<compile_context>
chip_gen: v7x
topology: tpu7x:2x2x1
jax: 0.10.0
libtpu: 0.0.40
codegen_flags: <defaults>
</compile_context>

<pallas_src>
import functools

import jax
import jax.numpy as jnp
from jax import lax
from jax.experimental import pallas as pl
from jax.experimental.pallas import tpu as pltpu

BP = 8     # padded batch (f32 sublane tile)
HP = 128   # padded feature / gate-block lane width (4 gates x 32 = 128 lanes)


def _rup(n, m):
    return ((n + m - 1) // m) * m


def _full_spec(shape):
    """Whole-array single-block BlockSpec (index_map ignores grid + prefetch args)."""
    zero = (0,) * len(shape)

    def idx(*_):
        return zero

    return pl.BlockSpec(shape, idx)


# ----------------------------------------------------------------------------
# Fused embedding-gather + LSTM (all layers, all timesteps) + head kernel
# ----------------------------------------------------------------------------
def _lstm_head_kernel(tok_ref, emb_ref, wih_ref, whh_ref, b_ref,
                      wfc_ref, bfc_ref, wc1_ref, bc1_ref,
                      wc2_ref, bc2_ref, wout_ref, bout_ref,
                      out_ref,
                      gx_ref, seq_ref, h_ref, c_ref,
                      *, n_layers, seq_len, batch, bp, hp):
    f32 = jnp.float32
    gw = hp // 4                     # per-gate lane width (== n_hidden here)

    # ---- fused embedding gather (token ids in SMEM, table resident in VMEM) ----
    seq_ref[...] = jnp.zeros((seq_len * bp, hp), f32)      # padded rows stay zero
    for t in range(seq_len):
        for bi in range(batch):
            tok = tok_ref[bi * seq_len + t]                # SMEM scalar
            seq_ref[pl.ds(t * bp + bi, 1), :] = emb_ref[pl.ds(tok, 1), :]

    # Lane mask selecting the "g" (cell candidate) gate for the fused activation:
    # sigmoid(x) = 0.5*tanh(0.5*x)+0.5  -> one EUP tanh covers all four gates.
    lane = lax.broadcasted_iota(jnp.int32, (bp, hp), 1)
    g_mask = (lane >= 2 * gw) & (lane < 3 * gw)

    for layer in range(n_layers):                          # static (n_layers small)
        # Hoisted input projection + bias for ALL timesteps in one matmul.
        gx_ref[...] = (jnp.dot(seq_ref[...], wih_ref[layer],
                               preferred_element_type=f32)
                       + b_ref[layer])                     # (T*Bp, hp)
        h_ref[...] = jnp.zeros((bp, hp), f32)              # init_hidden: zeros
        c_ref[...] = jnp.zeros((bp, gw), f32)
        last_layer = layer == n_layers - 1

        def step(t, carry):
            row = pl.multiple_of(t * bp, bp)
            # Single (bp,hp)@(hp,hp) MXU tile per step (gates packed to 4*gw lanes).
            gates = (gx_ref[pl.ds(row, bp), :]
                     + jnp.dot(h_ref[...], whh_ref[layer],
                               preferred_element_type=f32))            # (Bp, hp)
            th = jnp.tanh(jnp.where(g_mask, gates, 0.5 * gates))
            act = jnp.where(g_mask, th, 0.5 * th + 0.5)
            # PyTorch gate order (i, f, g, o), each gate in its own gw-lane block.
            i = act[:, 0 * gw:1 * gw]
            f = act[:, 1 * gw:2 * gw]
            g = act[:, 2 * gw:3 * gw]
            o = act[:, 3 * gw:4 * gw]
            c_new = f * c_ref[...] + i * g
            h_new = o * jnp.tanh(c_new)
            c_ref[...] = c_new
            h_ref[:, 0:gw] = h_new                 # lanes gw:hp stay zero forever
            if not last_layer:                     # next layer needs the sequence
                seq_ref[pl.ds(row, bp), 0:gw] = h_new
            return carry

        # Full unroll at small T; partial unroll keeps vreg pressure sane if T grows.
        lax.fori_loop(0, seq_len, step, 0,
                      unroll=True if seq_len <= 32 else 8)
        # nn.LSTM inter-layer dropout(0.2) and self.dropout(0.1): identity at inference.

    # ---- fused head: lstm_fc -> combined_fc1 -> combined_fc2 -> output_fc ----
    h_last = h_ref[...]                                    # lstm_out[:, -1] (padded)
    y = jnp.maximum(jnp.dot(h_last, wfc_ref[...], preferred_element_type=f32)
                    + bfc_ref[...], 0.0)
    y = jnp.maximum(jnp.dot(y, wc1_ref[...], preferred_element_type=f32)
                    + bc1_ref[...], 0.0)
    y = jnp.maximum(jnp.dot(y, wc2_ref[...], preferred_element_type=f32)
                    + bc2_ref[...], 0.0)
    y = jax.nn.sigmoid(jnp.dot(y, wout_ref[...], preferred_element_type=f32)
                       + bout_ref[...])
    out_ref[...] = y.astype(out_ref.dtype)


def lstm_head_pallas(tokens, params, *, n_layers, seq_len, batch, bp=BP, hp=HP):
    """tokens: (batch*seq_len,) int32, row-major (b, t) order."""
    weights = (params["emb"], params["wih"], params["whh"], params["b"],
               params["wfc"], params["bfc"], params["wc1"], params["bc1"],
               params["wc2"], params["bc2"], params["wout"], params["bout"])
    nop = params["wout"].shape[1]
    kernel = functools.partial(_lstm_head_kernel, n_layers=n_layers,
                               seq_len=seq_len, batch=batch, bp=bp, hp=hp)
    # NOTE: whole-sequence scratch is ~64 KB here; chunk the hoisted projection
    # over time (emit_pipeline / T-chunk grid) before seq_len grows large on v7x.
    return pl.pallas_call(
        kernel,
        out_shape=jax.ShapeDtypeStruct((bp, nop), jnp.float32),
        grid_spec=pltpu.PrefetchScalarGridSpec(
            num_scalar_prefetch=1,
            grid=(1,),
            in_specs=[_full_spec(w.shape) for w in weights],
            out_specs=_full_spec((bp, nop)),
            scratch_shapes=[
                pltpu.VMEM((seq_len * bp, hp), jnp.float32),   # all-step input gates
                pltpu.VMEM((seq_len * bp, hp), jnp.float32),   # layer in/out sequence
                pltpu.VMEM((bp, hp), jnp.float32),             # h (lanes 0:gw live)
                pltpu.VMEM((bp, hp // 4), jnp.float32),        # c
            ]),
        compiler_params=pltpu.CompilerParams(dimension_semantics=("arbitrary",)),
    )(tokens, *weights)


# ----------------------------------------------------------------------------
# Tiled matmul kernel (CNN branch): M-tiled grid, lane-dense (128x) output
# ----------------------------------------------------------------------------
def _matmul_kernel(x_ref, w_ref, b_ref, o_ref, *, activation):
    y = jnp.dot(x_ref[...], w_ref[...], preferred_element_type=jnp.float32)
    y = y + b_ref[...]
    if activation == "relu":
        y = jnp.maximum(y, 0.0)
    o_ref[...] = y.astype(o_ref.dtype)


def pallas_matmul(x, w, b, activation="none", block_m=1024):
    """act(x @ w + b), x:(M,K) w:(K,N) b:(N,).  Pads M/K/N, tiles M, slices back."""
    M, K = x.shape
    K2, N = w.shape
    assert K == K2
    Kp = _rup(K, 8)
    Np = _rup(N, 128)
    if M <= block_m:
        bm = _rup(max(M, 8), 8)
        Mp = bm
    else:
        bm = block_m
        Mp = _rup(M, bm)
    xp = x if (Mp, Kp) == (M, K) else jnp.zeros((Mp, Kp), x.dtype).at[:M, :K].set(x)
    wp = w if (Kp, Np) == (K, N) else jnp.zeros((Kp, Np), w.dtype).at[:K, :N].set(w)
    bp = jnp.zeros((1, Np), jnp.float32).at[0, :N].set(b)
    out = pl.pallas_call(
        functools.partial(_matmul_kernel, activation=activation),
        out_shape=jax.ShapeDtypeStruct((Mp, Np), jnp.float32),
        grid=(Mp // bm,),
        in_specs=[
            pl.BlockSpec((bm, Kp), lambda i: (i, 0)),
            pl.BlockSpec((Kp, Np), lambda i: (0, 0)),
            pl.BlockSpec((1, Np), lambda i: (0, 0)),
        ],
        out_specs=pl.BlockSpec((bm, Np), lambda i: (i, 0)),
        compiler_params=pltpu.CompilerParams(dimension_semantics=("parallel",)),
    )(xp, wp, bp)
    return out[:M, :N]


# ----------------------------------------------------------------------------
# CNN branch glue (dead code w.r.t. the PyTorch output; kept for fidelity)
# ----------------------------------------------------------------------------
def _im2col(x_nchw, k=3):
    """(B,C,H,W) -> (B*Ho*Wo, C*k*k), column order (cin, ki, kj) = PyTorch weight order."""
    B, C, H, W = x_nchw.shape
    Ho, Wo = H - k + 1, W - k + 1
    cols = []
    for ki in range(k):
        for kj in range(k):
            cols.append(x_nchw[:, :, ki:ki + Ho, kj:kj + Wo])
    p = jnp.stack(cols, axis=2)                                   # (B,C,k*k,Ho,Wo)
    p = p.transpose(0, 3, 4, 1, 2).reshape(B * Ho * Wo, C * k * k)
    return p, Ho, Wo


def conv3x3_relu(x_nchw, w, b):
    # TODO(synk): a direct Pallas conv kernel would avoid materializing im2col
    # patches in plain JAX; left as im2col since this branch does not feed `out`.
    B = x_nchw.shape[0]
    Cout, Cin, _, _ = w.shape
    p, Ho, Wo = _im2col(x_nchw, 3)
    wmat = w.reshape(Cout, Cin * 9).T                             # (Cin*9, Cout)
    y = pallas_matmul(p, wmat, b, activation="relu", block_m=1024)
    return y.reshape(B, Ho, Wo, Cout).transpose(0, 3, 1, 2)       # back to NCHW


def maxpool2(x):
    B, C, H, W = x.shape
    assert H % 2 == 0 and W % 2 == 0, "odd spatial dims: PyTorch floor-mode pool differs"
    return x.reshape(B, C, H // 2, 2, W // 2, 2).max(axis=(3, 5))


def cnn_forward(params, cnn_inp):
    """Conv stack + cnn_fc.  In the PyTorch forward this value is computed but
    never used by the returned output; it is exercised separately here."""
    x = maxpool2(conv3x3_relu(cnn_inp, params["conv1_w"], params["conv1_b"]))
    x = maxpool2(conv3x3_relu(x, params["conv2_w"], params["conv2_b"]))
    x = maxpool2(conv3x3_relu(x, params["conv3_w"], params["conv3_b"]))
    x = maxpool2(conv3x3_relu(x, params["conv4_w"], params["conv4_b"]))
    x = x.reshape(x.shape[0], 5 * 2 * 128)        # NCHW flatten == x.view(-1, 5*2*128)
    # cnn_dropout(0.1): identity at inference.
    return pallas_matmul(x, params["cnn_fc_w"], params["cnn_fc_b"], activation="relu")


# ----------------------------------------------------------------------------
# Parameters: raw (PyTorch layout) and packed (padded / pre-transposed for TPU)
# ----------------------------------------------------------------------------
def init_raw_params(key, vocab_size, emb_dim, n_hidden, n_layers, n_out):
    def u(k, shape, scale=0.1):
        return jax.random.uniform(k, shape, jnp.float32, -scale, scale)

    ks = iter(jax.random.split(key, 32))
    raw = {"emb": jax.random.normal(next(ks), (vocab_size, emb_dim), jnp.float32) * 0.1,
           "lstm": []}
    for layer in range(n_layers):
        din = emb_dim if layer == 0 else n_hidden
        raw["lstm"].append((u(next(ks), (4 * n_hidden, din)),       # w_ih (PyTorch)
                            u(next(ks), (4 * n_hidden, n_hidden)),  # w_hh
                            u(next(ks), (4 * n_hidden,)),           # b_ih
                            u(next(ks), (4 * n_hidden,))))          # b_hh
    raw["lstm_fc_w"] = u(next(ks), (128, n_hidden)); raw["lstm_fc_b"] = u(next(ks), (128,))
    raw["conv1_w"] = u(next(ks), (32, 3, 3, 3));     raw["conv1_b"] = u(next(ks), (32,))
    raw["conv2_w"] = u(next(ks), (64, 32, 3, 3));    raw["conv2_b"] = u(next(ks), (64,))
    raw["conv3_w"] = u(next(ks), (128, 64, 3, 3));   raw["conv3_b"] = u(next(ks), (128,))
    raw["conv4_w"] = u(next(ks), (128, 128, 3, 3));  raw["conv4_b"] = u(next(ks), (128,))
    raw["cnn_fc_w"] = u(next(ks), (512, 5 * 2 * 128)); raw["cnn_fc_b"] = u(next(ks), (512,))
    raw["comb1_w"] = u(next(ks), (256, 128));        raw["comb1_b"] = u(next(ks), (256,))
    raw["comb2_w"] = u(next(ks), (128, 256));        raw["comb2_b"] = u(next(ks), (128,))
    raw["out_w"]   = u(next(ks), (n_out, 128));      raw["out_b"]   = u(next(ks), (n_out,))
    return raw


def pack_params(raw, *, n_hidden, n_layers, n_out, hp=HP):
    """Pad/transpose weights once: gates packed into hp lanes (gw = hp//4 per gate)."""
    H = n_hidden
    gw = hp // 4
    E = raw["emb"].shape[1]
    assert H <= gw and E <= hp, "config exceeds packed gate/feature layout"
    p = {}
    vocab = raw["emb"].shape[0]
    vocab_p = _rup(vocab, 8)
    p["emb"] = jnp.zeros((vocab_p, hp), jnp.float32).at[:vocab, :E].set(raw["emb"])
    wih_l, whh_l, b_l = [], [], []
    for layer in range(n_layers):
        w_ih, w_hh, b_ih, b_hh = raw["lstm"][layer]
        din = w_ih.shape[1]
        wih = jnp.zeros((hp, hp), jnp.float32)
        whh = jnp.zeros((hp, hp), jnp.float32)
        bb = jnp.zeros((hp,), jnp.float32)
        bsum = b_ih + b_hh                                  # pre-summed biases
        for g in range(4):                                  # compressed gate blocks
            wih = wih.at[:din, g * gw:g * gw + H].set(w_ih[g * H:(g + 1) * H, :].T)
            whh = whh.at[:H, g * gw:g * gw + H].set(w_hh[g * H:(g + 1) * H, :].T)
            bb = bb.at[g * gw:g * gw + H].set(bsum[g * H:(g + 1) * H])
        wih_l.append(wih); whh_l.append(whh); b_l.append(bb.reshape(1, hp))
    p["wih"] = jnp.stack(wih_l)                             # (n_layers, hp, hp)
    p["whh"] = jnp.stack(whh_l)
    p["b"] = jnp.stack(b_l)                                 # (n_layers, 1, hp)
    p["wfc"] = jnp.zeros((hp, 128), jnp.float32).at[:H, :].set(raw["lstm_fc_w"].T)
    p["bfc"] = raw["lstm_fc_b"].reshape(1, 128)
    p["wc1"] = raw["comb1_w"].T;  p["bc1"] = raw["comb1_b"].reshape(1, 256)
    p["wc2"] = raw["comb2_w"].T;  p["bc2"] = raw["comb2_b"].reshape(1, 128)
    nop = _rup(n_out, 128)
    p["wout"] = jnp.zeros((128, nop), jnp.float32).at[:, :n_out].set(raw["out_w"].T)
    p["bout"] = jnp.zeros((1, nop), jnp.float32).at[0, :n_out].set(raw["out_b"])
    for k in ("conv1_w", "conv1_b", "conv2_w", "conv2_b",
              "conv3_w", "conv3_b", "conv4_w", "conv4_b"):
        p[k] = raw[k]
    p["cnn_fc_w"] = raw["cnn_fc_w"].T                       # (1280, 512)
    p["cnn_fc_b"] = raw["cnn_fc_b"]
    return p


# ----------------------------------------------------------------------------
# Model forward (matches the PyTorch forward: returns only `out`)
# ----------------------------------------------------------------------------
def model_forward(params, lstm_inp, cnn_inp=None, *, n_hidden, n_layers, n_out,
                  bp=BP, hp=HP):
    del cnn_inp, n_hidden  # As in PyTorch, the CNN branch never feeds `out`
    #                        (combined_inp = lstm_out) -> dead code under jit.
    B, T = lstm_inp.shape
    tokens = lstm_inp.astype(jnp.int32).reshape(-1)         # (B*T,), (b, t) order
    out_p = lstm_head_pallas(tokens, params, n_layers=n_layers, seq_len=T,
                             batch=B, bp=bp, hp=hp)
    return out_p[:B, :n_out]


# ----------------------------------------------------------------------------
# Pure-JAX reference (PyTorch-layout weights) for correctness checking
# ----------------------------------------------------------------------------
def ref_forward(raw, lstm_inp, *, n_hidden, n_layers):
    H = n_hidden
    x = raw["emb"][lstm_inp.astype(jnp.int32)]
    B, T, _ = x.shape
    seq = x
    for layer in range(n_layers):
        w_ih, w_hh, b_ih, b_hh = raw["lstm"][layer]
        h = jnp.zeros((B, H), jnp.float32)
        c = jnp.zeros((B, H), jnp.float32)
        outs = []
        for t in range(T):
            gates = seq[:, t] @ w_ih.T + h @ w_hh.T + b_ih + b_hh
            i = jax.nn.sigmoid(gates[:, 0 * H:1 * H])
            f = jax.nn.sigmoid(gates[:, 1 * H:2 * H])
            g = jnp.tanh(gates[:, 2 * H:3 * H])
            o = jax.nn.sigmoid(gates[:, 3 * H:4 * H])
            c = f * c + i * g
            h = o * jnp.tanh(c)
            outs.append(h)
        seq = jnp.stack(outs, axis=1)
    last = seq[:, -1]
    y = jnp.maximum(last @ raw["lstm_fc_w"].T + raw["lstm_fc_b"], 0.0)
    y = jnp.maximum(y @ raw["comb1_w"].T + raw["comb1_b"], 0.0)
    y = jnp.maximum(y @ raw["comb2_w"].T + raw["comb2_b"], 0.0)
    return jax.nn.sigmoid(y @ raw["out_w"].T + raw["out_b"])


if __name__ == "__main__":
    vocab_size, emb_dim, n_hidden, n_layers, n_out = 50, 32, 32, 2, 8
    B, T = 2, 8
    H_img, W_img = 110, 62      # yields the 5x2x128 feature map the flatten expects

    key = jax.random.PRNGKey(0)
    k_par, k_tok, k_img = jax.random.split(key, 3)
    raw = init_raw_params(k_par, vocab_size, emb_dim, n_hidden, n_layers, n_out)
    params = pack_params(raw, n_hidden=n_hidden, n_layers=n_layers, n_out=n_out)
    lstm_inp = jax.random.randint(k_tok, (B, T), 0, vocab_size, dtype=jnp.int32)
    cnn_inp = jax.random.normal(k_img, (B, 3, H_img, W_img), jnp.float32)

    fwd = jax.jit(functools.partial(model_forward, n_hidden=n_hidden,
                                    n_layers=n_layers, n_out=n_out))
    out = fwd(params, lstm_inp, cnn_inp)
    jax.block_until_ready(out)
    assert out.shape == (B, n_out)
    assert bool(jnp.all((out >= 0.0) & (out <= 1.0)))

    # correctness against pure-JAX reference of the same forward
    ref = ref_forward(raw, lstm_inp, n_hidden=n_hidden, n_layers=n_layers)
    assert bool(jnp.allclose(out, ref, atol=1e-3, rtol=1e-3)), (out, ref)

    # exercise the (dead-code) CNN branch kernels once for fidelity/validation
    cnn_out = jax.jit(cnn_forward)(params, cnn_inp)
    jax.block_until_ready(cnn_out)
    assert cnn_out.shape == (B, 512) and bool(jnp.all(jnp.isfinite(cnn_out)))

    print("KERNEL_OK")
</pallas_src>

<mosaic_0001>
module attributes {stable_mosaic.version = 11 : i64} {
  func.func @_lstm_head_kernel(%arg0: i32, %arg1: memref<16xi32, #tpu.memory_space<smem>>, %arg2: memref<56x128xf32, #tpu.memory_space<vmem>>, %arg3: memref<2x128x128xf32, #tpu.memory_space<vmem>>, %arg4: memref<2x128x128xf32, #tpu.memory_space<vmem>>, %arg5: memref<2x1x128xf32, #tpu.memory_space<vmem>>, %arg6: memref<128x128xf32, #tpu.memory_space<vmem>>, %arg7: memref<1x128xf32, #tpu.memory_space<vmem>>, %arg8: memref<128x256xf32, #tpu.memory_space<vmem>>, %arg9: memref<1x256xf32, #tpu.memory_space<vmem>>, %arg10: memref<256x128xf32, #tpu.memory_space<vmem>>, %arg11: memref<1x128xf32, #tpu.memory_space<vmem>>, %arg12: memref<128x128xf32, #tpu.memory_space<vmem>>, %arg13: memref<1x128xf32, #tpu.memory_space<vmem>>, %arg14: memref<8x128xf32, #tpu.memory_space<vmem>>, %arg15: memref<64x128xf32, #tpu.memory_space<vmem>>, %arg16: memref<64x128xf32, #tpu.memory_space<vmem>>, %arg17: memref<8x128xf32, #tpu.memory_space<vmem>>, %arg18: memref<8x32xf32, #tpu.memory_space<vmem>>) attributes {dimension_semantics = [#tpu.dimension_semantics<arbitrary>], iteration_bounds = array<i64: 1>, scalar_prefetch = 1 : i64, scratch_operands = 4 : i64, tpu.core_type = #tpu.core_type<tc>, window_params = [{pipeline_mode = #tpu.pipeline_mode<synchronous>, transform_indices = @transform_0, window_bounds = array<i64: 56, 128>}, {pipeline_mode = #tpu.pipeline_mode<synchronous>, transform_indices = @transform_1, window_bounds = array<i64: 2, 128, 128>}, {pipeline_mode = #tpu.pipeline_mode<synchronous>, transform_indices = @transform_2, window_bounds = array<i64: 2, 128, 128>}, {pipeline_mode = #tpu.pipeline_mode<synchronous>, transform_indices = @transform_3, window_bounds = array<i64: 2, 1, 128>}, {pipeline_mode = #tpu.pipeline_mode<synchronous>, transform_indices = @transform_4, window_bounds = array<i64: 128, 128>}, {pipeline_mode = #tpu.pipeline_mode<synchronous>, transform_indices = @transform_5, window_bounds = array<i64: 1, 128>}, {pipeline_mode = #tpu.pipeline_mode<synchronous>, transform_indices = @transform_6, window_bounds = array<i64: 128, 256>}, {pipeline_mode = #tpu.pipeline_mode<synchronous>, transform_indices = @transform_7, window_bounds = array<i64: 1, 256>}, {pipeline_mode = #tpu.pipeline_mode<synchronous>, transform_indices = @transform_8, window_bounds = array<i64: 256, 128>}, {pipeline_mode = #tpu.pipeline_mode<synchronous>, transform_indices = @transform_9, window_bounds = array<i64: 1, 128>}, {pipeline_mode = #tpu.pipeline_mode<synchronous>, transform_indices = @transform_10, window_bounds = array<i64: 128, 128>}, {pipeline_mode = #tpu.pipeline_mode<synchronous>, transform_indices = @transform_11, window_bounds = array<i64: 1, 128>}, {pipeline_mode = #tpu.pipeline_mode<synchronous>, transform_indices = @transform_12, window_bounds = array<i64: 8, 128>}]} {
    %cst = arith.constant 0.000000e+00 : f32
    %0 = vector.broadcast %cst : f32 to vector<64x128xf32>
    %c0 = arith.constant 0 : index
    %c0_0 = arith.constant 0 : index
    %1 = vector.load %arg16[%c0, %c0_0] : memref<64x128xf32, #tpu.memory_space<vmem>>, vector<64x128xf32>
    tpu.vector_store %arg16[%c0, %c0_0], %0 {strides = array<i32>} : memref<64x128xf32, #tpu.memory_space<vmem>>, vector<64x128xf32>,
    %c0_1 = arith.constant 0 : index
    %2 = memref.load %arg1[%c0_1] : memref<16xi32, #tpu.memory_space<smem>>
    %3 = arith.index_cast %2 : i32 to index
    %c0_2 = arith.constant 0 : index
    %4 = vector.load %arg2[%3, %c0_2] : memref<56x128xf32, #tpu.memory_space<vmem>>, vector<1x128xf32>
    %c0_3 = arith.constant 0 : index
    %c0_4 = arith.constant 0 : index
    %5 = vector.load %arg16[%c0_3, %c0_4] : memref<64x128xf32, #tpu.memory_space<vmem>>, vector<1x128xf32>
    tpu.vector_store %arg16[%c0_3, %c0_4], %4 {strides = array<i32>} : memref<64x128xf32, #tpu.memory_space<vmem>>, vector<1x128xf32>,
    %c8 = arith.constant 8 : index
    %6 = memref.load %arg1[%c8] : memref<16xi32, #tpu.memory_space<smem>>
    %7 = arith.index_cast %6 : i32 to index
    %c0_5 = arith.constant 0 : index
    %8 = vector.load %arg2[%7, %c0_5] : memref<56x128xf32, #tpu.memory_space<vmem>>, vector<1x128xf32>
    %c1 = arith.constant 1 : index
    %c0_6 = arith.constant 0 : index
    %9 = vector.load %arg16[%c1, %c0_6] : memref<64x128xf32, #tpu.memory_space<vmem>>, vector<1x128xf32>
    tpu.vector_store %arg16[%c1, %c0_6], %8 {strides = array<i32>} : memref<64x128xf32, #tpu.memory_space<vmem>>, vector<1x128xf32>,
    %c1_7 = arith.constant 1 : index
    %10 = memref.load %arg1[%c1_7] : memref<16xi32, #tpu.memory_space<smem>>
    %11 = arith.index_cast %10 : i32 to index
    %c0_8 = arith.constant 0 : index
    %12 = vector.load %arg2[%11, %c0_8] : memref<56x128xf32, #tpu.memory_space<vmem>>, vector<1x128xf32>
    %c8_9 = arith.constant 8 : index
    %c0_10 = arith.constant 0 : index
    %13 = vector.load %arg16[%c8_9, %c0_10] : memref<64x128xf32, #tpu.memory_space<vmem>>, vector<1x128xf32>
    tpu.vector_store %arg16[%c8_9, %c0_10], %12 {strides = array<i32>} : memref<64x128xf32, #tpu.memory_space<vmem>>, vector<1x128xf32>,
    %c9 = arith.constant 9 : index
    %14 = memref.load %arg1[%c9] : memref<16xi32, #tpu.memory_space<smem>>
    %15 = arith.index_cast %14 : i32 to index
    %c0_11 = arith.constant 0 : index
    %16 = vector.load %arg2[%15, %c0_11] : memref<56x128xf32, #tpu.memory_space<vmem>>, vector<1x128xf32>
    %c9_12 = arith.constant 9 : index
    %c0_13 = arith.constant 0 : index
    %17 = vector.load %arg16[%c9_12, %c0_13] : memref<64x128xf32, #tpu.memory_space<vmem>>, vector<1x128xf32>
    tpu.vector_store %arg16[%c9_12, %c0_13], %16 {strides = array<i32>} : memref<64x128xf32, #tpu.memory_space<vmem>>, vector<1x128xf32>,
    %c2 = arith.constant 2 : index
    %18 = memref.load %arg1[%c2] : memref<16xi32, #tpu.memory_space<smem>>
    %19 = arith.index_cast %18 : i32 to index
    %c0_14 = arith.constant 0 : index
    %20 = vector.load %arg2[%19, %c0_14] : memref<56x128xf32, #tpu.memory_space<vmem>>, vector<1x128xf32>
    %c16 = arith.constant 16 : index
    %c0_15 = arith.constant 0 : index
    %21 = vector.load %arg16[%c16, %c0_15] : memref<64x128xf32, #tpu.memory_space<vmem>>, vector<1x128xf32>
    tpu.vector_store %arg16[%c16, %c0_15], %20 {strides = array<i32>} : memref<64x128xf32, #tpu.memory_space<vmem>>, vector<1x128xf32>,
    %c10 = arith.constant 10 : index
    %22 = memref.load %arg1[%c10] : memref<16xi32, #tpu.memory_space<smem>>
    %23 = arith.index_cast %22 : i32 to index
    %c0_16 = arith.constant 0 : index
    %24 = vector.load %arg2[%23, %c0_16] : memref<56x128xf32, #tpu.memory_space<vmem>>, vector<1x128xf32>
    %c17 = arith.constant 17 : index
    %c0_17 = arith.constant 0 : index
    %25 = vector.load %arg16[%c17, %c0_17] : memref<64x128xf32, #tpu.memory_space<vmem>>, vector<1x128xf32>
    tpu.vector_store %arg16[%c17, %c0_17], %24 {strides = array<i32>} : memref<64x128xf32, #tpu.memory_space<vmem>>, vector<1x128xf32>,
    %c3 = arith.constant 3 : index
    %26 = memref.load %arg1[%c3] : memref<16xi32, #tpu.memory_space<smem>>
    %27 = arith.index_cast %26 : i32 to index
    %c0_18 = arith.constant 0 : index
    %28 = vector.load %arg2[%27, %c0_18] : memref<56x128xf32, #tpu.memory_space<vmem>>, vector<1x128xf32>
    %c24 = arith.constant 24 : index
    %c0_19 = arith.constant 0 : index
    %29 = vector.load %arg16[%c24, %c0_19] : memref<64x128xf32, #tpu.memory_space<vmem>>, vector<1x128xf32>
    tpu.vector_store %arg16[%c24, %c0_19], %28 {strides = array<i32>} : memref<64x128xf32, #tpu.memory_space<vmem>>, vector<1x128xf32>,
    %c11 = arith.constant 11 : index
    %30 = memref.load %arg1[%c11] : memref<16xi32, #tpu.memory_space<smem>>
    %31 = arith.index_cast %30 : i32 to index
    %c0_20 = arith.constant 0 : index
    %32 = vector.load %arg2[%31, %c0_20] : memref<56x128xf32, #tpu.memory_space<vmem>>, vector<1x128xf32>
    %c25 = arith.constant 25 : index
    %c0_21 = arith.constant 0 : index
    %33 = vector.load %arg16[%c25, %c0_21] : memref<64x128xf32, #tpu.memory_space<vmem>>, vector<1x128xf32>
    tpu.vector_store %arg16[%c25, %c0_21], %32 {strides = array<i32>} : memref<64x128xf32, #tpu.memory_space<vmem>>, vector<1x128xf32>,
    %c4 = arith.constant 4 : index
    %34 = memref.load %arg1[%c4] : memref<16xi32, #tpu.memory_space<smem>>
    %35 = arith.index_cast %34 : i32 to index
    %c0_22 = arith.constant 0 : index
    %36 = vector.load %arg2[%35, %c0_22] : memref<56x128xf32, #tpu.memory_space<vmem>>, vector<1x128xf32>
    %c32 = arith.constant 32 : index
    %c0_23 = arith.constant 0 : index
    %37 = vector.load %arg16[%c32, %c0_23] : memref<64x128xf32, #tpu.memory_space<vmem>>, vector<1x128xf32>
    tpu.vector_store %arg16[%c32, %c0_23], %36 {strides = array<i32>} : memref<64x128xf32, #tpu.memory_space<vmem>>, vector<1x128xf32>,
    %c12 = arith.constant 12 : index
    %38 = memref.load %arg1[%c12] : memref<16xi32, #tpu.memory_space<smem>>
    %39 = arith.index_cast %38 : i32 to index
    %c0_24 = arith.constant 0 : index
    %40 = vector.load %arg2[%39, %c0_24] : memref<56x128xf32, #tpu.memory_space<vmem>>, vector<1x128xf32>
    %c33 = arith.constant 33 : index
    %c0_25 = arith.constant 0 : index
    %41 = vector.load %arg16[%c33, %c0_25] : memref<64x128xf32, #tpu.memory_space<vmem>>, vector<1x128xf32>
    tpu.vector_store %arg16[%c33, %c0_25], %40 {strides = array<i32>} : memref<64x128xf32, #tpu.memory_space<vmem>>, vector<1x128xf32>,
    %c5 = arith.constant 5 : index
    %42 = memref.load %arg1[%c5] : memref<16xi32, #tpu.memory_space<smem>>
    %43 = arith.index_cast %42 : i32 to index
    %c0_26 = arith.constant 0 : index
    %44 = vector.load %arg2[%43, %c0_26] : memref<56x128xf32, #tpu.memory_space<vmem>>, vector<1x128xf32>
    %c40 = arith.constant 40 : index
    %c0_27 = arith.constant 0 : index
    %45 = vector.load %arg16[%c40, %c0_27] : memref<64x128xf32, #tpu.memory_space<vmem>>, vector<1x128xf32>
    tpu.vector_store %arg16[%c40, %c0_27], %44 {strides = array<i32>} : memref<64x128xf32, #tpu.memory_space<vmem>>, vector<1x128xf32>,
    %c13 = arith.constant 13 : index
    %46 = memref.load %arg1[%c13] : memref<16xi32, #tpu.memory_space<smem>>
    %47 = arith.index_cast %46 : i32 to index
    %c0_28 = arith.constant 0 : index
    %48 = vector.load %arg2[%47, %c0_28] : memref<56x128xf32, #tpu.memory_space<vmem>>, vector<1x128xf32>
    %c41 = arith.constant 41 : index
    %c0_29 = arith.constant 0 : index
    %49 = vector.load %arg16[%c41, %c0_29] : memref<64x128xf32, #tpu.memory_space<vmem>>, vector<1x128xf32>
    tpu.vector_store %arg16[%c41, %c0_29], %48 {strides = array<i32>} : memref<64x128xf32, #tpu.memory_space<vmem>>, vector<1x128xf32>,
    %c6 = arith.constant 6 : index
    %50 = memref.load %arg1[%c6] : memref<16xi32, #tpu.memory_space<smem>>
    %51 = arith.index_cast %50 : i32 to index
    %c0_30 = arith.constant 0 : index
    %52 = vector.load %arg2[%51, %c0_30] : memref<56x128xf32, #tpu.memory_space<vmem>>, vector<1x128xf32>
    %c48 = arith.constant 48 : index
    %c0_31 = arith.constant 0 : index
    %53 = vector.load %arg16[%c48, %c0_31] : memref<64x128xf32, #tpu.memory_space<vmem>>, vector<1x128xf32>
    tpu.vector_store %arg16[%c48, %c0_31], %52 {strides = array<i32>} : memref<64x128xf32, #tpu.memory_space<vmem>>, vector<1x128xf32>,
    %c14 = arith.constant 14 : index
    %54 = memref.load %arg1[%c14] : memref<16xi32, #tpu.memory_space<smem>>
    %55 = arith.index_cast %54 : i32 to index
    %c0_32 = arith.constant 0 : index
    %56 = vector.load %arg2[%55, %c0_32] : memref<56x128xf32, #tpu.memory_space<vmem>>, vector<1x128xf32>
    %c49 = arith.constant 49 : index
    %c0_33 = arith.constant 0 : index
    %57 = vector.load %arg16[%c49, %c0_33] : memref<64x128xf32, #tpu.memory_space<vmem>>, vector<1x128xf32>
    tpu.vector_store %arg16[%c49, %c0_33], %56 {strides = array<i32>} : memref<64x128xf32, #tpu.memory_space<vmem>>, vector<1x128xf32>,
    %c7 = arith.constant 7 : index
    %58 = memref.load %arg1[%c7] : memref<16xi32, #tpu.memory_space<smem>>
    %59 = arith.index_cast %58 : i32 to index
    %c0_34 = arith.constant 0 : index
    %60 = vector.load %arg2[%59, %c0_34] : memref<56x128xf32, #tpu.memory_space<vmem>>, vector<1x128xf32>
    %c56 = arith.constant 56 : index
    %c0_35 = arith.constant 0 : index
    %61 = vector.load %arg16[%c56, %c0_35] : memref<64x128xf32, #tpu.memory_space<vmem>>, vector<1x128xf32>
    tpu.vector_store %arg16[%c56, %c0_35], %60 {strides = array<i32>} : memref<64x128xf32, #tpu.memory_space<vmem>>, vector<1x128xf32>,
    %c15 = arith.constant 15 : index
    %62 = memref.load %arg1[%c15] : memref<16xi32, #tpu.memory_space<smem>>
    %63 = arith.index_cast %62 : i32 to index
    %c0_36 = arith.constant 0 : index
    %64 = vector.load %arg2[%63, %c0_36] : memref<56x128xf32, #tpu.memory_space<vmem>>, vector<1x128xf32>
    %c57 = arith.constant 57 : index
    %c0_37 = arith.constant 0 : index
    %65 = vector.load %arg16[%c57, %c0_37] : memref<64x128xf32, #tpu.memory_space<vmem>>, vector<1x128xf32>
    tpu.vector_store %arg16[%c57, %c0_37], %64 {strides = array<i32>} : memref<64x128xf32, #tpu.memory_space<vmem>>, vector<1x128xf32>,
    %66 = tpu.iota {dimensions = array<i32: 1>} : vector<8x128xi32>
    %c64_i32 = arith.constant 64 : i32
    %67 = vector.broadcast %c64_i32 : i32 to vector<8x128xi32>
    %68 = arith.cmpi sge, %66, %67 : vector<8x128xi32>
    %c96_i32 = arith.constant 96 : i32
    %69 = vector.broadcast %c96_i32 : i32 to vector<8x128xi32>
    %70 = arith.cmpi slt, %66, %69 : vector<8x128xi32>
    %71 = arith.andi %68, %70 : vector<8x128xi1>
    %c0_38 = arith.constant 0 : index
    %c0_39 = arith.constant 0 : index
    %72 = vector.load %arg16[%c0_38, %c0_39] : memref<64x128xf32, #tpu.memory_space<vmem>>, vector<64x128xf32>
    %c0_40 = arith.constant 0 : index
    %c0_41 = arith.constant 0 : index
    %c0_42 = arith.constant 0 : index
    %73 = vector.load %arg3[%c0_40, %c0_41, %c0_42] : memref<2x128x128xf32, #tpu.memory_space<vmem>>, vector<1x128x128xf32>
    %74 = vector.shape_cast %73 : vector<1x128x128xf32> to vector<128x128xf32>
    %cst_43 = arith.constant dense<0.000000e+00> : vector<64x128xf32>
    %75 = tpu.matmul %72, %74, %cst_43 {dimension_numbers = #tpu.dot_dimension_numbers<[1], [0], [0], [1], [0, 0, 1, 1], [], []>} : vector<64x128xf32>, vector<128x128xf32>, vector<64x128xf32> -> vector<64x128xf32>
    %c0_44 = arith.constant 0 : index
    %c0_45 = arith.constant 0 : index
    %c0_46 = arith.constant 0 : index
    %76 = vector.load %arg5[%c0_44, %c0_45, %c0_46] : memref<2x1x128xf32, #tpu.memory_space<vmem>>, vector<1x1x128xf32>
    %77 = vector.shape_cast %76 : vector<1x1x128xf32> to vector<1x128xf32>
    %78 = vector.broadcast %77 : vector<1x128xf32> to vector<64x128xf32>
    %79 = arith.addf %75, %78 : vector<64x128xf32>
    %c0_47 = arith.constant 0 : index
    %c0_48 = arith.constant 0 : index
    %80 = vector.load %arg15[%c0_47, %c0_48] : memref<64x128xf32, #tpu.memory_space<vmem>>, vector<64x128xf32>
    tpu.vector_store %arg15[%c0_47, %c0_48], %79 {strides = array<i32>} : memref<64x128xf32, #tpu.memory_space<vmem>>, vector<64x128xf32>,
    %cst_49 = arith.constant 0.000000e+00 : f32
    %81 = vector.broadcast %cst_49 : f32 to vector<8x128xf32>
    %c0_50 = arith.constant 0 : index
    %c0_51 = arith.constant 0 : index
    %82 = vector.load %arg17[%c0_50, %c0_51] : memref<8x128xf32, #tpu.memory_space<vmem>>, vector<8x128xf32>
    tpu.vector_store %arg17[%c0_50, %c0_51], %81 {strides = array<i32>} : memref<8x128xf32, #tpu.memory_space<vmem>>, vector<8x128xf32>,
    %cst_52 = arith.constant 0.000000e+00 : f32
    %83 = vector.broadcast %cst_52 : f32 to vector<8x32xf32>
    %c0_53 = arith.constant 0 : index
    %c0_54 = arith.constant 0 : index
    %84 = vector.load %arg18[%c0_53, %c0_54] : memref<8x32xf32, #tpu.memory_space<vmem>>, vector<8x32xf32>
    tpu.vector_store %arg18[%c0_53, %c0_54], %83 {strides = array<i32>} : memref<8x32xf32, #tpu.memory_space<vmem>>, vector<8x32xf32>,
    %c0_i32 = arith.constant 0 : i32
    %c8_i32 = arith.constant 8 : i32
    %85 = arith.muli %c0_i32, %c8_i32 : i32
    %86 = tpu.assume_multiple %85, 8 : i32
    %87 = arith.index_cast %86 : i32 to index
    %c0_55 = arith.constant 0 : index
    %88 = vector.load %arg15[%87, %c0_55] : memref<64x128xf32, #tpu.memory_space<vmem>>, vector<8x128xf32>
    %c0_56 = arith.constant 0 : index
    %c0_57 = arith.constant 0 : index
    %89 = vector.load %arg17[%c0_56, %c0_57] : memref<8x128xf32, #tpu.memory_space<vmem>>, vector<8x128xf32>
    %c0_58 = arith.constant 0 : index
    %c0_59 = arith.constant 0 : index
    %c0_60 = arith.constant 0 : index
    %90 = vector.load %arg4[%c0_58, %c0_59, %c0_60] : memref<2x128x128xf32, #tpu.memory_space<vmem>>, vector<1x128x128xf32>
    %91 = vector.shape_cast %90 : vector<1x128x128xf32> to vector<128x128xf32>
    %cst_61 = arith.constant dense<0.000000e+00> : vector<8x128xf32>
    %92 = tpu.matmul %89, %91, %cst_61 {dimension_numbers = #tpu.dot_dimension_numbers<[1], [0], [0], [1], [0, 0, 1, 1], [], []>} : vector<8x128xf32>, vector<128x128xf32>, vector<8x128xf32> -> vector<8x128xf32>
    %93 = arith.addf %88, %92 : vector<8x128xf32>
    %cst_62 = arith.constant 5.000000e-01 : f32
    %94 = vector.broadcast %cst_62 : f32 to vector<8x128xf32>
    %95 = arith.mulf %94, %93 : vector<8x128xf32>
    %96 = arith.select %71, %93, %95 : vector<8x128xi1>, vector<8x128xf32>
    %97 = math.tanh %96 : vector<8x128xf32>
    %cst_63 = arith.constant 5.000000e-01 : f32
    %98 = vector.broadcast %cst_63 : f32 to vector<8x128xf32>
    %99 = arith.mulf %98, %97 : vector<8x128xf32>
    %cst_64 = arith.constant 5.000000e-01 : f32
    %100 = vector.broadcast %cst_64 : f32 to vector<8x128xf32>
    %101 = arith.addf %99, %100 : vector<8x128xf32>
    %102 = arith.select %71, %97, %101 : vector<8x128xi1>, vector<8x128xf32>
    %103 = vector.extract_strided_slice %102 {offsets = [0, 0], sizes = [8, 32], strides = [1, 1]} : vector<8x128xf32> to vector<8x32xf32>
    %104 = vector.extract_strided_slice %102 {offsets = [0, 32], sizes = [8, 32], strides = [1, 1]} : vector<8x128xf32> to vector<8x32xf32>
    %105 = vector.extract_strided_slice %102 {offsets = [0, 64], sizes = [8, 32], strides = [1, 1]} : vector<8x128xf32> to vector<8x32xf32>
    %106 = vector.extract_strided_slice %102 {offsets = [0, 96], sizes = [8, 32], strides = [1, 1]} : vector<8x128xf32> to vector<8x32xf32>
    %c0_65 = arith.constant 0 : index
    %c0_66 = arith.constant 0 : index
    %107 = vector.load %arg18[%c0_65, %c0_66] : memref<8x32xf32, #tpu.memory_space<vmem>>, vector<8x32xf32>
    %108 = arith.mulf %104, %107 : vector<8x32xf32>
    %109 = arith.mulf %103, %105 : vector<8x32xf32>
    %110 = arith.addf %108, %109 : vector<8x32xf32>
    %111 = math.tanh %110 : vector<8x32xf32>
    %112 = arith.mulf %106, %111 : vector<8x32xf32>
    %c0_67 = arith.constant 0 : index
    %c0_68 = arith.constant 0 : index
    %113 = vector.load %arg18[%c0_67, %c0_68] : memref<8x32xf32, #tpu.memory_space<vmem>>, vector<8x32xf32>
    tpu.vector_store %arg18[%c0_67, %c0_68], %110 {strides = array<i32>} : memref<8x32xf32, #tpu.memory_space<vmem>>, vector<8x32xf32>,
    %c0_69 = arith.constant 0 : index
    %c0_70 = arith.constant 0 : index
    %114 = vector.load %arg17[%c0_69, %c0_70] : memref<8x128xf32, #tpu.memory_space<vmem>>, vector<8x32xf32>
    tpu.vector_store %arg17[%c0_69, %c0_70], %112 {strides = array<i32>} : memref<8x128xf32, #tpu.memory_space<vmem>>, vector<8x32xf32>,
    %115 = arith.index_cast %86 : i32 to index
    %c0_71 = arith.constant 0 : index
    %116 = vector.load %arg16[%115, %c0_71] : memref<64x128xf32, #tpu.memory_space<vmem>>, vector<8x32xf32>
    tpu.vector_store %arg16[%115, %c0_71], %112 {strides = array<i32>} : memref<64x128xf32, #tpu.memory_space<vmem>>, vector<8x32xf32>,
    %c1_i32 = arith.constant 1 : i32
    %c8_i32_72 = arith.constant 8 : i32
    %117 = arith.muli %c1_i32, %c8_i32_72 : i32
    %118 = tpu.assume_multiple %117, 8 : i32
    %119 = arith.index_cast %118 : i32 to index
    %c0_73 = arith.constant 0 : index
    %120 = vector.load %arg15[%119, %c0_73] : memref<64x128xf32, #tpu.memory_space<vmem>>, vector<8x128xf32>
    %c0_74 = arith.constant 0 : index
    %c0_75 = arith.constant 0 : index
    %121 = vector.load %arg17[%c0_74, %c0_75] : memref<8x128xf32, #tpu.memory_space<vmem>>, vector<8x128xf32>
    %c0_76 = arith.constant 0 : index
    %c0_77 = arith.constant 0 : index
    %c0_78 = arith.constant 0 : index
    %122 = vector.load %arg4[%c0_76, %c0_77, %c0_78] : memref<2x128x128xf32, #tpu.memory_space<vmem>>, vector<1x128x128xf32>
    %123 = vector.shape_cast %122 : vector<1x128x128xf32> to vector<128x128xf32>
    %cst_79 = arith.constant dense<0.000000e+00> : vector<8x128xf32>
    %124 = tpu.matmul %121, %123, %cst_79 {dimension_numbers = #tpu.dot_dimension_numbers<[1], [0], [0], [1], [0, 0, 1, 1], [], []>} : vector<8x128xf32>, vector<128x128xf32>, vector<8x128xf32> -> vector<8x128xf32>
    %125 = arith.addf %120, %124 : vector<8x128xf32>
    %cst_80 = arith.constant 5.000000e-01 : f32
    %126 = vector.broadcast %cst_80 : f32 to vector<8x128xf32>
    %127 = arith.mulf %126, %125 : vector<8x128xf32>
    %128 = arith.select %71, %125, %127 : vector<8x128xi1>, vector<8x128xf32>
    %129 = math.tanh %128 : vector<8x128xf32>
    %cst_81 = arith.constant 5.000000e-01 : f32
    %130 = vector.broadcast %cst_81 : f32 to vector<8x128xf32>
    %131 = arith.mulf %130, %129 : vector<8x128xf32>
    %cst_82 = arith.constant 5.000000e-01 : f32
    %132 = vector.broadcast %cst_82 : f32 to vector<8x128xf32>
    %133 = arith.addf %131, %132 : vector<8x128xf32>
    %134 = arith.select %71, %129, %133 : vector<8x128xi1>, vector<8x128xf32>
    %135 = vector.extract_strided_slice %134 {offsets = [0, 0], sizes = [8, 32], strides = [1, 1]} : vector<8x128xf32> to vector<8x32xf32>
    %136 = vector.extract_strided_slice %134 {offsets = [0, 32], sizes = [8, 32], strides = [1, 1]} : vector<8x128xf32> to vector<8x32xf32>
    %137 = vector.extract_strided_slice %134 {offsets = [0, 64], sizes = [8, 32], strides = [1, 1]} : vector<8x128xf32> to vector<8x32xf32>
    %138 = vector.extract_strided_slice %134 {offsets = [0, 96], sizes = [8, 32], strides = [1, 1]} : vector<8x128xf32> to vector<8x32xf32>
    %c0_83 = arith.constant 0 : index
    %c0_84 = arith.constant 0 : index
    %139 = vector.load %arg18[%c0_83, %c0_84] : memref<8x32xf32, #tpu.memory_space<vmem>>, vector<8x32xf32>
    %140 = arith.mulf %136, %139 : vector<8x32xf32>
    %141 = arith.mulf %135, %137 : vector<8x32xf32>
    %142 = arith.addf %140, %141 : vector<8x32xf32>
    %143 = math.tanh %142 : vector<8x32xf32>
    %144 = arith.mulf %138, %143 : vector<8x32xf32>
    %c0_85 = arith.constant 0 : index
    %c0_86 = arith.constant 0 : index
    %145 = vector.load %arg18[%c0_85, %c0_86] : memref<8x32xf32, #tpu.memory_space<vmem>>, vector<8x32xf32>
    tpu.vector_store %arg18[%c0_85, %c0_86], %142 {strides = array<i32>} : memref<8x32xf32, #tpu.memory_space<vmem>>, vector<8x32xf32>,
    %c0_87 = arith.constant 0 : index
    %c0_88 = arith.constant 0 : index
    %146 = vector.load %arg17[%c0_87, %c0_88] : memref<8x128xf32, #tpu.memory_space<vmem>>, vector<8x32xf32>
    tpu.vector_store %arg17[%c0_87, %c0_88], %144 {strides = array<i32>} : memref<8x128xf32, #tpu.memory_space<vmem>>, vector<8x32xf32>,
    %147 = arith.index_cast %118 : i32 to index
    %c0_89 = arith.constant 0 : index
    %148 = vector.load %arg16[%147, %c0_89] : memref<64x128xf32, #tpu.memory_space<vmem>>, vector<8x32xf32>
    tpu.vector_store %arg16[%147, %c0_89], %144 {strides = array<i32>} : memref<64x128xf32, #tpu.memory_space<vmem>>, vector<8x32xf32>,
    %c2_i32 = arith.constant 2 : i32
    %c8_i32_90 = arith.constant 8 : i32
    %149 = arith.muli %c2_i32, %c8_i32_90 : i32
    %150 = tpu.assume_multiple %149, 8 : i32
    %151 = arith.index_cast %150 : i32 to index
    %c0_91 = arith.constant 0 : index
    %152 = vector.load %arg15[%151, %c0_91] : memref<64x128xf32, #tpu.memory_space<vmem>>, vector<8x128xf32>
    %c0_92 = arith.constant 0 : index
    %c0_93 = arith.constant 0 : index
    %153 = vector.load %arg17[%c0_92, %c0_93] : memref<8x128xf32, #tpu.memory_space<vmem>>, vector<8x128xf32>
    %c0_94 = arith.constant 0 : index
    %c0_95 = arith.constant 0 : index
    %c0_96 = arith.constant 0 : index
    %154 = vector.load %arg4[%c0_94, %c0_95, %c0_96] : memref<2x128x128xf32, #tpu.memory_space<vmem>>, vector<1x128x128xf32>
    %155 = vector.shape_cast %154 : vector<1x128x128xf32> to vector<128x128xf32>
    %cst_97 = arith.constant dense<0.000000e+00> : vector<8x128xf32>
    %156 = tpu.matmul %153, %155, %cst_97 {dimension_numbers = #tpu.dot_dimension_numbers<[1], [0], [0], [1], [0, 0, 1, 1], [], []>} : vector<8x128xf32>, vector<128x128xf32>, vector<8x128xf32> -> vector<8x128xf32>
    %157 = arith.addf %152, %156 : vector<8x128xf32>
    %cst_98 = arith.constant 5.000000e-01 : f32
    %158 = vector.broadcast %cst_98 : f32 to vector<8x128xf32>
    %159 = arith.mulf %158, %157 : vector<8x128xf32>
    %160 = arith.select %71, %157, %159 : vector<8x128xi1>, vector<8x128xf32>
    %161 = math.tanh %160 : vector<8x128xf32>
    %cst_99 = arith.constant 5.000000e-01 : f32
    %162 = vector.broadcast %cst_99 : f32 to vector<8x128xf32>
    %163 = arith.mulf %162, %161 : vector<8x128xf32>
    %cst_100 = arith.constant 5.000000e-01 : f32
    %164 = vector.broadcast %cst_100 : f32 to vector<8x128xf32>
    %165 = arith.addf %163, %164 : vector<8x128xf32>
    %166 = arith.select %71, %161, %165 : vector<8x128xi1>, vector<8x128xf32>
    %167 = vector.extract_strided_slice %166 {offsets = [0, 0], sizes = [8, 32], strides = [1, 1]} : vector<8x128xf32> to vector<8x32xf32>
    %168 = vector.extract_strided_slice %166 {offsets = [0, 32], sizes = [8, 32], strides = [1, 1]} : vector<8x128xf32> to vector<8x32xf32>
    %169 = vector.extract_strided_slice %166 {offsets = [0, 64], sizes = [8, 32], strides = [1, 1]} : vector<8x128xf32> to vector<8x32xf32>
    %170 = vector.extract_strided_slice %166 {offsets = [0, 96], sizes = [8, 32], strides = [1, 1]} : vector<8x128xf32> to vector<8x32xf32>
    %c0_101 = arith.constant 0 : index
    %c0_102 = arith.constant 0 : index
    %171 = vector.load %arg18[%c0_101, %c0_102] : memref<8x32xf32, #tpu.memory_space<vmem>>, vector<8x32xf32>
    %172 = arith.mulf %168, %171 : vector<8x32xf32>
    %173 = arith.mulf %167, %169 : vector<8x32xf32>
    %174 = arith.addf %172, %173 : vector<8x32xf32>
    %175 = math.tanh %174 : vector<8x32xf32>
    %176 = arith.mulf %170, %175 : vector<8x32xf32>
    %c0_103 = arith.constant 0 : index
    %c0_104 = arith.constant 0 : index
    %177 = vector.load %arg18[%c0_103, %c0_104] : memref<8x32xf32, #tpu.memory_space<vmem>>, vector<8x32xf32>
    tpu.vector_store %arg18[%c0_103, %c0_104], %174 {strides = array<i32>} : memref<8x32xf32, #tpu.memory_space<vmem>>, vector<8x32xf32>,
    %c0_105 = arith.constant 0 : index
    %c0_106 = arith.constant 0 : index
    %178 = vector.load %arg17[%c0_105, %c0_106] : memref<8x128xf32, #tpu.memory_space<vmem>>, vector<8x32xf32>
    tpu.vector_store %arg17[%c0_105, %c0_106], %176 {strides = array<i32>} : memref<8x128xf32, #tpu.memory_space<vmem>>, vector<8x32xf32>,
    %179 = arith.index_cast %150 : i32 to index
    %c0_107 = arith.constant 0 : index
    %180 = vector.load %arg16[%179, %c0_107] : memref<64x128xf32, #tpu.memory_space<vmem>>, vector<8x32xf32>
    tpu.vector_store %arg16[%179, %c0_107], %176 {strides = array<i32>} : memref<64x128xf32, #tpu.memory_space<vmem>>, vector<8x32xf32>,
    %c3_i32 = arith.constant 3 : i32
    %c8_i32_108 = arith.constant 8 : i32
    %181 = arith.muli %c3_i32, %c8_i32_108 : i32
    %182 = tpu.assume_multiple %181, 8 : i32
    %183 = arith.index_cast %182 : i32 to index
    %c0_109 = arith.constant 0 : index
    %184 = vector.load %arg15[%183, %c0_109] : memref<64x128xf32, #tpu.memory_space<vmem>>, vector<8x128xf32>
    %c0_110 = arith.constant 0 : index
    %c0_111 = arith.constant 0 : index
    %185 = vector.load %arg17[%c0_110, %c0_111] : memref<8x128xf32, #tpu.memory_space<vmem>>, vector<8x128xf32>
    %c0_112 = arith.constant 0 : index
    %c0_113 = arith.constant 0 : index
    %c0_114 = arith.constant 0 : index
    %186 = vector.load %arg4[%c0_112, %c0_113, %c0_114] : memref<2x128x128xf32, #tpu.memory_space<vmem>>, vector<1x128x128xf32>
    %187 = vector.shape_cast %186 : vector<1x128x128xf32> to vector<128x128xf32>
    %cst_115 = arith.constant dense<0.000000e+00> : vector<8x128xf32>
    %188 = tpu.matmul %185, %187, %cst_115 {dimension_numbers = #tpu.dot_dimension_numbers<[1], [0], [0], [1], [0, 0, 1, 1], [], []>} : vector<8x128xf32>, vector<128x128xf32>, vector<8x128xf32> -> vector<8x128xf32>
    %189 = arith.addf %184, %188 : vector<8x128xf32>
    %cst_116 = arith.constant 5.000000e-01 : f32
    %190 = vector.broadcast %cst_116 : f32 to vector<8x128xf32>
    %191 = arith.mulf %190, %189 : vector<8x128xf32>
    %192 = arith.select %71, %189, %191 : vector<8x128xi1>, vector<8x128xf32>
    %193 = math.tanh %192 : vector<8x128xf32>
    %cst_117 = arith.constant 5.000000e-01 : f32
    %194 = vector.broadcast %cst_117 : f32 to vector<8x128xf32>
    %195 = arith.mulf %194, %193 : vector<8x128xf32>
    %cst_118 = arith.constant 5.000000e-01 : f32
    %196 = vector.broadcast %cst_118 : f32 to vector<8x128xf32>
    %197 = arith.addf %195, %196 : vector<8x128xf32>
    %198 = arith.select %71, %193, %197 : vector<8x128xi1>, vector<8x128xf32>
    %199 = vector.extract_strided_slice %198 {offsets = [0, 0], sizes = [8, 32], strides = [1, 1]} : vector<8x128xf32> to vector<8x32xf32>
    %200 = vector.extract_strided_slice %198 {offsets = [0, 32], sizes = [8, 32], strides = [1, 1]} : vector<8x128xf32> to vector<8x32xf32>
    %201 = vector.extract_strided_slice %198 {offsets = [0, 64], sizes = [8, 32], strides = [1, 1]} : vector<8x128xf32> to vector<8x32xf32>
    %202 = vector.extract_strided_slice %198 {offsets = [0, 96], sizes = [8, 32], strides = [1, 1]} : vector<8x128xf32> to vector<8x32xf32>
    %c0_119 = arith.constant 0 : index
    %c0_120 = arith.constant 0 : index
    %203 = vector.load %arg18[%c0_119, %c0_120] : memref<8x32xf32, #tpu.memory_space<vmem>>, vector<8x32xf32>
    %204 = arith.mulf %200, %203 : vector<8x32xf32>
    %205 = arith.mulf %199, %201 : vector<8x32xf32>
    %206 = arith.addf %204, %205 : vector<8x32xf32>
    %207 = math.tanh %206 : vector<8x32xf32>
    %208 = arith.mulf %202, %207 : vector<8x32xf32>
    %c0_121 = arith.constant 0 : index
    %c0_122 = arith.constant 0 : index
    %209 = vector.load %arg18[%c0_121, %c0_122] : memref<8x32xf32, #tpu.memory_space<vmem>>, vector<8x32xf32>
    tpu.vector_store %arg18[%c0_121, %c0_122], %206 {strides = array<i32>} : memref<8x32xf32, #tpu.memory_space<vmem>>, vector<8x32xf32>,
    %c0_123 = arith.constant 0 : index
    %c0_124 = arith.constant 0 : index
    %210 = vector.load %arg17[%c0_123, %c0_124] : memref<8x128xf32, #tpu.memory_space<vmem>>, vector<8x32xf32>
    tpu.vector_store %arg17[%c0_123, %c0_124], %208 {strides = array<i32>} : memref<8x128xf32, #tpu.memory_space<vmem>>, vector<8x32xf32>,
    %211 = arith.index_cast %182 : i32 to index
    %c0_125 = arith.constant 0 : index
    %212 = vector.load %arg16[%211, %c0_125] : memref<64x128xf32, #tpu.memory_space<vmem>>, vector<8x32xf32>
    tpu.vector_store %arg16[%211, %c0_125], %208 {strides = array<i32>} : memref<64x128xf32, #tpu.memory_space<vmem>>, vector<8x32xf32>,
    %c4_i32 = arith.constant 4 : i32
    %c8_i32_126 = arith.constant 8 : i32
    %213 = arith.muli %c4_i32, %c8_i32_126 : i32
    %214 = tpu.assume_multiple %213, 8 : i32
    %215 = arith.index_cast %214 : i32 to index
    %c0_127 = arith.constant 0 : index
    %216 = vector.load %arg15[%215, %c0_127] : memref<64x128xf32, #tpu.memory_space<vmem>>, vector<8x128xf32>
    %c0_128 = arith.constant 0 : index
    %c0_129 = arith.constant 0 : index
    %217 = vector.load %arg17[%c0_128, %c0_129] : memref<8x128xf32, #tpu.memory_space<vmem>>, vector<8x128xf32>
    %c0_130 = arith.constant 0 : index
    %c0_131 = arith.constant 0 : index
    %c0_132 = arith.constant 0 : index
    %218 = vector.load %arg4[%c0_130, %c0_131, %c0_132] : memref<2x128x128xf32, #tpu.memory_space<vmem>>, vector<1x128x128xf32>
    %219 = vector.shape_cast %218 : vector<1x128x128xf32> to vector<128x128xf32>
    %cst_133 = arith.constant dense<0.000000e+00> : vector<8x128xf32>
    %220 = tpu.matmul %217, %219, %cst_133 {dimension_numbers = #tpu.dot_dimension_numbers<[1], [0], [0], [1], [0, 0, 1, 1], [], []>} : vector<8x128xf32>, vector<128x128xf32>, vector<8x128xf32> -> vector<8x128xf32>
    %221 = arith.addf %216, %220 : vector<8x128xf32>
    %cst_134 = arith.constant 5.000000e-01 : f32
    %222 = vector.broadcast %cst_134 : f32 to vector<8x128xf32>
    %223 = arith.mulf %222, %221 : vector<8x128xf32>
    %224 = arith.select %71, %221, %223 : vector<8x128xi1>, vector<8x128xf32>
    %225 = math.tanh %224 : vector<8x128xf32>
    %cst_135 = arith.constant 5.000000e-01 : f32
    %226 = vector.broadcast %cst_135 : f32 to vector<8x128xf32>
    %227 = arith.mulf %226, %225 : vector<8x128xf32>
    %cst_136 = arith.constant 5.000000e-01 : f32
    %228 = vector.broadcast %cst_136 : f32 to vector<8x128xf32>
    %229 = arith.addf %227, %228 : vector<8x128xf32>
    %230 = arith.select %71, %225, %229 : vector<8x128xi1>, vector<8x128xf32>
    %231 = vector.extract_strided_slice %230 {offsets = [0, 0], sizes = [8, 32], strides = [1, 1]} : vector<8x128xf32> to vector<8x32xf32>
    %232 = vector.extract_strided_slice %230 {offsets = [0, 32], sizes = [8, 32], strides = [1, 1]} : vector<8x128xf32> to vector<8x32xf32>
    %233 = vector.extract_strided_slice %230 {offsets = [0, 64], sizes = [8, 32], strides = [1, 1]} : vector<8x128xf32> to vector<8x32xf32>
    %234 = vector.extract_strided_slice %230 {offsets = [0, 96], sizes = [8, 32], strides = [1, 1]} : vector<8x128xf32> to vector<8x32xf32>
    %c0_137 = arith.constant 0 : index
    %c0_138 = arith.constant 0 : index
    %235 = vector.load %arg18[%c0_137, %c0_138] : memref<8x32xf32, #tpu.memory_space<vmem>>, vector<8x32xf32>
    %236 = arith.mulf %232, %235 : vector<8x32xf32>
    %237 = arith.mulf %231, %233 : vector<8x32xf32>
    %238 = arith.addf %236, %237 : vector<8x32xf32>
    %239 = math.tanh %238 : vector<8x32xf32>
    %240 = arith.mulf %234, %239 : vector<8x32xf32>
    %c0_139 = arith.constant 0 : index
    %c0_140 = arith.constant 0 : index
    %241 = vector.load %arg18[%c0_139, %c0_140] : memref<8x32xf32, #tpu.memory_space<vmem>>, vector<8x32xf32>
    tpu.vector_store %arg18[%c0_139, %c0_140], %238 {strides = array<i32>} : memref<8x32xf32, #tpu.memory_space<vmem>>, vector<8x32xf32>,
    %c0_141 = arith.constant 0 : index
    %c0_142 = arith.constant 0 : index
    %242 = vector.load %arg17[%c0_141, %c0_142] : memref<8x128xf32, #tpu.memory_space<vmem>>, vector<8x32xf32>
    tpu.vector_store %arg17[%c0_141, %c0_142], %240 {strides = array<i32>} : memref<8x128xf32, #tpu.memory_space<vmem>>, vector<8x32xf32>,
    %243 = arith.index_cast %214 : i32 to index
    %c0_143 = arith.constant 0 : index
    %244 = vector.load %arg16[%243, %c0_143] : memref<64x128xf32, #tpu.memory_space<vmem>>, vector<8x32xf32>
    tpu.vector_store %arg16[%243, %c0_143], %240 {strides = array<i32>} : memref<64x128xf32, #tpu.memory_space<vmem>>, vector<8x32xf32>,
    %c5_i32 = arith.constant 5 : i32
    %c8_i32_144 = arith.constant 8 : i32
    %245 = arith.muli %c5_i32, %c8_i32_144 : i32
    %246 = tpu.assume_multiple %245, 8 : i32
    %247 = arith.index_cast %246 : i32 to index
    %c0_145 = arith.constant 0 : index
    %248 = vector.load %arg15[%247, %c0_145] : memref<64x128xf32, #tpu.memory_space<vmem>>, vector<8x128xf32>
    %c0_146 = arith.constant 0 : index
    %c0_147 = arith.constant 0 : index
    %249 = vector.load %arg17[%c0_146, %c0_147] : memref<8x128xf32, #tpu.memory_space<vmem>>, vector<8x128xf32>
    %c0_148 = arith.constant 0 : index
    %c0_149 = arith.constant 0 : index
    %c0_150 = arith.constant 0 : index
    %250 = vector.load %arg4[%c0_148, %c0_149, %c0_150] : memref<2x128x128xf32, #tpu.memory_space<vmem>>, vector<1x128x128xf32>
    %251 = vector.shape_cast %250 : vector<1x128x128xf32> to vector<128x128xf32>
    %cst_151 = arith.constant dense<0.000000e+00> : vector<8x128xf32>
    %252 = tpu.matmul %249, %251, %cst_151 {dimension_numbers = #tpu.dot_dimension_numbers<[1], [0], [0], [1], [0, 0, 1, 1], [], []>} : vector<8x128xf32>, vector<128x128xf32>, vector<8x128xf32> -> vector<8x128xf32>
    %253 = arith.addf %248, %252 : vector<8x128xf32>
    %cst_152 = arith.constant 5.000000e-01 : f32
    %254 = vector.broadcast %cst_152 : f32 to vector<8x128xf32>
    %255 = arith.mulf %254, %253 : vector<8x128xf32>
    %256 = arith.select %71, %253, %255 : vector<8x128xi1>, vector<8x128xf32>
    %257 = math.tanh %256 : vector<8x128xf32>
    %cst_153 = arith.constant 5.000000e-01 : f32
    %258 = vector.broadcast %cst_153 : f32 to vector<8x128xf32>
    %259 = arith.mulf %258, %257 : vector<8x128xf32>
    %cst_154 = arith.constant 5.000000e-01 : f32
    %260 = vector.broadcast %cst_154 : f32 to vector<8x128xf32>
    %261 = arith.addf %259, %260 : vector<8x128xf32>
    %262 = arith.select %71, %257, %261 : vector<8x128xi1>, vector<8x128xf32>
    %263 = vector.extract_strided_slice %262 {offsets = [0, 0], sizes = [8, 32], strides = [1, 1]} : vector<8x128xf32> to vector<8x32xf32>
    %264 = vector.extract_strided_slice %262 {offsets = [0, 32], sizes = [8, 32], strides = [1, 1]} : vector<8x128xf32> to vector<8x32xf32>
    %265 = vector.extract_strided_slice %262 {offsets = [0, 64], sizes = [8, 32], strides = [1, 1]} : vector<8x128xf32> to vector<8x32xf32>
    %266 = vector.extract_strided_slice %262 {offsets = [0, 96], sizes = [8, 32], strides = [1, 1]} : vector<8x128xf32> to vector<8x32xf32>
    %c0_155 = arith.constant 0 : index
    %c0_156 = arith.constant 0 : index
    %267 = vector.load %arg18[%c0_155, %c0_156] : memref<8x32xf32, #tpu.memory_space<vmem>>, vector<8x32xf32>
    %268 = arith.mulf %264, %267 : vector<8x32xf32>
    %269 = arith.mulf %263, %265 : vector<8x32xf32>
    %270 = arith.addf %268, %269 : vector<8x32xf32>
    %271 = math.tanh %270 : vector<8x32xf32>
    %272 = arith.mulf %266, %271 : vector<8x32xf32>
    %c0_157 = arith.constant 0 : index
    %c0_158 = arith.constant 0 : index
    %273 = vector.load %arg18[%c0_157, %c0_158] : memref<8x32xf32, #tpu.memory_space<vmem>>, vector<8x32xf32>
    tpu.vector_store %arg18[%c0_157, %c0_158], %270 {strides = array<i32>} : memref<8x32xf32, #tpu.memory_space<vmem>>, vector<8x32xf32>,
    %c0_159 = arith.constant 0 : index
    %c0_160 = arith.constant 0 : index
    %274 = vector.load %arg17[%c0_159, %c0_160] : memref<8x128xf32, #tpu.memory_space<vmem>>, vector<8x32xf32>
    tpu.vector_store %arg17[%c0_159, %c0_160], %272 {strides = array<i32>} : memref<8x128xf32, #tpu.memory_space<vmem>>, vector<8x32xf32>,
    %275 = arith.index_cast %246 : i32 to index
    %c0_161 = arith.constant 0 : index
    %276 = vector.load %arg16[%275, %c0_161] : memref<64x128xf32, #tpu.memory_space<vmem>>, vector<8x32xf32>
    tpu.vector_store %arg16[%275, %c0_161], %272 {strides = array<i32>} : memref<64x128xf32, #tpu.memory_space<vmem>>, vector<8x32xf32>,
    %c6_i32 = arith.constant 6 : i32
    %c8_i32_162 = arith.constant 8 : i32
    %277 = arith.muli %c6_i32, %c8_i32_162 : i32
    %278 = tpu.assume_multiple %277, 8 : i32
    %279 = arith.index_cast %278 : i32 to index
    %c0_163 = arith.constant 0 : index
    %280 = vector.load %arg15[%279, %c0_163] : memref<64x128xf32, #tpu.memory_space<vmem>>, vector<8x128xf32>
    %c0_164 = arith.constant 0 : index
    %c0_165 = arith.constant 0 : index
    %281 = vector.load %arg17[%c0_164, %c0_165] : memref<8x128xf32, #tpu.memory_space<vmem>>, vector<8x128xf32>
    %c0_166 = arith.constant 0 : index
    %c0_167 = arith.constant 0 : index
    %c0_168 = arith.constant 0 : index
    %282 = vector.load %arg4[%c0_166, %c0_167, %c0_168] : memref<2x128x128xf32, #tpu.memory_space<vmem>>, vector<1x128x128xf32>
    %283 = vector.shape_cast %282 : vector<1x128x128xf32> to vector<128x128xf32>
    %cst_169 = arith.constant dense<0.000000e+00> : vector<8x128xf32>
    %284 = tpu.matmul %281, %283, %cst_169 {dimension_numbers = #tpu.dot_dimension_numbers<[1], [0], [0], [1], [0, 0, 1, 1], [], []>} : vector<8x128xf32>, vector<128x128xf32>, vector<8x128xf32> -> vector<8x128xf32>
    %285 = arith.addf %280, %284 : vector<8x128xf32>
    %cst_170 = arith.constant 5.000000e-01 : f32
    %286 = vector.broadcast %cst_170 : f32 to vector<8x128xf32>
    %287 = arith.mulf %286, %285 : vector<8x128xf32>
    %288 = arith.select %71, %285, %287 : vector<8x128xi1>, vector<8x128xf32>
    %289 = math.tanh %288 : vector<8x128xf32>
    %cst_171 = arith.constant 5.000000e-01 : f32
    %290 = vector.broadcast %cst_171 : f32 to vector<8x128xf32>
    %291 = arith.mulf %290, %289 : vector<8x128xf32>
    %cst_172 = arith.constant 5.000000e-01 : f32
    %292 = vector.broadcast %cst_172 : f32 to vector<8x128xf32>
    %293 = arith.addf %291, %292 : vector<8x128xf32>
    %294 = arith.select %71, %289, %293 : vector<8x128xi1>, vector<8x128xf32>
    %295 = vector.extract_strided_slice %294 {offsets = [0, 0], sizes = [8, 32], strides = [1, 1]} : vector<8x128xf32> to vector<8x32xf32>
    %296 = vector.extract_strided_slice %294 {offsets = [0, 32], sizes = [8, 32], strides = [1, 1]} : vector<8x128xf32> to vector<8x32xf32>
    %297 = vector.extract_strided_slice %294 {offsets = [0, 64], sizes = [8, 32], strides = [1, 1]} : vector<8x128xf32> to vector<8x32xf32>
    %298 = vector.extract_strided_slice %294 {offsets = [0, 96], sizes = [8, 32], strides = [1, 1]} : vector<8x128xf32> to vector<8x32xf32>
    %c0_173 = arith.constant 0 : index
    %c0_174 = arith.constant 0 : index
    %299 = vector.load %arg18[%c0_173, %c0_174] : memref<8x32xf32, #tpu.memory_space<vmem>>, vector<8x32xf32>
    %300 = arith.mulf %296, %299 : vector<8x32xf32>
    %301 = arith.mulf %295, %297 : vector<8x32xf32>
    %302 = arith.addf %300, %301 : vector<8x32xf32>
    %303 = math.tanh %302 : vector<8x32xf32>
    %304 = arith.mulf %298, %303 : vector<8x32xf32>
    %c0_175 = arith.constant 0 : index
    %c0_176 = arith.constant 0 : index
    %305 = vector.load %arg18[%c0_175, %c0_176] : memref<8x32xf32, #tpu.memory_space<vmem>>, vector<8x32xf32>
    tpu.vector_store %arg18[%c0_175, %c0_176], %302 {strides = array<i32>} : memref<8x32xf32, #tpu.memory_space<vmem>>, vector<8x32xf32>,
    %c0_177 = arith.constant 0 : index
    %c0_178 = arith.constant 0 : index
    %306 = vector.load %arg17[%c0_177, %c0_178] : memref<8x128xf32, #tpu.memory_space<vmem>>, vector<8x32xf32>
    tpu.vector_store %arg17[%c0_177, %c0_178], %304 {strides = array<i32>} : memref<8x128xf32, #tpu.memory_space<vmem>>, vector<8x32xf32>,
    %307 = arith.index_cast %278 : i32 to index
    %c0_179 = arith.constant 0 : index
    %308 = vector.load %arg16[%307, %c0_179] : memref<64x128xf32, #tpu.memory_space<vmem>>, vector<8x32xf32>
    tpu.vector_store %arg16[%307, %c0_179], %304 {strides = array<i32>} : memref<64x128xf32, #tpu.memory_space<vmem>>, vector<8x32xf32>,
    %c7_i32 = arith.constant 7 : i32
    %c8_i32_180 = arith.constant 8 : i32
    %309 = arith.muli %c7_i32, %c8_i32_180 : i32
    %310 = tpu.assume_multiple %309, 8 : i32
    %311 = arith.index_cast %310 : i32 to index
    %c0_181 = arith.constant 0 : index
    %312 = vector.load %arg15[%311, %c0_181] : memref<64x128xf32, #tpu.memory_space<vmem>>, vector<8x128xf32>
    %c0_182 = arith.constant 0 : index
    %c0_183 = arith.constant 0 : index
    %313 = vector.load %arg17[%c0_182, %c0_183] : memref<8x128xf32, #tpu.memory_space<vmem>>, vector<8x128xf32>
    %c0_184 = arith.constant 0 : index
    %c0_185 = arith.constant 0 : index
    %c0_186 = arith.constant 0 : index
    %314 = vector.load %arg4[%c0_184, %c0_185, %c0_186] : memref<2x128x128xf32, #tpu.memory_space<vmem>>, vector<1x128x128xf32>
    %315 = vector.shape_cast %314 : vector<1x128x128xf32> to vector<128x128xf32>
    %cst_187 = arith.constant dense<0.000000e+00> : vector<8x128xf32>
    %316 = tpu.matmul %313, %315, %cst_187 {dimension_numbers = #tpu.dot_dimension_numbers<[1], [0], [0], [1], [0, 0, 1, 1], [], []>} : vector<8x128xf32>, vector<128x128xf32>, vector<8x128xf32> -> vector<8x128xf32>
    %317 = arith.addf %312, %316 : vector<8x128xf32>
    %cst_188 = arith.constant 5.000000e-01 : f32
    %318 = vector.broadcast %cst_188 : f32 to vector<8x128xf32>
    %319 = arith.mulf %318, %317 : vector<8x128xf32>
    %320 = arith.select %71, %317, %319 : vector<8x128xi1>, vector<8x128xf32>
    %321 = math.tanh %320 : vector<8x128xf32>
    %cst_189 = arith.constant 5.000000e-01 : f32
    %322 = vector.broadcast %cst_189 : f32 to vector<8x128xf32>
    %323 = arith.mulf %322, %321 : vector<8x128xf32>
    %cst_190 = arith.constant 5.000000e-01 : f32
    %324 = vector.broadcast %cst_190 : f32 to vector<8x128xf32>
    %325 = arith.addf %323, %324 : vector<8x128xf32>
    %326 = arith.select %71, %321, %325 : vector<8x128xi1>, vector<8x128xf32>
    %327 = vector.extract_strided_slice %326 {offsets = [0, 0], sizes = [8, 32], strides = [1, 1]} : vector<8x128xf32> to vector<8x32xf32>
    %328 = vector.extract_strided_slice %326 {offsets = [0, 32], sizes = [8, 32], strides = [1, 1]} : vector<8x128xf32> to vector<8x32xf32>
    %329 = vector.extract_strided_slice %326 {offsets = [0, 64], sizes = [8, 32], strides = [1, 1]} : vector<8x128xf32> to vector<8x32xf32>
    %330 = vector.extract_strided_slice %326 {offsets = [0, 96], sizes = [8, 32], strides = [1, 1]} : vector<8x128xf32> to vector<8x32xf32>
    %c0_191 = arith.constant 0 : index
    %c0_192 = arith.constant 0 : index
    %331 = vector.load %arg18[%c0_191, %c0_192] : memref<8x32xf32, #tpu.memory_space<vmem>>, vector<8x32xf32>
    %332 = arith.mulf %328, %331 : vector<8x32xf32>
    %333 = arith.mulf %327, %329 : vector<8x32xf32>
    %334 = arith.addf %332, %333 : vector<8x32xf32>
    %335 = math.tanh %334 : vector<8x32xf32>
    %336 = arith.mulf %330, %335 : vector<8x32xf32>
    %c0_193 = arith.constant 0 : index
    %c0_194 = arith.constant 0 : index
    %337 = vector.load %arg18[%c0_193, %c0_194] : memref<8x32xf32, #tpu.memory_space<vmem>>, vector<8x32xf32>
    tpu.vector_store %arg18[%c0_193, %c0_194], %334 {strides = array<i32>} : memref<8x32xf32, #tpu.memory_space<vmem>>, vector<8x32xf32>,
    %c0_195 = arith.constant 0 : index
    %c0_196 = arith.constant 0 : index
    %338 = vector.load %arg17[%c0_195, %c0_196] : memref<8x128xf32, #tpu.memory_space<vmem>>, vector<8x32xf32>
    tpu.vector_store %arg17[%c0_195, %c0_196], %336 {strides = array<i32>} : memref<8x128xf32, #tpu.memory_space<vmem>>, vector<8x32xf32>,
    %339 = arith.index_cast %310 : i32 to index
    %c0_197 = arith.constant 0 : index
    %340 = vector.load %arg16[%339, %c0_197] : memref<64x128xf32, #tpu.memory_space<vmem>>, vector<8x32xf32>
    tpu.vector_store %arg16[%339, %c0_197], %336 {strides = array<i32>} : memref<64x128xf32, #tpu.memory_space<vmem>>, vector<8x32xf32>,
    %c8_i32_198 = arith.constant 8 : i32
    %c0_199 = arith.constant 0 : index
    %c0_200 = arith.constant 0 : index
    %341 = vector.load %arg16[%c0_199, %c0_200] : memref<64x128xf32, #tpu.memory_space<vmem>>, vector<64x128xf32>
    %c1_201 = arith.constant 1 : index
    %c0_202 = arith.constant 0 : index
    %c0_203 = arith.constant 0 : index
    %342 = vector.load %arg3[%c1_201, %c0_202, %c0_203] : memref<2x128x128xf32, #tpu.memory_space<vmem>>, vector<1x128x128xf32>
    %343 = vector.shape_cast %342 : vector<1x128x128xf32> to vector<128x128xf32>
    %cst_204 = arith.constant dense<0.000000e+00> : vector<64x128xf32>
    %344 = tpu.matmul %341, %343, %cst_204 {dimension_numbers = #tpu.dot_dimension_numbers<[1], [0], [0], [1], [0, 0, 1, 1], [], []>} : vector<64x128xf32>, vector<128x128xf32>, vector<64x128xf32> -> vector<64x128xf32>
    %c1_205 = arith.constant 1 : index
    %c0_206 = arith.constant 0 : index
    %c0_207 = arith.constant 0 : index
    %345 = vector.load %arg5[%c1_205, %c0_206, %c0_207] : memref<2x1x128xf32, #tpu.memory_space<vmem>>, vector<1x1x128xf32>
    %346 = vector.shape_cast %345 : vector<1x1x128xf32> to vector<1x128xf32>
    %347 = vector.broadcast %346 : vector<1x128xf32> to vector<64x128xf32>
    %348 = arith.addf %344, %347 : vector<64x128xf32>
    %c0_208 = arith.constant 0 : index
    %c0_209 = arith.constant 0 : index
    %349 = vector.load %arg15[%c0_208, %c0_209] : memref<64x128xf32, #tpu.memory_space<vmem>>, vector<64x128xf32>
    tpu.vector_store %arg15[%c0_208, %c0_209], %348 {strides = array<i32>} : memref<64x128xf32, #tpu.memory_space<vmem>>, vector<64x128xf32>,
    %cst_210 = arith.constant 0.000000e+00 : f32
    %350 = vector.broadcast %cst_210 : f32 to vector<8x128xf32>
    %c0_211 = arith.constant 0 : index
    %c0_212 = arith.constant 0 : index
    %351 = vector.load %arg17[%c0_211, %c0_212] : memref<8x128xf32, #tpu.memory_space<vmem>>, vector<8x128xf32>
    tpu.vector_store %arg17[%c0_211, %c0_212], %350 {strides = array<i32>} : memref<8x128xf32, #tpu.memory_space<vmem>>, vector<8x128xf32>,
    %cst_213 = arith.constant 0.000000e+00 : f32
    %352 = vector.broadcast %cst_213 : f32 to vector<8x32xf32>
    %c0_214 = arith.constant 0 : index
    %c0_215 = arith.constant 0 : index
    %353 = vector.load %arg18[%c0_214, %c0_215] : memref<8x32xf32, #tpu.memory_space<vmem>>, vector<8x32xf32>
    tpu.vector_store %arg18[%c0_214, %c0_215], %352 {strides = array<i32>} : memref<8x32xf32, #tpu.memory_space<vmem>>, vector<8x32xf32>,
    %c0_i32_216 = arith.constant 0 : i32
    %c8_i32_217 = arith.constant 8 : i32
    %354 = arith.muli %c0_i32_216, %c8_i32_217 : i32
    %355 = tpu.assume_multiple %354, 8 : i32
    %356 = arith.index_cast %355 : i32 to index
    %c0_218 = arith.constant 0 : index
    %357 = vector.load %arg15[%356, %c0_218] : memref<64x128xf32, #tpu.memory_space<vmem>>, vector<8x128xf32>
    %c0_219 = arith.constant 0 : index
    %c0_220 = arith.constant 0 : index
    %358 = vector.load %arg17[%c0_219, %c0_220] : memref<8x128xf32, #tpu.memory_space<vmem>>, vector<8x128xf32>
    %c1_221 = arith.constant 1 : index
    %c0_222 = arith.constant 0 : index
    %c0_223 = arith.constant 0 : index
    %359 = vector.load %arg4[%c1_221, %c0_222, %c0_223] : memref<2x128x128xf32, #tpu.memory_space<vmem>>, vector<1x128x128xf32>
    %360 = vector.shape_cast %359 : vector<1x128x128xf32> to vector<128x128xf32>
    %cst_224 = arith.constant dense<0.000000e+00> : vector<8x128xf32>
    %361 = tpu.matmul %358, %360, %cst_224 {dimension_numbers = #tpu.dot_dimension_numbers<[1], [0], [0], [1], [0, 0, 1, 1], [], []>} : vector<8x128xf32>, vector<128x128xf32>, vector<8x128xf32> -> vector<8x128xf32>
    %362 = arith.addf %357, %361 : vector<8x128xf32>
    %cst_225 = arith.constant 5.000000e-01 : f32
    %363 = vector.broadcast %cst_225 : f32 to vector<8x128xf32>
    %364 = arith.mulf %363, %362 : vector<8x128xf32>
    %365 = arith.select %71, %362, %364 : vector<8x128xi1>, vector<8x128xf32>
    %366 = math.tanh %365 : vector<8x128xf32>
    %cst_226 = arith.constant 5.000000e-01 : f32
    %367 = vector.broadcast %cst_226 : f32 to vector<8x128xf32>
    %368 = arith.mulf %367, %366 : vector<8x128xf32>
    %cst_227 = arith.constant 5.000000e-01 : f32
    %369 = vector.broadcast %cst_227 : f32 to vector<8x128xf32>
    %370 = arith.addf %368, %369 : vector<8x128xf32>
    %371 = arith.select %71, %366, %370 : vector<8x128xi1>, vector<8x128xf32>
    %372 = vector.extract_strided_slice %371 {offsets = [0, 0], sizes = [8, 32], strides = [1, 1]} : vector<8x128xf32> to vector<8x32xf32>
    %373 = vector.extract_strided_slice %371 {offsets = [0, 32], sizes = [8, 32], strides = [1, 1]} : vector<8x128xf32> to vector<8x32xf32>
    %374 = vector.extract_strided_slice %371 {offsets = [0, 64], sizes = [8, 32], strides = [1, 1]} : vector<8x128xf32> to vector<8x32xf32>
    %375 = vector.extract_strided_slice %371 {offsets = [0, 96], sizes = [8, 32], strides = [1, 1]} : vector<8x128xf32> to vector<8x32xf32>
    %c0_228 = arith.constant 0 : index
    %c0_229 = arith.constant 0 : index
    %376 = vector.load %arg18[%c0_228, %c0_229] : memref<8x32xf32, #tpu.memory_space<vmem>>, vector<8x32xf32>
    %377 = arith.mulf %373, %376 : vector<8x32xf32>
    %378 = arith.mulf %372, %374 : vector<8x32xf32>
    %379 = arith.addf %377, %378 : vector<8x32xf32>
    %380 = math.tanh %379 : vector<8x32xf32>
    %381 = arith.mulf %375, %380 : vector<8x32xf32>
    %c0_230 = arith.constant 0 : index
    %c0_231 = arith.constant 0 : index
    %382 = vector.load %arg18[%c0_230, %c0_231] : memref<8x32xf32, #tpu.memory_space<vmem>>, vector<8x32xf32>
    tpu.vector_store %arg18[%c0_230, %c0_231], %379 {strides = array<i32>} : memref<8x32xf32, #tpu.memory_space<vmem>>, vector<8x32xf32>,
    %c0_232 = arith.constant 0 : index
    %c0_233 = arith.constant 0 : index
    %383 = vector.load %arg17[%c0_232, %c0_233] : memref<8x128xf32, #tpu.memory_space<vmem>>, vector<8x32xf32>
    tpu.vector_store %arg17[%c0_232, %c0_233], %381 {strides = array<i32>} : memref<8x128xf32, #tpu.memory_space<vmem>>, vector<8x32xf32>,
    %c1_i32_234 = arith.constant 1 : i32
    %c8_i32_235 = arith.constant 8 : i32
    %384 = arith.muli %c1_i32_234, %c8_i32_235 : i32
    %385 = tpu.assume_multiple %384, 8 : i32
    %386 = arith.index_cast %385 : i32 to index
    %c0_236 = arith.constant 0 : index
    %387 = vector.load %arg15[%386, %c0_236] : memref<64x128xf32, #tpu.memory_space<vmem>>, vector<8x128xf32>
    %c0_237 = arith.constant 0 : index
    %c0_238 = arith.constant 0 : index
    %388 = vector.load %arg17[%c0_237, %c0_238] : memref<8x128xf32, #tpu.memory_space<vmem>>, vector<8x128xf32>
    %c1_239 = arith.constant 1 : index
    %c0_240 = arith.constant 0 : index
    %c0_241 = arith.constant 0 : index
    %389 = vector.load %arg4[%c1_239, %c0_240, %c0_241] : memref<2x128x128xf32, #tpu.memory_space<vmem>>, vector<1x128x128xf32>
    %390 = vector.shape_cast %389 : vector<1x128x128xf32> to vector<128x128xf32>
    %cst_242 = arith.constant dense<0.000000e+00> : vector<8x128xf32>
    %391 = tpu.matmul %388, %390, %cst_242 {dimension_numbers = #tpu.dot_dimension_numbers<[1], [0], [0], [1], [0, 0, 1, 1], [], []>} : vector<8x128xf32>, vector<128x128xf32>, vector<8x128xf32> -> vector<8x128xf32>
    %392 = arith.addf %387, %391 : vector<8x128xf32>
    %cst_243 = arith.constant 5.000000e-01 : f32
    %393 = vector.broadcast %cst_243 : f32 to vector<8x128xf32>
    %394 = arith.mulf %393, %392 : vector<8x128xf32>
    %395 = arith.select %71, %392, %394 : vector<8x128xi1>, vector<8x128xf32>
    %396 = math.tanh %395 : vector<8x128xf32>
    %cst_244 = arith.constant 5.000000e-01 : f32
    %397 = vector.broadcast %cst_244 : f32 to vector<8x128xf32>
    %398 = arith.mulf %397, %396 : vector<8x128xf32>
    %cst_245 = arith.constant 5.000000e-01 : f32
    %399 = vector.broadcast %cst_245 : f32 to vector<8x128xf32>
    %400 = arith.addf %398, %399 : vector<8x128xf32>
    %401 = arith.select %71, %396, %400 : vector<8x128xi1>, vector<8x128xf32>
    %402 = vector.extract_strided_slice %401 {offsets = [0, 0], sizes = [8, 32], strides = [1, 1]} : vector<8x128xf32> to vector<8x32xf32>
    %403 = vector.extract_strided_slice %401 {offsets = [0, 32], sizes = [8, 32], strides = [1, 1]} : vector<8x128xf32> to vector<8x32xf32>
    %404 = vector.extract_strided_slice %401 {offsets = [0, 64], sizes = [8, 32], strides = [1, 1]} : vector<8x128xf32> to vector<8x32xf32>
    %405 = vector.extract_strided_slice %401 {offsets = [0, 96], sizes = [8, 32], strides = [1, 1]} : vector<8x128xf32> to vector<8x32xf32>
    %c0_246 = arith.constant 0 : index
    %c0_247 = arith.constant 0 : index
    %406 = vector.load %arg18[%c0_246, %c0_247] : memref<8x32xf32, #tpu.memory_space<vmem>>, vector<8x32xf32>
    %407 = arith.mulf %403, %406 : vector<8x32xf32>
    %408 = arith.mulf %402, %404 : vector<8x32xf32>
    %409 = arith.addf %407, %408 : vector<8x32xf32>
    %410 = math.tanh %409 : vector<8x32xf32>
    %411 = arith.mulf %405, %410 : vector<8x32xf32>
    %c0_248 = arith.constant 0 : index
    %c0_249 = arith.constant 0 : index
    %412 = vector.load %arg18[%c0_248, %c0_249] : memref<8x32xf32, #tpu.memory_space<vmem>>, vector<8x32xf32>
    tpu.vector_store %arg18[%c0_248, %c0_249], %409 {strides = array<i32>} : memref<8x32xf32, #tpu.memory_space<vmem>>, vector<8x32xf32>,
    %c0_250 = arith.constant 0 : index
    %c0_251 = arith.constant 0 : index
    %413 = vector.load %arg17[%c0_250, %c0_251] : memref<8x128xf32, #tpu.memory_space<vmem>>, vector<8x32xf32>
    tpu.vector_store %arg17[%c0_250, %c0_251], %411 {strides = array<i32>} : memref<8x128xf32, #tpu.memory_space<vmem>>, vector<8x32xf32>,
    %c2_i32_252 = arith.constant 2 : i32
    %c8_i32_253 = arith.constant 8 : i32
    %414 = arith.muli %c2_i32_252, %c8_i32_253 : i32
    %415 = tpu.assume_multiple %414, 8 : i32
    %416 = arith.index_cast %415 : i32 to index
    %c0_254 = arith.constant 0 : index
    %417 = vector.load %arg15[%416, %c0_254] : memref<64x128xf32, #tpu.memory_space<vmem>>, vector<8x128xf32>
    %c0_255 = arith.constant 0 : index
    %c0_256 = arith.constant 0 : index
    %418 = vector.load %arg17[%c0_255, %c0_256] : memref<8x128xf32, #tpu.memory_space<vmem>>, vector<8x128xf32>
    %c1_257 = arith.constant 1 : index
    %c0_258 = arith.constant 0 : index
    %c0_259 = arith.constant 0 : index
    %419 = vector.load %arg4[%c1_257, %c0_258, %c0_259] : memref<2x128x128xf32, #tpu.memory_space<vmem>>, vector<1x128x128xf32>
    %420 = vector.shape_cast %419 : vector<1x128x128xf32> to vector<128x128xf32>
    %cst_260 = arith.constant dense<0.000000e+00> : vector<8x128xf32>
    %421 = tpu.matmul %418, %420, %cst_260 {dimension_numbers = #tpu.dot_dimension_numbers<[1], [0], [0], [1], [0, 0, 1, 1], [], []>} : vector<8x128xf32>, vector<128x128xf32>, vector<8x128xf32> -> vector<8x128xf32>
    %422 = arith.addf %417, %421 : vector<8x128xf32>
    %cst_261 = arith.constant 5.000000e-01 : f32
    %423 = vector.broadcast %cst_261 : f32 to vector<8x128xf32>
    %424 = arith.mulf %423, %422 : vector<8x128xf32>
    %425 = arith.select %71, %422, %424 : vector<8x128xi1>, vector<8x128xf32>
    %426 = math.tanh %425 : vector<8x128xf32>
    %cst_262 = arith.constant 5.000000e-01 : f32
    %427 = vector.broadcast %cst_262 : f32 to vector<8x128xf32>
    %428 = arith.mulf %427, %426 : vector<8x128xf32>
    %cst_263 = arith.constant 5.000000e-01 : f32
    %429 = vector.broadcast %cst_263 : f32 to vector<8x128xf32>
    %430 = arith.addf %428, %429 : vector<8x128xf32>
    %431 = arith.select %71, %426, %430 : vector<8x128xi1>, vector<8x128xf32>
    %432 = vector.extract_strided_slice %431 {offsets = [0, 0], sizes = [8, 32], strides = [1, 1]} : vector<8x128xf32> to vector<8x32xf32>
    %433 = vector.extract_strided_slice %431 {offsets = [0, 32], sizes = [8, 32], strides = [1, 1]} : vector<8x128xf32> to vector<8x32xf32>
    %434 = vector.extract_strided_slice %431 {offsets = [0, 64], sizes = [8, 32], strides = [1, 1]} : vector<8x128xf32> to vector<8x32xf32>
    %435 = vector.extract_strided_slice %431 {offsets = [0, 96], sizes = [8, 32], strides = [1, 1]} : vector<8x128xf32> to vector<8x32xf32>
    %c0_264 = arith.constant 0 : index
    %c0_265 = arith.constant 0 : index
    %436 = vector.load %arg18[%c0_264, %c0_265] : memref<8x32xf32, #tpu.memory_space<vmem>>, vector<8x32xf32>
    %437 = arith.mulf %433, %436 : vector<8x32xf32>
    %438 = arith.mulf %432, %434 : vector<8x32xf32>
    %439 = arith.addf %437, %438 : vector<8x32xf32>
    %440 = math.tanh %439 : vector<8x32xf32>
    %441 = arith.mulf %435, %440 : vector<8x32xf32>
    %c0_266 = arith.constant 0 : index
    %c0_267 = arith.constant 0 : index
    %442 = vector.load %arg18[%c0_266, %c0_267] : memref<8x32xf32, #tpu.memory_space<vmem>>, vector<8x32xf32>
    tpu.vector_store %arg18[%c0_266, %c0_267], %439 {strides = array<i32>} : memref<8x32xf32, #tpu.memory_space<vmem>>, vector<8x32xf32>,
    %c0_268 = arith.constant 0 : index
    %c0_269 = arith.constant 0 : index
    %443 = vector.load %arg17[%c0_268, %c0_269] : memref<8x128xf32, #tpu.memory_space<vmem>>, vector<8x32xf32>
    tpu.vector_store %arg17[%c0_268, %c0_269], %441 {strides = array<i32>} : memref<8x128xf32, #tpu.memory_space<vmem>>, vector<8x32xf32>,
    %c3_i32_270 = arith.constant 3 : i32
    %c8_i32_271 = arith.constant 8 : i32
    %444 = arith.muli %c3_i32_270, %c8_i32_271 : i32
    %445 = tpu.assume_multiple %444, 8 : i32
    %446 = arith.index_cast %445 : i32 to index
    %c0_272 = arith.constant 0 : index
    %447 = vector.load %arg15[%446, %c0_272] : memref<64x128xf32, #tpu.memory_space<vmem>>, vector<8x128xf32>
    %c0_273 = arith.constant 0 : index
    %c0_274 = arith.constant 0 : index
    %448 = vector.load %arg17[%c0_273, %c0_274] : memref<8x128xf32, #tpu.memory_space<vmem>>, vector<8x128xf32>
    %c1_275 = arith.constant 1 : index
    %c0_276 = arith.constant 0 : index
    %c0_277 = arith.constant 0 : index
    %449 = vector.load %arg4[%c1_275, %c0_276, %c0_277] : memref<2x128x128xf32, #tpu.memory_space<vmem>>, vector<1x128x128xf32>
    %450 = vector.shape_cast %449 : vector<1x128x128xf32> to vector<128x128xf32>
    %cst_278 = arith.constant dense<0.000000e+00> : vector<8x128xf32>
    %451 = tpu.matmul %448, %450, %cst_278 {dimension_numbers = #tpu.dot_dimension_numbers<[1], [0], [0], [1], [0, 0, 1, 1], [], []>} : vector<8x128xf32>, vector<128x128xf32>, vector<8x128xf32> -> vector<8x128xf32>
    %452 = arith.addf %447, %451 : vector<8x128xf32>
    %cst_279 = arith.constant 5.000000e-01 : f32
    %453 = vector.broadcast %cst_279 : f32 to vector<8x128xf32>
    %454 = arith.mulf %453, %452 : vector<8x128xf32>
    %455 = arith.select %71, %452, %454 : vector<8x128xi1>, vector<8x128xf32>
    %456 = math.tanh %455 : vector<8x128xf32>
    %cst_280 = arith.constant 5.000000e-01 : f32
    %457 = vector.broadcast %cst_280 : f32 to vector<8x128xf32>
    %458 = arith.mulf %457, %456 : vector<8x128xf32>
    %cst_281 = arith.constant 5.000000e-01 : f32
    %459 = vector.broadcast %cst_281 : f32 to vector<8x128xf32>
    %460 = arith.addf %458, %459 : vector<8x128xf32>
    %461 = arith.select %71, %456, %460 : vector<8x128xi1>, vector<8x128xf32>
    %462 = vector.extract_strided_slice %461 {offsets = [0, 0], sizes = [8, 32], strides = [1, 1]} : vector<8x128xf32> to vector<8x32xf32>
    %463 = vector.extract_strided_slice %461 {offsets = [0, 32], sizes = [8, 32], strides = [1, 1]} : vector<8x128xf32> to vector<8x32xf32>
    %464 = vector.extract_strided_slice %461 {offsets = [0, 64], sizes = [8, 32], strides = [1, 1]} : vector<8x128xf32> to vector<8x32xf32>
    %465 = vector.extract_strided_slice %461 {offsets = [0, 96], sizes = [8, 32], strides = [1, 1]} : vector<8x128xf32> to vector<8x32xf32>
    %c0_282 = arith.constant 0 : index
    %c0_283 = arith.constant 0 : index
    %466 = vector.load %arg18[%c0_282, %c0_283] : memref<8x32xf32, #tpu.memory_space<vmem>>, vector<8x32xf32>
    %467 = arith.mulf %463, %466 : vector<8x32xf32>
    %468 = arith.mulf %462, %464 : vector<8x32xf32>
    %469 = arith.addf %467, %468 : vector<8x32xf32>
    %470 = math.tanh %469 : vector<8x32xf32>
    %471 = arith.mulf %465, %470 : vector<8x32xf32>
    %c0_284 = arith.constant 0 : index
    %c0_285 = arith.constant 0 : index
    %472 = vector.load %arg18[%c0_284, %c0_285] : memref<8x32xf32, #tpu.memory_space<vmem>>, vector<8x32xf32>
    tpu.vector_store %arg18[%c0_284, %c0_285], %469 {strides = array<i32>} : memref<8x32xf32, #tpu.memory_space<vmem>>, vector<8x32xf32>,
    %c0_286 = arith.constant 0 : index
    %c0_287 = arith.constant 0 : index
    %473 = vector.load %arg17[%c0_286, %c0_287] : memref<8x128xf32, #tpu.memory_space<vmem>>, vector<8x32xf32>
    tpu.vector_store %arg17[%c0_286, %c0_287], %471 {strides = array<i32>} : memref<8x128xf32, #tpu.memory_space<vmem>>, vector<8x32xf32>,
    %c4_i32_288 = arith.constant 4 : i32
    %c8_i32_289 = arith.constant 8 : i32
    %474 = arith.muli %c4_i32_288, %c8_i32_289 : i32
    %475 = tpu.assume_multiple %474, 8 : i32
    %476 = arith.index_cast %475 : i32 to index
    %c0_290 = arith.constant 0 : index
    %477 = vector.load %arg15[%476, %c0_290] : memref<64x128xf32, #tpu.memory_space<vmem>>, vector<8x128xf32>
    %c0_291 = arith.constant 0 : index
    %c0_292 = arith.constant 0 : index
    %478 = vector.load %arg17[%c0_291, %c0_292] : memref<8x128xf32, #tpu.memory_space<vmem>>, vector<8x128xf32>
    %c1_293 = arith.constant 1 : index
    %c0_294 = arith.constant 0 : index
    %c0_295 = arith.constant 0 : index
    %479 = vector.load %arg4[%c1_293, %c0_294, %c0_295] : memref<2x128x128xf32, #tpu.memory_space<vmem>>, vector<1x128x128xf32>
    %480 = vector.shape_cast %479 : vector<1x128x128xf32> to vector<128x128xf32>
    %cst_296 = arith.constant dense<0.000000e+00> : vector<8x128xf32>
    %481 = tpu.matmul %478, %480, %cst_296 {dimension_numbers = #tpu.dot_dimension_numbers<[1], [0], [0], [1], [0, 0, 1, 1], [], []>} : vector<8x128xf32>, vector<128x128xf32>, vector<8x128xf32> -> vector<8x128xf32>
    %482 = arith.addf %477, %481 : vector<8x128xf32>
    %cst_297 = arith.constant 5.000000e-01 : f32
    %483 = vector.broadcast %cst_297 : f32 to vector<8x128xf32>
    %484 = arith.mulf %483, %482 : vector<8x128xf32>
    %485 = arith.select %71, %482, %484 : vector<8x128xi1>, vector<8x128xf32>
    %486 = math.tanh %485 : vector<8x128xf32>
    %cst_298 = arith.constant 5.000000e-01 : f32
    %487 = vector.broadcast %cst_298 : f32 to vector<8x128xf32>
    %488 = arith.mulf %487, %486 : vector<8x128xf32>
    %cst_299 = arith.constant 5.000000e-01 : f32
    %489 = vector.broadcast %cst_299 : f32 to vector<8x128xf32>
    %490 = arith.addf %488, %489 : vector<8x128xf32>
    %491 = arith.select %71, %486, %490 : vector<8x128xi1>, vector<8x128xf32>
    %492 = vector.extract_strided_slice %491 {offsets = [0, 0], sizes = [8, 32], strides = [1, 1]} : vector<8x128xf32> to vector<8x32xf32>
    %493 = vector.extract_strided_slice %491 {offsets = [0, 32], sizes = [8, 32], strides = [1, 1]} : vector<8x128xf32> to vector<8x32xf32>
    %494 = vector.extract_strided_slice %491 {offsets = [0, 64], sizes = [8, 32], strides = [1, 1]} : vector<8x128xf32> to vector<8x32xf32>
    %495 = vector.extract_strided_slice %491 {offsets = [0, 96], sizes = [8, 32], strides = [1, 1]} : vector<8x128xf32> to vector<8x32xf32>
    %c0_300 = arith.constant 0 : index
    %c0_301 = arith.constant 0 : index
    %496 = vector.load %arg18[%c0_300, %c0_301] : memref<8x32xf32, #tpu.memory_space<vmem>>, vector<8x32xf32>
    %497 = arith.mulf %493, %496 : vector<8x32xf32>
    %498 = arith.mulf %492, %494 : vector<8x32xf32>
    %499 = arith.addf %497, %498 : vector<8x32xf32>
    %500 = math.tanh %499 : vector<8x32xf32>
    %501 = arith.mulf %495, %500 : vector<8x32xf32>
    %c0_302 = arith.constant 0 : index
    %c0_303 = arith.constant 0 : index
    %502 = vector.load %arg18[%c0_302, %c0_303] : memref<8x32xf32, #tpu.memory_space<vmem>>, vector<8x32xf32>
    tpu.vector_store %arg18[%c0_302, %c0_303], %499 {strides = array<i32>} : memref<8x32xf32, #tpu.memory_space<vmem>>, vector<8x32xf32>,
    %c0_304 = arith.constant 0 : index
    %c0_305 = arith.constant 0 : index
    %503 = vector.load %arg17[%c0_304, %c0_305] : memref<8x128xf32, #tpu.memory_space<vmem>>, vector<8x32xf32>
    tpu.vector_store %arg17[%c0_304, %c0_305], %501 {strides = array<i32>} : memref<8x128xf32, #tpu.memory_space<vmem>>, vector<8x32xf32>,
    %c5_i32_306 = arith.constant 5 : i32
    %c8_i32_307 = arith.constant 8 : i32
    %504 = arith.muli %c5_i32_306, %c8_i32_307 : i32
    %505 = tpu.assume_multiple %504, 8 : i32
    %506 = arith.index_cast %505 : i32 to index
    %c0_308 = arith.constant 0 : index
    %507 = vector.load %arg15[%506, %c0_308] : memref<64x128xf32, #tpu.memory_space<vmem>>, vector<8x128xf32>
    %c0_309 = arith.constant 0 : index
    %c0_310 = arith.constant 0 : index
    %508 = vector.load %arg17[%c0_309, %c0_310] : memref<8x128xf32, #tpu.memory_space<vmem>>, vector<8x128xf32>
    %c1_311 = arith.constant 1 : index
    %c0_312 = arith.constant 0 : index
    %c0_313 = arith.constant 0 : index
    %509 = vector.load %arg4[%c1_311, %c0_312, %c0_313] : memref<2x128x128xf32, #tpu.memory_space<vmem>>, vector<1x128x128xf32>
    %510 = vector.shape_cast %509 : vector<1x128x128xf32> to vector<128x128xf32>
    %cst_314 = arith.constant dense<0.000000e+00> : vector<8x128xf32>
    %511 = tpu.matmul %508, %510, %cst_314 {dimension_numbers = #tpu.dot_dimension_numbers<[1], [0], [0], [1], [0, 0, 1, 1], [], []>} : vector<8x128xf32>, vector<128x128xf32>, vector<8x128xf32> -> vector<8x128xf32>
    %512 = arith.addf %507, %511 : vector<8x128xf32>
    %cst_315 = arith.constant 5.000000e-01 : f32
    %513 = vector.broadcast %cst_315 : f32 to vector<8x128xf32>
    %514 = arith.mulf %513, %512 : vector<8x128xf32>
    %515 = arith.select %71, %512, %514 : vector<8x128xi1>, vector<8x128xf32>
    %516 = math.tanh %515 : vector<8x128xf32>
    %cst_316 = arith.constant 5.000000e-01 : f32
    %517 = vector.broadcast %cst_316 : f32 to vector<8x128xf32>
    %518 = arith.mulf %517, %516 : vector<8x128xf32>
    %cst_317 = arith.constant 5.000000e-01 : f32
    %519 = vector.broadcast %cst_317 : f32 to vector<8x128xf32>
    %520 = arith.addf %518, %519 : vector<8x128xf32>
    %521 = arith.select %71, %516, %520 : vector<8x128xi1>, vector<8x128xf32>
    %522 = vector.extract_strided_slice %521 {offsets = [0, 0], sizes = [8, 32], strides = [1, 1]} : vector<8x128xf32> to vector<8x32xf32>
    %523 = vector.extract_strided_slice %521 {offsets = [0, 32], sizes = [8, 32], strides = [1, 1]} : vector<8x128xf32> to vector<8x32xf32>
    %524 = vector.extract_strided_slice %521 {offsets = [0, 64], sizes = [8, 32], strides = [1, 1]} : vector<8x128xf32> to vector<8x32xf32>
    %525 = vector.extract_strided_slice %521 {offsets = [0, 96], sizes = [8, 32], strides = [1, 1]} : vector<8x128xf32> to vector<8x32xf32>
    %c0_318 = arith.constant 0 : index
    %c0_319 = arith.constant 0 : index
    %526 = vector.load %arg18[%c0_318, %c0_319] : memref<8x32xf32, #tpu.memory_space<vmem>>, vector<8x32xf32>
    %527 = arith.mulf %523, %526 : vector<8x32xf32>
    %528 = arith.mulf %522, %524 : vector<8x32xf32>
    %529 = arith.addf %527, %528 : vector<8x32xf32>
    %530 = math.tanh %529 : vector<8x32xf32>
    %531 = arith.mulf %525, %530 : vector<8x32xf32>
    %c0_320 = arith.constant 0 : index
    %c0_321 = arith.constant 0 : index
    %532 = vector.load %arg18[%c0_320, %c0_321] : memref<8x32xf32, #tpu.memory_space<vmem>>, vector<8x32xf32>
    tpu.vector_store %arg18[%c0_320, %c0_321], %529 {strides = array<i32>} : memref<8x32xf32, #tpu.memory_space<vmem>>, vector<8x32xf32>,
    %c0_322 = arith.constant 0 : index
    %c0_323 = arith.constant 0 : index
    %533 = vector.load %arg17[%c0_322, %c0_323] : memref<8x128xf32, #tpu.memory_space<vmem>>, vector<8x32xf32>
    tpu.vector_store %arg17[%c0_322, %c0_323], %531 {strides = array<i32>} : memref<8x128xf32, #tpu.memory_space<vmem>>, vector<8x32xf32>,
    %c6_i32_324 = arith.constant 6 : i32
    %c8_i32_325 = arith.constant 8 : i32
    %534 = arith.muli %c6_i32_324, %c8_i32_325 : i32
    %535 = tpu.assume_multiple %534, 8 : i32
    %536 = arith.index_cast %535 : i32 to index
    %c0_326 = arith.constant 0 : index
    %537 = vector.load %arg15[%536, %c0_326] : memref<64x128xf32, #tpu.memory_space<vmem>>, vector<8x128xf32>
    %c0_327 = arith.constant 0 : index
    %c0_328 = arith.constant 0 : index
    %538 = vector.load %arg17[%c0_327, %c0_328] : memref<8x128xf32, #tpu.memory_space<vmem>>, vector<8x128xf32>
    %c1_329 = arith.constant 1 : index
    %c0_330 = arith.constant 0 : index
    %c0_331 = arith.constant 0 : index
    %539 = vector.load %arg4[%c1_329, %c0_330, %c0_331] : memref<2x128x128xf32, #tpu.memory_space<vmem>>, vector<1x128x128xf32>
    %540 = vector.shape_cast %539 : vector<1x128x128xf32> to vector<128x128xf32>
    %cst_332 = arith.constant dense<0.000000e+00> : vector<8x128xf32>
    %541 = tpu.matmul %538, %540, %cst_332 {dimension_numbers = #tpu.dot_dimension_numbers<[1], [0], [0], [1], [0, 0, 1, 1], [], []>} : vector<8x128xf32>, vector<128x128xf32>, vector<8x128xf32> -> vector<8x128xf32>
    %542 = arith.addf %537, %541 : vector<8x128xf32>
    %cst_333 = arith.constant 5.000000e-01 : f32
    %543 = vector.broadcast %cst_333 : f32 to vector<8x128xf32>
    %544 = arith.mulf %543, %542 : vector<8x128xf32>
    %545 = arith.select %71, %542, %544 : vector<8x128xi1>, vector<8x128xf32>
    %546 = math.tanh %545 : vector<8x128xf32>
    %cst_334 = arith.constant 5.000000e-01 : f32
    %547 = vector.broadcast %cst_334 : f32 to vector<8x128xf32>
    %548 = arith.mulf %547, %546 : vector<8x128xf32>
    %cst_335 = arith.constant 5.000000e-01 : f32
    %549 = vector.broadcast %cst_335 : f32 to vector<8x128xf32>
    %550 = arith.addf %548, %549 : vector<8x128xf32>
    %551 = arith.select %71, %546, %550 : vector<8x128xi1>, vector<8x128xf32>
    %552 = vector.extract_strided_slice %551 {offsets = [0, 0], sizes = [8, 32], strides = [1, 1]} : vector<8x128xf32> to vector<8x32xf32>
    %553 = vector.extract_strided_slice %551 {offsets = [0, 32], sizes = [8, 32], strides = [1, 1]} : vector<8x128xf32> to vector<8x32xf32>
    %554 = vector.extract_strided_slice %551 {offsets = [0, 64], sizes = [8, 32], strides = [1, 1]} : vector<8x128xf32> to vector<8x32xf32>
    %555 = vector.extract_strided_slice %551 {offsets = [0, 96], sizes = [8, 32], strides = [1, 1]} : vector<8x128xf32> to vector<8x32xf32>
    %c0_336 = arith.constant 0 : index
    %c0_337 = arith.constant 0 : index
    %556 = vector.load %arg18[%c0_336, %c0_337] : memref<8x32xf32, #tpu.memory_space<vmem>>, vector<8x32xf32>
    %557 = arith.mulf %553, %556 : vector<8x32xf32>
    %558 = arith.mulf %552, %554 : vector<8x32xf32>
    %559 = arith.addf %557, %558 : vector<8x32xf32>
    %560 = math.tanh %559 : vector<8x32xf32>
    %561 = arith.mulf %555, %560 : vector<8x32xf32>
    %c0_338 = arith.constant 0 : index
    %c0_339 = arith.constant 0 : index
    %562 = vector.load %arg18[%c0_338, %c0_339] : memref<8x32xf32, #tpu.memory_space<vmem>>, vector<8x32xf32>
    tpu.vector_store %arg18[%c0_338, %c0_339], %559 {strides = array<i32>} : memref<8x32xf32, #tpu.memory_space<vmem>>, vector<8x32xf32>,
    %c0_340 = arith.constant 0 : index
    %c0_341 = arith.constant 0 : index
    %563 = vector.load %arg17[%c0_340, %c0_341] : memref<8x128xf32, #tpu.memory_space<vmem>>, vector<8x32xf32>
    tpu.vector_store %arg17[%c0_340, %c0_341], %561 {strides = array<i32>} : memref<8x128xf32, #tpu.memory_space<vmem>>, vector<8x32xf32>,
    %c7_i32_342 = arith.constant 7 : i32
    %c8_i32_343 = arith.constant 8 : i32
    %564 = arith.muli %c7_i32_342, %c8_i32_343 : i32
    %565 = tpu.assume_multiple %564, 8 : i32
    %566 = arith.index_cast %565 : i32 to index
    %c0_344 = arith.constant 0 : index
    %567 = vector.load %arg15[%566, %c0_344] : memref<64x128xf32, #tpu.memory_space<vmem>>, vector<8x128xf32>
    %c0_345 = arith.constant 0 : index
    %c0_346 = arith.constant 0 : index
    %568 = vector.load %arg17[%c0_345, %c0_346] : memref<8x128xf32, #tpu.memory_space<vmem>>, vector<8x128xf32>
    %c1_347 = arith.constant 1 : index
    %c0_348 = arith.constant 0 : index
    %c0_349 = arith.constant 0 : index
    %569 = vector.load %arg4[%c1_347, %c0_348, %c0_349] : memref<2x128x128xf32, #tpu.memory_space<vmem>>, vector<1x128x128xf32>
    %570 = vector.shape_cast %569 : vector<1x128x128xf32> to vector<128x128xf32>
    %cst_350 = arith.constant dense<0.000000e+00> : vector<8x128xf32>
    %571 = tpu.matmul %568, %570, %cst_350 {dimension_numbers = #tpu.dot_dimension_numbers<[1], [0], [0], [1], [0, 0, 1, 1], [], []>} : vector<8x128xf32>, vector<128x128xf32>, vector<8x128xf32> -> vector<8x128xf32>
    %572 = arith.addf %567, %571 : vector<8x128xf32>
    %cst_351 = arith.constant 5.000000e-01 : f32
    %573 = vector.broadcast %cst_351 : f32 to vector<8x128xf32>
    %574 = arith.mulf %573, %572 : vector<8x128xf32>
    %575 = arith.select %71, %572, %574 : vector<8x128xi1>, vector<8x128xf32>
    %576 = math.tanh %575 : vector<8x128xf32>
    %cst_352 = arith.constant 5.000000e-01 : f32
    %577 = vector.broadcast %cst_352 : f32 to vector<8x128xf32>
    %578 = arith.mulf %577, %576 : vector<8x128xf32>
    %cst_353 = arith.constant 5.000000e-01 : f32
    %579 = vector.broadcast %cst_353 : f32 to vector<8x128xf32>
    %580 = arith.addf %578, %579 : vector<8x128xf32>
    %581 = arith.select %71, %576, %580 : vector<8x128xi1>, vector<8x128xf32>
    %582 = vector.extract_strided_slice %581 {offsets = [0, 0], sizes = [8, 32], strides = [1, 1]} : vector<8x128xf32> to vector<8x32xf32>
    %583 = vector.extract_strided_slice %581 {offsets = [0, 32], sizes = [8, 32], strides = [1, 1]} : vector<8x128xf32> to vector<8x32xf32>
    %584 = vector.extract_strided_slice %581 {offsets = [0, 64], sizes = [8, 32], strides = [1, 1]} : vector<8x128xf32> to vector<8x32xf32>
    %585 = vector.extract_strided_slice %581 {offsets = [0, 96], sizes = [8, 32], strides = [1, 1]} : vector<8x128xf32> to vector<8x32xf32>
    %c0_354 = arith.constant 0 : index
    %c0_355 = arith.constant 0 : index
    %586 = vector.load %arg18[%c0_354, %c0_355] : memref<8x32xf32, #tpu.memory_space<vmem>>, vector<8x32xf32>
    %587 = arith.mulf %583, %586 : vector<8x32xf32>
    %588 = arith.mulf %582, %584 : vector<8x32xf32>
    %589 = arith.addf %587, %588 : vector<8x32xf32>
    %590 = math.tanh %589 : vector<8x32xf32>
    %591 = arith.mulf %585, %590 : vector<8x32xf32>
    %c0_356 = arith.constant 0 : index
    %c0_357 = arith.constant 0 : index
    %592 = vector.load %arg18[%c0_356, %c0_357] : memref<8x32xf32, #tpu.memory_space<vmem>>, vector<8x32xf32>
    tpu.vector_store %arg18[%c0_356, %c0_357], %589 {strides = array<i32>} : memref<8x32xf32, #tpu.memory_space<vmem>>, vector<8x32xf32>,
    %c0_358 = arith.constant 0 : index
    %c0_359 = arith.constant 0 : index
    %593 = vector.load %arg17[%c0_358, %c0_359] : memref<8x128xf32, #tpu.memory_space<vmem>>, vector<8x32xf32>
    tpu.vector_store %arg17[%c0_358, %c0_359], %591 {strides = array<i32>} : memref<8x128xf32, #tpu.memory_space<vmem>>, vector<8x32xf32>,
    %c8_i32_360 = arith.constant 8 : i32
    %c0_361 = arith.constant 0 : index
    %c0_362 = arith.constant 0 : index
    %594 = vector.load %arg17[%c0_361, %c0_362] : memref<8x128xf32, #tpu.memory_space<vmem>>, vector<8x128xf32>
    %c0_363 = arith.constant 0 : index
    %c0_364 = arith.constant 0 : index
    %595 = vector.load %arg6[%c0_363, %c0_364] : memref<128x128xf32, #tpu.memory_space<vmem>>, vector<128x128xf32>
    %cst_365 = arith.constant dense<0.000000e+00> : vector<8x128xf32>
    %596 = tpu.matmul %594, %595, %cst_365 {dimension_numbers = #tpu.dot_dimension_numbers<[1], [0], [0], [1], [0, 0, 1, 1], [], []>} : vector<8x128xf32>, vector<128x128xf32>, vector<8x128xf32> -> vector<8x128xf32>
    %c0_366 = arith.constant 0 : index
    %c0_367 = arith.constant 0 : index
    %597 = vector.load %arg7[%c0_366, %c0_367] : memref<1x128xf32, #tpu.memory_space<vmem>>, vector<1x128xf32>
    %598 = vector.broadcast %597 : vector<1x128xf32> to vector<8x128xf32>
    %599 = arith.addf %596, %598 : vector<8x128xf32>
    %cst_368 = arith.constant 0.000000e+00 : f32
    %600 = vector.broadcast %cst_368 : f32 to vector<8x128xf32>
    %601 = arith.maximumf %599, %600 : vector<8x128xf32>
    %c0_369 = arith.constant 0 : index
    %c0_370 = arith.constant 0 : index
    %602 = vector.load %arg8[%c0_369, %c0_370] : memref<128x256xf32, #tpu.memory_space<vmem>>, vector<128x256xf32>
    %cst_371 = arith.constant dense<0.000000e+00> : vector<8x256xf32>
    %603 = tpu.matmul %601, %602, %cst_371 {dimension_numbers = #tpu.dot_dimension_numbers<[1], [0], [0], [1], [0, 0, 1, 1], [], []>} : vector<8x128xf32>, vector<128x256xf32>, vector<8x256xf32> -> vector<8x256xf32>
    %c0_372 = arith.constant 0 : index
    %c0_373 = arith.constant 0 : index
    %604 = vector.load %arg9[%c0_372, %c0_373] : memref<1x256xf32, #tpu.memory_space<vmem>>, vector<1x256xf32>
    %605 = vector.broadcast %604 : vector<1x256xf32> to vector<8x256xf32>
    %606 = arith.addf %603, %605 : vector<8x256xf32>
    %cst_374 = arith.constant 0.000000e+00 : f32
    %607 = vector.broadcast %cst_374 : f32 to vector<8x256xf32>
    %608 = arith.maximumf %606, %607 : vector<8x256xf32>
    %c0_375 = arith.constant 0 : index
    %c0_376 = arith.constant 0 : index
    %609 = vector.load %arg10[%c0_375, %c0_376] : memref<256x128xf32, #tpu.memory_space<vmem>>, vector<256x128xf32>
    %cst_377 = arith.constant dense<0.000000e+00> : vector<8x128xf32>
    %610 = tpu.matmul %608, %609, %cst_377 {dimension_numbers = #tpu.dot_dimension_numbers<[1], [0], [0], [1], [0, 0, 1, 1], [], []>} : vector<8x256xf32>, vector<256x128xf32>, vector<8x128xf32> -> vector<8x128xf32>
    %c0_378 = arith.constant 0 : index
    %c0_379 = arith.constant 0 : index
    %611 = vector.load %arg11[%c0_378, %c0_379] : memref<1x128xf32, #tpu.memory_space<vmem>>, vector<1x128xf32>
    %612 = vector.broadcast %611 : vector<1x128xf32> to vector<8x128xf32>
    %613 = arith.addf %610, %612 : vector<8x128xf32>
    %cst_380 = arith.constant 0.000000e+00 : f32
    %614 = vector.broadcast %cst_380 : f32 to vector<8x128xf32>
    %615 = arith.maximumf %613, %614 : vector<8x128xf32>
    %c0_381 = arith.constant 0 : index
    %c0_382 = arith.constant 0 : index
    %616 = vector.load %arg12[%c0_381, %c0_382] : memref<128x128xf32, #tpu.memory_space<vmem>>, vector<128x128xf32>
    %cst_383 = arith.constant dense<0.000000e+00> : vector<8x128xf32>
    %617 = tpu.matmul %615, %616, %cst_383 {dimension_numbers = #tpu.dot_dimension_numbers<[1], [0], [0], [1], [0, 0, 1, 1], [], []>} : vector<8x128xf32>, vector<128x128xf32>, vector<8x128xf32> -> vector<8x128xf32>
    %c0_384 = arith.constant 0 : index
    %c0_385 = arith.constant 0 : index
    %618 = vector.load %arg13[%c0_384, %c0_385] : memref<1x128xf32, #tpu.memory_space<vmem>>, vector<1x128xf32>
    %619 = vector.broadcast %618 : vector<1x128xf32> to vector<8x128xf32>
    %620 = arith.addf %617, %619 : vector<8x128xf32>
    %621 = arith.negf %620 : vector<8x128xf32>
    %622 = math.exp %621 : vector<8x128xf32>
    %cst_386 = arith.constant 1.000000e+00 : f32
    %623 = vector.broadcast %cst_386 : f32 to vector<8x128xf32>
    %624 = arith.addf %623, %622 : vector<8x128xf32>
    %625 = arith.divf %623, %624 : vector<8x128xf32>
    %c0_387 = arith.constant 0 : index
    %c0_388 = arith.constant 0 : index
    %626 = vector.load %arg14[%c0_387, %c0_388] : memref<8x128xf32, #tpu.memory_space<vmem>>, vector<8x128xf32>
    tpu.vector_store %arg14[%c0_387, %c0_388], %625 {strides = array<i32>} : memref<8x128xf32, #tpu.memory_space<vmem>>, vector<8x128xf32>,
    return
  }
  func.func @transform_0(%arg0: i32, %arg1: memref<16xi32, #tpu.memory_space<smem>>) -> (i32, i32) {
    %c0_i32 = arith.constant 0 : i32
    %c0_i32_0 = arith.constant 0 : i32
    %c0_i32_1 = arith.constant 0 : i32
    return %c0_i32, %c0_i32_0 : i32, i32
  }
  func.func @transform_1(%arg0: i32, %arg1: memref<16xi32, #tpu.memory_space<smem>>) -> (i32, i32, i32) {
    %c0_i32 = arith.constant 0 : i32
    %c0_i32_0 = arith.constant 0 : i32
    %c0_i32_1 = arith.constant 0 : i32
    %c0_i32_2 = arith.constant 0 : i32
    return %c0_i32, %c0_i32_0, %c0_i32_1 : i32, i32, i32
  }
  func.func @transform_2(%arg0: i32, %arg1: memref<16xi32, #tpu.memory_space<smem>>) -> (i32, i32, i32) {
    %c0_i32 = arith.constant 0 : i32
    %c0_i32_0 = arith.constant 0 : i32
    %c0_i32_1 = arith.constant 0 : i32
    %c0_i32_2 = arith.constant 0 : i32
    return %c0_i32, %c0_i32_0, %c0_i32_1 : i32, i32, i32
  }
  func.func @transform_3(%arg0: i32, %arg1: memref<16xi32, #tpu.memory_space<smem>>) -> (i32, i32, i32) {
    %c0_i32 = arith.constant 0 : i32
    %c0_i32_0 = arith.constant 0 : i32
    %c0_i32_1 = arith.constant 0 : i32
    %c0_i32_2 = arith.constant 0 : i32
    return %c0_i32, %c0_i32_0, %c0_i32_1 : i32, i32, i32
  }
  func.func @transform_4(%arg0: i32, %arg1: memref<16xi32, #tpu.memory_space<smem>>) -> (i32, i32) {
    %c0_i32 = arith.constant 0 : i32
    %c0_i32_0 = arith.constant 0 : i32
    %c0_i32_1 = arith.constant 0 : i32
    return %c0_i32, %c0_i32_0 : i32, i32
  }
  func.func @transform_5(%arg0: i32, %arg1: memref<16xi32, #tpu.memory_space<smem>>) -> (i32, i32) {
    %c0_i32 = arith.constant 0 : i32
    %c0_i32_0 = arith.constant 0 : i32
    %c0_i32_1 = arith.constant 0 : i32
    return %c0_i32, %c0_i32_0 : i32, i32
  }
  func.func @transform_6(%arg0: i32, %arg1: memref<16xi32, #tpu.memory_space<smem>>) -> (i32, i32) {
    %c0_i32 = arith.constant 0 : i32
    %c0_i32_0 = arith.constant 0 : i32
    %c0_i32_1 = arith.constant 0 : i32
    return %c0_i32, %c0_i32_0 : i32, i32
  }
  func.func @transform_7(%arg0: i32, %arg1: memref<16xi32, #tpu.memory_space<smem>>) -> (i32, i32) {
    %c0_i32 = arith.constant 0 : i32
    %c0_i32_0 = arith.constant 0 : i32
    %c0_i32_1 = arith.constant 0 : i32
    return %c0_i32, %c0_i32_0 : i32, i32
  }
  func.func @transform_8(%arg0: i32, %arg1: memref<16xi32, #tpu.memory_space<smem>>) -> (i32, i32) {
    %c0_i32 = arith.constant 0 : i32
    %c0_i32_0 = arith.constant 0 : i32
    %c0_i32_1 = arith.constant 0 : i32
    return %c0_i32, %c0_i32_0 : i32, i32
  }
  func.func @transform_9(%arg0: i32, %arg1: memref<16xi32, #tpu.memory_space<smem>>) -> (i32, i32) {
    %c0_i32 = arith.constant 0 : i32
    %c0_i32_0 = arith.constant 0 : i32
    %c0_i32_1 = arith.constant 0 : i32
    return %c0_i32, %c0_i32_0 : i32, i32
  }
  func.func @transform_10(%arg0: i32, %arg1: memref<16xi32, #tpu.memory_space<smem>>) -> (i32, i32) {
    %c0_i32 = arith.constant 0 : i32
    %c0_i32_0 = arith.constant 0 : i32
    %c0_i32_1 = arith.constant 0 : i32
    return %c0_i32, %c0_i32_0 : i32, i32
  }
  func.func @transform_11(%arg0: i32, %arg1: memref<16xi32, #tpu.memory_space<smem>>) -> (i32, i32) {
    %c0_i32 = arith.constant 0 : i32
    %c0_i32_0 = arith.constant 0 : i32
    %c0_i32_1 = arith.constant 0 : i32
    return %c0_i32, %c0_i32_0 : i32, i32
  }
  func.func @transform_12(%arg0: i32, %arg1: memref<16xi32, #tpu.memory_space<smem>>) -> (i32, i32) {
    %c0_i32 = arith.constant 0 : i32
    %c0_i32_0 = arith.constant 0 : i32
    %c0_i32_1 = arith.constant 0 : i32
    return %c0_i32, %c0_i32_0 : i32, i32
  }
}

</mosaic_0001>

<bundles_post_ra>
// kernel: model_forward.1
= control target key start
LH: loop header
LB: loop body
LE: loop exit
PB: predicated region body
PF: predicated region fallthrough
CT: control target
= control target key end

     0   :  { %s5840_s0 = inlined_call_operand.vmem [shape: s32[16], index: 0, kind: input, shape index: {}]   ;;  %s5841_s1 = inlined_call_operand.hbm [shape: f32[56,128], index: 1, kind: input, shape index: {}]   ;;  %s5842_s2 = inlined_call_operand.hbm [shape: f32[2,128,128], index: 2, kind: input, shape index: {}]   ;;  %s5843_s3 = inlined_call_operand.hbm [shape: f32[2,128,128], index: 3, kind: input, shape index: {}]   ;;  %s5844_s4 = inlined_call_operand.vmem [shape: f32[2,1,128], index: 4, kind: input, shape index: {}]   ;;  %s5845_s5 = inlined_call_operand.hbm [shape: f32[128,128], index: 5, kind: input, shape index: {}]   ;;  %s5846_s6 = inlined_call_operand.vmem [shape: f32[1,128], index: 6, kind: input, shape index: {}]   ;;  %s5847_s7 = inlined_call_operand.hbm [shape: f32[128,256], index: 7, kind: input, shape index: {}]   ;;  %s5848_s8 = inlined_call_operand.vmem [shape: f32[1,256], index: 8, kind: input, shape index: {}]   ;;  %s5849_s9 = inlined_call_operand.hbm [shape: f32[256,128], index: 9, kind: input, shape index: {}]   ;;  %s5850_s10 = inlined_call_operand.vmem [shape: f32[1,128], index: 10, kind: input, shape index: {}]   ;;  %s5851_s11 = inlined_call_operand.hbm [shape: f32[128,128], index: 11, kind: input, shape index: {}]   ;;  %s5852_s12 = inlined_call_operand.vmem [shape: f32[1,128], index: 12, kind: input, shape index: {}]   ;;  %s5853_s13 = inlined_call_operand.vmem [shape: f32[8,128], index: 13, kind: output, shape index: {}]  }
   0x1   :  { %s18_s27 = sshll.u32 %s5840_s0, 4  ;;  %s19_s27 = int_to_ptr.vmem [resolvable:$true] %s18_s27 }
   0x2   :  { %s4792_s28 = scalar_lea.vmem %s19_s27, 16  ;;  %p4797_p1 = scmp.lt.s32.totalorder %s19_s27, %s19_s27 }
   0x3   :  { %p4793_p0 = scmp.ne.s32.totalorder %s19_s27, %s4792_s28  ;;  %p4798_p2 = scmp.lt.s32.totalorder %s4792_s28, %s4792_s28 }
   0x5   :  { %p4799_p3 = por %p4798_p2, %p4797_p1 }
   0x7   :  { %p4800_p4 = pnand %p4799_p3, %p4793_p0 }
   0x9   :  { %4803 = shalt.err (!%p4800_p4)  }
   0xa   :  { %s4968_s29 = smov [#allocation7]  }
   0xb   :  { %21 = dma.vmem_to_smem %s19_s27, 16, %s4968_s29, [#allocation6] }
   0xc   :  { %4958 = dma.done.wait [#allocation6], 16 }
   0xd   :  { %4959 = vsyncadd [#allocation6], 4294967280 }
   0xe   :  { %23 = sfence }
   0xf   :  { %24 = vsyncpa [#allocation9], 0 }
  0x10   :  { %25 = vsyncpa [#allocation11], 0 }
  0x11   :  { %26 = vsyncpa [#allocation14], 0 }
  0x12   :  { %27 = vsyncpa [#allocation17], 0  ;;  %s4969_s30 = smov [#allocation10]   ;;  %s4970_s0 = smov [#allocation13]  }
  0x13   :  { %s45_s14 = sshll.u32 %s4969_s30, 4  ;;  %s71_s15 = sshll.u32 %s4970_s0, 4  ;;  %s46_s14 = int_to_ptr.vmem [resolvable:$true] %s45_s14  ;;  %s5059_s15 = int_to_ptr.vmem [resolvable:$true] %s71_s15 }
  0x14   :  { %s4804_s18 = scalar_lea.hbm %s5842_s2, 4096 }
  0x15   :  { %p4805_p5 = scmp.ne.s32.totalorder %s5842_s2, %s4804_s18  ;;  %p4808_p6 = scmp.lt.u32.totalorder %s4804_s18, %s5842_s2 }
  0x17   :  { %p4810_p7 = pnand %p4808_p6, %p4805_p5 }
  0x19   :  { %4813 = shalt.err (!%p4810_p7)
}
  0x1a   :  { %s4814_s23 = scalar_lea.vmem %s46_s14, 4096  ;;  %p4819_p9 = scmp.lt.s32.totalorder %s46_s14, %s46_s14 }
  0x1b   :  { %p4815_p8 = scmp.ne.s32.totalorder %s46_s14, %s4814_s23  ;;  %p4820_p10 = scmp.lt.s32.totalorder %s4814_s23, %s4814_s23 }
  0x1d   :  { %p4821_p11 = por %p4820_p10, %p4819_p9 }
  0x1f   :  { %p4822_p12 = pnand %p4821_p11, %p4815_p8 }
  0x21   :  { %4825 = shalt.err (!%p4822_p12)
}
  0x22   :  { %s4971_s24 = smov 128   ;;  %s4972_s25 = smov 8  }
  0x23   :  { %51 = dma.hbm_to_vmem [thread:$0]  %s5842_s2, 4096, %s46_s14, [#allocation11], %s4971_s24, %s4971_s24, %s4972_s25  }
  0x24   :  { %s4826_s30 = scalar_lea.hbm %s5845_s5, 2048 }
  0x25   :  { %p4827_p13 = scmp.ne.s32.totalorder %s5845_s5, %s4826_s30  ;;  %p4830_p0 = scmp.lt.u32.totalorder %s4826_s30, %s5845_s5 }
  0x27   :  { %p4832_p1 = pnand %p4830_p0, %p4827_p13 }
  0x29   :  { %4835 = shalt.err (!%p4832_p1)
}
  0x2a   :  { %s4836_s19 = scalar_lea.vmem %s5059_s15, 2048  ;;  %p4841_p3 = scmp.lt.s32.totalorder %s5059_s15, %s5059_s15 }
  0x2b   :  { %p4837_p2 = scmp.ne.s32.totalorder %s5059_s15, %s4836_s19  ;;  %p4842_p4 = scmp.lt.s32.totalorder %s4836_s19, %s4836_s19 }
  0x2d   :  { %p4843_p5 = por %p4842_p4, %p4841_p3 }
  0x2f   :  { %p4844_p6 = pnand %p4843_p5, %p4837_p2 }
  0x31   :  { %4847 = shalt.err (!%p4844_p6)
}
  0x32   :  { %77 = dma.hbm_to_vmem [thread:$0]  %s5845_s5, 2048, %s5059_s15, [#allocation14], %s4971_s24, %s4971_s24, %s4972_s25  }
  0x33   :  { %s4973_s20 = smov [#allocation16]   ;;  %s4974_s22 = smov [#allocation8]  }
  0x34   :  { %s99_s21 = sshll.u32 %s4973_s20, 4  ;;  %s33_s23 = sshll.u32 %s4974_s22, 4  ;;  %s100_s21 = int_to_ptr.vmem [resolvable:$true] %s99_s21  ;;  %s5096_s23 = int_to_ptr.vmem [resolvable:$true] %s33_s23 }
  0x35   :  { %s4848_s28 = scalar_lea.hbm %s5849_s9, 4096 }
  0x36   :  { %p4849_p7 = scmp.ne.s32.totalorder %s5849_s9, %s4848_s28  ;;  %p4852_p8 = scmp.lt.u32.totalorder %s4848_s28, %s5849_s9 }
  0x38   :  { %p4854_p9 = pnand %p4852_p8, %p4849_p7 }
  0x3a   :  { %4857 = shalt.err (!%p4854_p9)
}
  0x3b   :  { %s4858_s5 = scalar_lea.vmem %s100_s21, 4096  ;;  %p4863_p11 = scmp.lt.s32.totalorder %s100_s21, %s100_s21 }
  0x3c   :  { %p4859_p10 = scmp.ne.s32.totalorder %s100_s21, %s4858_s5  ;;  %p4864_p12 = scmp.lt.s32.totalorder %s4858_s5, %s4858_s5 }
  0x3e   :  { %p4865_p13 = por %p4864_p12, %p4863_p11 }
  0x40   :  { %p4866_p0 = pnand %p4865_p13, %p4859_p10 }
  0x42   :  { %4869 = shalt.err (!%p4866_p0)
}
  0x43   :  { %105 = dma.hbm_to_vmem [thread:$0]  %s5849_s9, 4096, %s100_s21, [#allocation17], %s4971_s24, %s4971_s24, %s4972_s25  }
  0x44   :  { %s4870_s2 = scalar_lea.hbm %s5841_s1, 896 }
  0x45   :  { %p4871_p1 = scmp.ne.s32.totalorder %s5841_s1, %s4870_s2  ;;  %p4874_p2 = scmp.lt.u32.totalorder %s4870_s2, %s5841_s1 }
  0x47   :  { %p4876_p3 = pnand %p4874_p2, %p4871_p1 }
  0x49   :  { %4879 = shalt.err (!%p4876_p3)
}
  0x4a   :  { %s4880_s27 = scalar_lea.vmem %s5096_s23, 896  ;;  %p4885_p5 = scmp.lt.s32.totalorder %s5096_s23, %s5096_s23 }
  0x4b   :  { %p4881_p4 = scmp.ne.s32.totalorder %s5096_s23, %s4880_s27  ;;  %p4886_p6 = scmp.lt.s32.totalorder %s4880_s27, %s4880_s27 }
  0x4d   :  { %p4887_p7 = por %p4886_p6, %p4885_p5 }
  0x4f   :  { %p4888_p8 = pnand %p4887_p7, %p4881_p4 }
  0x51   :  { %4891 = shalt.err (!%p4888_p8)
}
  0x52   :  { %39 = dma.hbm_to_vmem [thread:$0]  %s5841_s1, 896, %s5096_s23, [#allocation9], %s4971_s24, %s4971_s24, %s4972_s25  }
  0x53   :  { %s4975_s28 = smov [#allocation12]   ;;  %s4976_s30 = smov [#allocation15]  }
  0x54   :  { %s57_s29 = sshll.u32 %s4975_s28, 4  ;;  %s85_s0 = sshll.u32 %s4976_s30, 4  ;;  %s58_s29 = int_to_ptr.vmem [resolvable:$true] %s57_s29  ;;  %s5133_s0 = int_to_ptr.vmem [resolvable:$true] %s85_s0 }
  0x55   :  { %s4892_s15 = scalar_lea.hbm %s5843_s3, 4096 }
  0x56   :  { %p4893_p9 = scmp.ne.s32.totalorder %s5843_s3, %s4892_s15  ;;  %p4896_p10 = scmp.lt.u32.totalorder %s4892_s15, %s5843_s3 }
  0x58   :  { %p4898_p11 = pnand %p4896_p10, %p4893_p9 }
  0x5a   :  { %4901 = shalt.err (!%p4898_p11)
}
  0x5b   :  { %s4902_s1 = scalar_lea.vmem %s58_s29, 4096  ;;  %p4907_p13 = scmp.lt.s32.totalorder %s58_s29, %s58_s29 }
  0x5c   :  { %p4903_p12 = scmp.ne.s32.totalorder %s58_s29, %s4902_s1  ;;  %p4908_p0 = scmp.lt.s32.totalorder %s4902_s1, %s4902_s1 }
  0x5e   :  { %p4909_p1 = por %p4908_p0, %p4907_p13 }
  0x60   :  { %p4910_p2 = pnand %p4909_p1, %p4903_p12 }
  0x62   :  { %4913 = shalt.err (!%p4910_p2)
}
  0x63   :  { %63 = dma.hbm_to_vmem [thread:$0]  %s5843_s3, 4096, %s58_s29, [#allocation11], %s4971_s24, %s4971_s24, %s4972_s25  }
  0x64   :  { %s4914_s26 = scalar_lea.hbm %s5847_s7, 4096 }
  0x65   :  { %p4915_p3 = scmp.ne.s32.totalorder %s5847_s7, %s4914_s26  ;;  %p4918_p4 = scmp.lt.u32.totalorder %s4914_s26, %s5847_s7 }
  0x67   :  { %p4920_p5 = pnand %p4918_p4, %p4915_p3 }
  0x69   :  { %4923 = shalt.err (!%p4920_p5)
}
  0x6a   :  { %s4924_s30 = scalar_lea.vmem %s5133_s0, 4096  ;;  %p4929_p7 = scmp.lt.s32.totalorder %s5133_s0, %s5133_s0 }
  0x6b   :  { %p4925_p6 = scmp.ne.s32.totalorder %s5133_s0, %s4924_s30  ;;  %p4930_p8 = scmp.lt.s32.totalorder %s4924_s30, %s4924_s30 }
  0x6d   :  { %p4931_p9 = por %p4930_p8, %p4929_p7 }
  0x6f   :  { %p4932_p10 = pnand %p4931_p9, %p4925_p6 }
  0x71   :  { %4935 = shalt.err (!%p4932_p10)
}
  0x72   :  { %s4977_s3 = smov 256   ;;  %s4978_s29 = smov 16  }
  0x73   :  { %91 = dma.hbm_to_vmem [thread:$0]  %s5847_s7, 4096, %s5133_s0, [#allocation14], %s4977_s3, %s4977_s3, %s4978_s29  }
  0x74   :  { %s4979_s15 = smov [#allocation18]   ;;  %s4936_s2 = scalar_lea.hbm %s5851_s11, 2048 }
  0x75   :  { %s113_s17 = sshll.u32 %s4979_s15, 4  ;;  %p4937_p11 = scmp.ne.s32.totalorder %s5851_s11, %s4936_s2  ;;  %s114_s17 = int_to_ptr.vmem [resolvable:$true] %s113_s17 }
  0x76   :  { %p4940_p12 = scmp.lt.u32.totalorder %s4936_s2, %s5851_s11 }
  0x78   :  { %p4942_p13 = pnand %p4940_p12, %p4937_p11 }
  0x7a   :  { %4945 = shalt.err (!%p4942_p13)
}
  0x7b   :  { %s4946_s22 = scalar_lea.vmem %s114_s17, 2048  ;;  %p4951_p1 = scmp.lt.s32.totalorder %s114_s17, %s114_s17 }
  0x7c   :  { %p4947_p0 = scmp.ne.s32.totalorder %s114_s17, %s4946_s22  ;;  %p4952_p2 = scmp.lt.s32.totalorder %s4946_s22, %s4946_s22 }
  0x7e   :  { %p4953_p3 = por %p4952_p2, %p4951_p1 }
  0x80   :  { %p4954_p4 = pnand %p4953_p3, %p4947_p0 }
  0x82   :  { %4957 = shalt.err (!%p4954_p4)
}
  0x83   :  { %119 = dma.hbm_to_vmem [thread:$0]  %s5851_s11, 2048, %s114_s17, [#allocation17], %s4971_s24, %s4971_s24, %s4972_s25  }
  0x84   :  { %4960 = dma.done.wait [#allocation9], 896  }
  0x85   :  { %4961 = vsyncadd [#allocation9], 4294966400 }
  0x86   :  { %4962 = dma.done.wait [#allocation11], 8192  }
  0x87   :  { %4963 = vsyncadd [#allocation11], 4294959104 }
  0x88   :  { %4964 = dma.done.wait [#allocation14], 6144  }
  0x89   :  { %4965 = vsyncadd [#allocation14], 4294961152 }
  0x8a   :  { %4966 = dma.done.wait [#allocation17], 6144  }
  0x8b   :  { %4967 = vsyncadd [#allocation17], 4294961152  ;;  %v4980_v0 = vmov 0.0|0.0   ;;  %v4981_v1 = vmov 0.0   ;;  %vm4982_vm0 = vmmov 0   ;;  %s5194_s11 = sld [smem:[#allocation7]]  ;;  %v215_v56 = vlaneseq }
  0x8c   :  { %4177 = vmatprep.subr.bf16.mxu1 %v4980_v0  ;;  %143 = vst [vmem:[#allocation3] sm:$0xff] %v4981_v1  ;;  %144 = vst [vmem:[#allocation3 + $0x8] sm:$0xff] %v4981_v1  ;;  %3503 = vmatprep.mubr.msk.f32.mxu1 %vm4982_vm0, %v4981_v1  ;;  %s5196_s24 = sld [smem:[#allocation7 + $0x8]]  ;;  %s5198_s25 = sld [smem:[#allocation7 + $0x1]]  ;;  %v228_v2 = vld [vmem:[#allocation10] sm:$0xff]  ;;  %v229_v3 = vld [vmem:[#allocation10 + $0x8] sm:$0xff] }
  0x8d   :  { %145 = vst [vmem:[#allocation3 + $0x10] sm:$0xff] %v4981_v1  ;;  %146 = vst [vmem:[#allocation3 + $0x18] sm:$0xff] %v4981_v1  ;;  %v369_v4 = vld [vmem:[#allocation12] sm:$0xff]  ;;  %s5200_s26 = sld [smem:[#allocation7 + $0x9]]  ;;  %v4145_v5 = vpack.c.bf16 %v229_v3, %v228_v2  ;;  %v370_v6 = vld [vmem:[#allocation12 + $0x8] sm:$0xff]  ;;  %vm365_vm1 = vcmask 261120  }
  0x8e   :  { %147 = vst [vmem:[#allocation3 + $0x20] sm:$0xff] %v4981_v1  ;;  %148 = vst [vmem:[#allocation3 + $0x28] sm:$0xff] %v4981_v1  ;;  %v230_v7 = vld [vmem:[#allocation10 + $0x10] sm:$0xff]  ;;  %v231_v8 = vld [vmem:[#allocation10 + $0x18] sm:$0xff]  ;;  %v5202_v9 = vpack.c.bf16 %v370_v6, %v369_v4  ;;  %v216_v57 = vand.u32 127, %v215_v56  ;;  %s4983_s29 = smov 64  }
  0x8f   :  { %149 = vst [vmem:[#allocation3 + $0x30] sm:$0xff] %v4981_v1  ;;  %150 = vst [vmem:[#allocation3 + $0x38] sm:$0xff] %v4981_v1  ;;  %v4149_v10 = vpack.c.bf16 %v231_v8, %v230_v7  ;;  %v371_v11 = vld [vmem:[#allocation12 + $0x10] sm:$0xff]  ;;  %v372_v12 = vld [vmem:[#allocation12 + $0x18] sm:$0xff]  ;;  %4146 = vmatprep.subr.bf16.mxu0 %v4145_v5  ;;  %s4984_s16 = smov 32   ;;  %s3019_s5 = sld [smem:[#allocation7 + $0x2]] }
  0x90   :  { %364 = vst [vmem:[#allocation4] sm:$0xff] %v4981_v1  ;;  %v232_v13 = vld [vmem:[#allocation10 + $0x20] sm:$0xff]  ;;  %v233_v14 = vld [vmem:[#allocation10 + $0x28] sm:$0xff]  ;;  %4148 = vmatpush3.bf16.msra.mxu0 %v4145_v5  ;;  %4179 = vmatpush3.bf16.msra.mxu1 %v5202_v9  ;;  %v5205_v15 = vpack.c.bf16 %v372_v12, %v371_v11  ;;  %v234_v19 = vld [vmem:[#allocation10 + $0x30] sm:$0xff]  ;;  %vm217_vm2 = vcmp.ge.s32.totalorder %v216_v57, 64  ;;  %vm218_vm3 = vcmp.lt.s32.totalorder %v216_v57, 96 }
  0x91   :  { %4150 = vmatprep.subr.bf16.mxu0 %v4149_v10  ;;  %4180 = vmatprep.subr.bf16.mxu1 %v4980_v0  ;;  %v4153_v16 = vpack.c.bf16 %v233_v14, %v232_v13  ;;  %v373_v17 = vld [vmem:[#allocation12 + $0x20] sm:$0xff]  ;;  %v374_v18 = vld [vmem:[#allocation12 + $0x28] sm:$0xff]  ;;  %v235_v20 = vld [vmem:[#allocation10 + $0x38] sm:$0xff]  ;;  %s152_s27 = scalar_lea.vmem [#allocation8], %s5194_s11  ;;  %366 = vst.msk [vmem:[#allocation5] sm:$0xff] %vm365_vm1, %v4981_v1  ;;  %s3020_s15 = sld [smem:[#allocation7 + $0xa]] }
  0x92   :  { %v5209_v21 = vpack.c.bf16 %v374_v18, %v373_v17  ;;  %v4157_v22 = vpack.c.bf16 %v235_v20, %v234_v19  ;;  %v375_v23 = vld [vmem:[#allocation12 + $0x30] sm:$0xff]  ;;  %v376_v24 = vld [vmem:[#allocation12 + $0x38] sm:$0xff]  ;;  %v236_v25 = vld [vmem:[#allocation10 + $0x40] sm:$0xff]  ;;  %s156_s9 = scalar_lea.vmem [#allocation8], %s5196_s24  ;;  %s160_s21 = scalar_lea.vmem [#allocation8], %s5198_s25 }
  0x93   :  { %v237_v26 = vld [vmem:[#allocation10 + $0x48] sm:$0xff]  ;;  %v153_v27 = vld [vmem:[%s152_s27] sm:$0x1]  ;;  %s164_s28 = scalar_lea.vmem [#allocation8], %s5200_s26  ;;  %v5217_v31 = vpack.c.bf16 %v376_v24, %v375_v23  ;;  %v377_v33 = vld [vmem:[#allocation12 + $0x40] sm:$0xff]  ;;  %s3021_s17 = sld [smem:[#allocation7 + $0x3]] }
  0x94   :  { %4152 = vmatpush3.bf16.msra.mxu0 %v4149_v10  ;;  %4182 = vmatpush3.bf16.msra.mxu1 %v5205_v15  ;;  %v157_v28 = vld [vmem:[%s156_s9] sm:$0x1]  ;;  %154 = vst [vmem:[#allocation3] sm:$0x1] %v153_v27  ;;  %v4161_v32 = vpack.c.bf16 %v237_v26, %v236_v25  ;;  %v378_v34 = vld [vmem:[#allocation12 + $0x48] sm:$0xff]  ;;  %v238_v35 = vld [vmem:[#allocation10 + $0x50] sm:$0xff] }
  0x95   :  { %4154 = vmatprep.subr.bf16.mxu0 %v4153_v16  ;;  %4183 = vmatprep.subr.bf16.mxu1 %v4980_v0  ;;  %158 = vst [vmem:[#allocation3 + $0x1] sm:$0x1] %v157_v28  ;;  %v161_v29 = vld [vmem:[%s160_s21] sm:$0x1]  ;;  %v5221_v37 = vpack.c.bf16 %v378_v34, %v377_v33  ;;  %v379_v39 = vld [vmem:[#allocation12 + $0x50] sm:$0xff]  ;;  %v240_v41 = vld [vmem:[#allocation10 + $0x60] sm:$0xff] }
  0x96   :  { %v165_v30 = vld [vmem:[%s164_s28] sm:$0x1]  ;;  %162 = vst [vmem:[#allocation3 + $0x8] sm:$0x1] %v161_v29  ;;  %v241_v42 = vld [vmem:[#allocation10 + $0x68] sm:$0xff]  ;;  %v381_v46 = vld [vmem:[#allocation12 + $0x60] sm:$0xff] }
  0x97   :  { %166 = vst [vmem:[#allocation3 + $0x9] sm:$0x1] %v165_v30  ;;  %v239_v36 = vld [vmem:[#allocation10 + $0x58] sm:$0xff]  ;;  %v4169_v45 = vpack.c.bf16 %v241_v42, %v240_v41  ;;  %v382_v47 = vld [vmem:[#allocation12 + $0x68] sm:$0xff]  ;;  %v242_v48 = vld [vmem:[#allocation10 + $0x70] sm:$0xff]  ;;  %s3022_s18 = sld [smem:[#allocation7 + $0xb]] }
  0x98   :  { %4156 = vmatpush3.bf16.msra.mxu0 %v4153_v16  ;;  %4185 = vmatpush3.bf16.msra.mxu1 %v5209_v21  ;;  %v4165_v38 = vpack.c.bf16 %v239_v36, %v238_v35  ;;  %v380_v40 = vld [vmem:[#allocation12 + $0x58] sm:$0xff]  ;;  %v5229_v50 = vpack.c.bf16 %v382_v47, %v381_v46  ;;  %v383_v52 = vld [vmem:[#allocation12 + $0x70] sm:$0xff]  ;;  %vm5285_vm4 = vmand %vm217_vm2, %vm218_vm3  ;;  %s3023_s19 = sld [smem:[#allocation7 + $0x4]]  ;;  %s3025_s1 = sld [smem:[#allocation7 + $0x5]] }
  0x99   :  { %4158 = vmatprep.subr.bf16.mxu0 %v4157_v22  ;;  %4186 = vmatprep.subr.bf16.mxu1 %v4980_v0  ;;  %v5225_v44 = vpack.c.bf16 %v380_v40, %v379_v39  ;;  %v243_v49 = vld [vmem:[#allocation10 + $0x78] sm:$0xff]  ;;  %v462_v11 = vld [vmem:[#allocation5] sm:$0xff]  ;;  %s3024_s2 = sld [smem:[#allocation7 + $0xc]]  ;;  %s3026_s23 = sld [smem:[#allocation7 + $0xd]] }
  0x9a   :  { %v4173_v51 = vpack.c.bf16 %v243_v49, %v242_v48  ;;  %v384_v53 = vld [vmem:[#allocation12 + $0x78] sm:$0xff]  ;;  %s4985_s14 = smov 96   ;;  %s168_s20 = scalar_lea.vmem [#allocation8], %s3019_s5 }
  0x9b   :  { %v5233_v54 = vpack.c.bf16 %v384_v53, %v383_v52  ;;  %v5280_v58 = vld [vmem:[%s5844_s4] ss:$0 sm:$0xff]  ;;  %s172_s22 = scalar_lea.vmem [#allocation8], %s3020_s15  ;;  %s176_s7 = scalar_lea.vmem [#allocation8], %s3021_s17 }
  0x9c   :  { %4160 = vmatpush3.bf16.msra.mxu0 %v4157_v22  ;;  %4188 = vmatpush3.bf16.msra.mxu1 %v5217_v31  ;;  %v220_v43 = vld [vmem:[#allocation3] sm:$0xff]  ;;  %s3027_s27 = sld [smem:[#allocation7 + $0x6]]  ;;  %s3029_s21 = sld [smem:[#allocation7 + $0x7]] }
  0x9d   :  { %4162 = vmatprep.subr.bf16.mxu0 %v4161_v32  ;;  %4189 = vmatprep.subr.bf16.mxu1 %v4980_v0  ;;  %v169_v20 = vld [vmem:[%s168_s20] sm:$0x1]  ;;  %s180_s0 = scalar_lea.vmem [#allocation8], %s3022_s18  ;;  %s3028_s9 = sld [smem:[#allocation7 + $0xe]] }
  0x9e   :  { %3459 = vmatprep.mubr.f32.mxu0 %v220_v43  ;;  %v221_v55 = vld [vmem:[#allocation3 + $0x8] sm:$0xff]  ;;  %v173_v22 = vld [vmem:[%s172_s22] sm:$0x1]  ;;  %170 = vst [vmem:[#allocation3 + $0x10] sm:$0x1] %v169_v20  ;;  %s184_s11 = scalar_lea.vmem [#allocation8], %s3023_s19 }
  0x9f   :  { %174 = vst [vmem:[#allocation3 + $0x11] sm:$0x1] %v173_v22  ;;  %v177_v23 = vld [vmem:[%s176_s7] sm:$0x1]  ;;  %s188_s24 = scalar_lea.vmem [#allocation8], %s3024_s2  ;;  %s192_s25 = scalar_lea.vmem [#allocation8], %s3025_s1 }
  0xa0   :  { %4164 = vmatpush3.bf16.msra.mxu0 %v4161_v32  ;;  %4191 = vmatpush3.bf16.msra.mxu1 %v5221_v37  ;;  %v181_v24 = vld [vmem:[%s180_s0] sm:$0x1]  ;;  %178 = vst [vmem:[#allocation3 + $0x18] sm:$0x1] %v177_v23  ;;  %s196_s26 = scalar_lea.vmem [#allocation8], %s3026_s23  ;;  %s3030_s28 = sld [smem:[#allocation7 + $0xf]] }
  0xa1   :  { %4166 = vmatprep.subr.bf16.mxu0 %v4165_v38  ;;  %4192 = vmatprep.subr.bf16.mxu1 %v4980_v0  ;;  %182 = vst [vmem:[#allocation3 + $0x19] sm:$0x1] %v181_v24  ;;  %v185_v25 = vld [vmem:[%s184_s11] sm:$0x1] }
  0xa2   :  { %v189_v26 = vld [vmem:[%s188_s24] sm:$0x1]  ;;  %186 = vst [vmem:[#allocation3 + $0x20] sm:$0x1] %v185_v25  ;;  %s200_s30 = scalar_lea.vmem [#allocation8], %s3027_s27  ;;  %s208_s5 = scalar_lea.vmem [#allocation8], %s3029_s21 }
  0xa3   :  { %190 = vst [vmem:[#allocation3 + $0x21] sm:$0x1] %v189_v26  ;;  %v193_v27 = vld [vmem:[%s192_s25] sm:$0x1]  ;;  %s204_s3 = scalar_lea.vmem [#allocation8], %s3028_s9 }
  0xa4   :  { %4168 = vmatpush3.bf16.msra.mxu0 %v4165_v38  ;;  %4194 = vmatpush3.bf16.msra.mxu1 %v5225_v44  ;;  %v197_v28 = vld [vmem:[%s196_s26] sm:$0x1]  ;;  %194 = vst [vmem:[#allocation3 + $0x28] sm:$0x1] %v193_v27 }
  0xa5   :  { %4170 = vmatprep.subr.bf16.mxu0 %v4169_v45  ;;  %4195 = vmatprep.subr.bf16.mxu1 %v4980_v0  ;;  %198 = vst [vmem:[#allocation3 + $0x29] sm:$0x1] %v197_v28  ;;  %v201_v34 = vld [vmem:[%s200_s30] sm:$0x1] }
  0xa6   :  { %v222_v29 = vld [vmem:[#allocation3 + $0x10] sm:$0xff]  ;;  %v205_v35 = vld [vmem:[%s204_s3] sm:$0x1]  ;;  %202 = vst [vmem:[#allocation3 + $0x30] sm:$0x1] %v201_v34  ;;  %s212_s15 = scalar_lea.vmem [#allocation8], %s3030_s28 }
  0xa7   :  { %206 = vst [vmem:[#allocation3 + $0x31] sm:$0x1] %v205_v35  ;;  %v209_v36 = vld [vmem:[%s208_s5] sm:$0x1] }
  0xa8   :  { %4172 = vmatpush3.bf16.msra.mxu0 %v4169_v45  ;;  %4197 = vmatpush3.bf16.msra.mxu1 %v5229_v50  ;;  %v223_v30 = vld [vmem:[#allocation3 + $0x18] sm:$0xff]  ;;  %v213_v38 = vld [vmem:[%s212_s15] sm:$0x1]  ;;  %210 = vst [vmem:[#allocation3 + $0x38] sm:$0x1] %v209_v36 }
  0xa9   :  { %4174 = vmatprep.subr.bf16.mxu0 %v4173_v51  ;;  %4198 = vmatprep.subr.bf16.mxu1 %v4980_v0  ;;  %214 = vst [vmem:[#allocation3 + $0x39] sm:$0x1] %v213_v38 }
  0xaa   :  { %v224_v32 = vld [vmem:[#allocation3 + $0x20] sm:$0xff] }
  0xac   :  { %4176 = vmatpush3.bf16.msra.mxu0 %v4173_v51  ;;  %4200 = vmatpush3.bf16.msra.mxu1 %v5233_v54  ;;  %v225_v33 = vld [vmem:[#allocation3 + $0x28] sm:$0xff] }
  0xad   :  { %4201 = vmatprep.subr.bf16.mxu0 %v4980_v0  ;;  %4225 = vmatprep.subr.bf16.mxu1 %v4980_v0 }
  0xae   :  { %v226_v39 = vld [vmem:[#allocation3 + $0x30] sm:$0xff] }
  0xaf   :  { %3460 = vmatmul.mubr.f32.vlgmr.msra.gmra.mrb[0].mxu0 %v221_v55  ;;  %3504 = vmatmul.mubr.f32.vlgmr.msra.gmra.mrb[0].mxu1 %v4981_v1 }
  0xb0   :  { %4203 = vmatpush3.bf16.msra.mxu0 %v5202_v9  ;;  %4227 = vmatpush3.bf16.msra.mxu1 %v5202_v9  ;;  %v227_v40 = vld [vmem:[#allocation3 + $0x38] sm:$0xff] }
  0xb1   :  { %4204 = vmatprep.subr.bf16.mxu0 %v4980_v0  ;;  %4228 = vmatprep.subr.bf16.mxu1 %v4980_v0 }
  0xb2   :  { %3573 = vmatprep.mubr.msk.f32.mxu1 %vm4982_vm0, %v4981_v1  ;;  %3462 = vmatprep.mubr.f32.mxu0 %v222_v29 }
  0xb3   :  { %3463 = vmatmul.mubr.f32.gmra.mrb[2].mxu0 %v223_v30 }
  0xb4   :  { %4206 = vmatpush3.bf16.msra.mxu0 %v5205_v15  ;;  %4230 = vmatpush3.bf16.msra.mxu1 %v5205_v15 }
  0xb5   :  { %4207 = vmatprep.subr.bf16.mxu0 %v4980_v0  ;;  %4231 = vmatprep.subr.bf16.mxu1 %v4980_v0 }
  0xb6   :  { %3465 = vmatprep.mubr.f32.mxu0 %v224_v32 }
  0xb7   :  { %3466 = vmatmul.mubr.f32.gmra.mrb[4].mxu0 %v225_v33 }
  0xb8   :  { %4209 = vmatpush3.bf16.msra.mxu0 %v5209_v21  ;;  %4233 = vmatpush3.bf16.msra.mxu1 %v5209_v21 }
  0xb9   :  { %4210 = vmatprep.subr.bf16.mxu0 %v4980_v0  ;;  %4234 = vmatprep.subr.bf16.mxu1 %v4980_v0 }
  0xba   :  { %3468 = vmatprep.mubr.f32.mxu0 %v226_v39 }
  0xbb   :  { %3469 = vmatmul.mubr.f32.gmra.mrb[6].mxu0 %v227_v40 }
  0xbc   :  { %4212 = vmatpush3.bf16.msra.mxu0 %v5217_v31  ;;  %4236 = vmatpush3.bf16.msra.mxu1 %v5217_v31 }
  0xbd   :  { %4213 = vmatprep.subr.bf16.mxu0 %v4980_v0  ;;  %4237 = vmatprep.subr.bf16.mxu1 %v4980_v0 }
  0xbe   :  { %3538 = vmatprep.mubr.msk.f32.mxu0 %vm4982_vm0, %v4981_v1 }
  0xc0   :  { %4215 = vmatpush3.bf16.msra.mxu0 %v5221_v37  ;;  %4239 = vmatpush3.bf16.msra.mxu1 %v5221_v37 }
  0xc1   :  { %4216 = vmatprep.subr.bf16.mxu0 %v4980_v0  ;;  %4240 = vmatprep.subr.bf16.mxu1 %v4980_v0 }
  0xc4   :  { %4218 = vmatpush3.bf16.msra.mxu0 %v5225_v44  ;;  %4242 = vmatpush3.bf16.msra.mxu1 %v5225_v44 }
  0xc5   :  { %4219 = vmatprep.subr.bf16.mxu0 %v4980_v0  ;;  %4243 = vmatprep.subr.bf16.mxu1 %v4980_v0 }
  0xc8   :  { %4221 = vmatpush3.bf16.msra.mxu0 %v5229_v50  ;;  %4245 = vmatpush3.bf16.msra.mxu1 %v5229_v50 }
  0xc9   :  { %4222 = vmatprep.subr.bf16.mxu0 %v4980_v0  ;;  %4246 = vmatprep.subr.bf16.mxu1 %v4980_v0 }
  0xcc   :  { %4224 = vmatpush3.bf16.msra.mxu0 %v5233_v54  ;;  %4248 = vmatpush3.bf16.msra.mxu1 %v5233_v54 }
  0xcd   :  { %4249 = vmatprep.subr.bf16.mxu0 %v4980_v0  ;;  %4273 = vmatprep.subr.bf16.mxu1 %v4980_v0 }
 0x182   :  { %v5282_v59 = vpop.f32.mrb[0].mxu0  ;;  %v451_v60 = vpop.f32.mrb[0].mxu1 }
 0x183   :  { %v317_v61 = vpop.f32.mrb[1].mxu0  ;;  %v3505_v62 = vpop.f32.mrb[1].mxu1  ;;  %v323_v57 = vadd.f32 %v5282_v59, %v5280_v58 }
 0x184   :  { %v318_v63 = vadd.f32 %v5280_v58, %v317_v61 }
 0x186   :  { %v455_v2 = vadd.f32 %v451_v60, %v318_v63  ;;  %v5309_v46 = vpop.f32.mrb[2].mxu0 }
 0x187   :  { %v5311_v47 = vpop.f32.mrb[3].mxu0 }
 0x188   :  { %v456_v4 = vmul.f32 0.5, %v455_v2 }
 0x18a   :  { %v457_v5 = vsel %vm5285_vm4, %v455_v2, %v456_v4  ;;  %v5313_v49 = vpop.f32.mrb[4].mxu0 }
 0x18b   :  { %4723 = vtanh.f32 %v457_v5  ;;  %v5317_v51 = vpop.f32.mrb[5].mxu0 }
 0x18e   :  { %v5337_v53 = vpop.f32.mrb[6].mxu0 }
 0x18f   :  { %v5339_v55 = vpop.f32.mrb[7].mxu0 }
 0x195   :  { %v4724_v6 = vpop.eup %4723 }
 0x196   :  { %v459_v7 = vmul.f32 0.5, %v4724_v6 }
 0x198   :  { %v460_v8 = vadd.f32 0.5, %v459_v7 }
 0x19a   :  { %v5293_v10 = vsel %vm5285_vm4, %v4724_v6, %v460_v8 }
 0x19b   :  { %469 = vrot.lane.b32.xlu0 %v5293_v10, %s4983_s29 }
 0x19f   :  { %464 = vrot.lane.b32.xlu0 %v462_v11, %s4984_s16 }
 0x20d   :  { %v470_v12 = vpop.permute.xlu0 %469 }
 0x20e   :  { %v472_v13 = vmul.f32 %v470_v12, %v5293_v10 }
 0x210   :  { %474 = vrot.lane.b32.xlu1 %v472_v13, %s4984_s16 }
 0x211   :  { %v465_v14 = vpop.permute.xlu0 %464 }
 0x212   :  { %v467_v16 = vmul.f32 %v465_v14, %v5293_v10 }
 0x282   :  { %v475_v17 = vpop.permute.xlu1 %474 }
 0x283   :  { %v477_v18 = vadd.f32 %v475_v17, %v467_v16 }
 0x285   :  { %4725 = vtanh.f32 %v477_v18 }
 0x28f   :  { %v4726_v19 = vpop.eup %4725 }
 0x290   :  { %480 = vrot.lane.b32.xlu1 %v4726_v19, %s4983_s29 }
 0x294   :  { %485 = vrot.lane.b32.xlu1 %v477_v18, %s4985_s14 }
 0x302   :  { %v481_v41 = vpop.permute.xlu1 %480 }
 0x303   :  { %v483_v42 = vmul.f32 %v481_v41, %v5293_v10 }
 0x305   :  { %490 = vrot.lane.b32.xlu0 %v483_v42, %s4984_s16 }
 0x306   :  { %v486_v43 = vpop.permute.xlu1 %485 }
 0x307   :  { %488 = vst.msk [vmem:[#allocation5] sm:$0xff] %vm365_vm1, %v486_v43 }
 0x30e   :  { %v591_v45 = vld [vmem:[#allocation5] sm:$0xff] }
 0x30f   :  { %593 = vrot.lane.b32.xlu1 %v591_v45, %s4984_s16 }
 0x377   :  { %v491_v48 = vpop.permute.xlu0 %490 }
 0x378   :  { %493 = vst.msk [vmem:[#allocation4] sm:$0xff] %vm365_vm1, %v491_v48  ;;  %494 = vst.msk [vmem:[#allocation3] sm:$0xff] %vm365_vm1, %v491_v48 }
 0x37f   :  { %v497_v52 = vld [vmem:[#allocation4] sm:$0xff] }
 0x380   :  { %3539 = vmatmul.mubr.f32.vlgmr.msra.gmra.mrb[8].mxu0 %v497_v52  ;;  %v333_v52 = vadd.f32 %v5309_v46, %v5280_v58 }
 0x381   :  { %4251 = vmatpush3.bf16.msra.mxu0 %v5202_v9  ;;  %3608 = vmatprep.mubr.msk.f32.mxu0 %vm4982_vm0, %v4981_v1  ;;  %v594_v59 = vpop.permute.xlu1 %593 }
 0x382   :  { %4252 = vmatprep.subr.bf16.mxu0 %v4980_v0 }
 0x385   :  { %4254 = vmatpush3.bf16.msra.mxu0 %v5205_v15 }
 0x386   :  { %4255 = vmatprep.subr.bf16.mxu0 %v4980_v0 }
 0x389   :  { %4257 = vmatpush3.bf16.msra.mxu0 %v5209_v21 }
 0x38a   :  { %4258 = vmatprep.subr.bf16.mxu0 %v4980_v0 }
 0x38d   :  { %4260 = vmatpush3.bf16.msra.mxu0 %v5217_v31 }
 0x38e   :  { %4261 = vmatprep.subr.bf16.mxu0 %v4980_v0 }
 0x391   :  { %4263 = vmatpush3.bf16.msra.mxu0 %v5221_v37 }
 0x392   :  { %4264 = vmatprep.subr.bf16.mxu0 %v4980_v0 }
 0x395   :  { %4266 = vmatpush3.bf16.msra.mxu0 %v5225_v44 }
 0x396   :  { %4267 = vmatprep.subr.bf16.mxu0 %v4980_v0 }
 0x399   :  { %4269 = vmatpush3.bf16.msra.mxu0 %v5229_v50 }
 0x39a   :  { %4270 = vmatprep.subr.bf16.mxu0 %v4980_v0 }
 0x39d   :  { %4272 = vmatpush3.bf16.msra.mxu0 %v5233_v54 }
 0x39e   :  { %4297 = vmatprep.subr.bf16.mxu0 %v4980_v0 }
 0x453   :  { %v580_v60 = vpop.f32.mrb[8].mxu0 }
 0x454   :  { %v584_v61 = vadd.f32 %v580_v60, %v323_v57  ;;  %v3540_v62 = vpop.f32.mrb[9].mxu0 }
 0x456   :  { %v585_v63 = vmul.f32 0.5, %v584_v61 }
 0x458   :  { %v586_v2 = vsel %vm5285_vm4, %v584_v61, %v585_v63 }
 0x459   :  { %4727 = vtanh.f32 %v586_v2 }
 0x463   :  { %v4728_v4 = vpop.eup %4727 }
 0x464   :  { %v588_v5 = vmul.f32 0.5, %v4728_v4 }
 0x466   :  { %v589_v6 = vadd.f32 0.5, %v588_v5 }
 0x468   :  { %v590_v7 = vsel %vm5285_vm4, %v4728_v4, %v589_v6 }
 0x469   :  { %598 = vrot.lane.b32.xlu0 %v590_v7, %s4983_s29  ;;  %v596_v11 = vmul.f32 %v594_v59, %v590_v7 }
 0x4db   :  { %v599_v8 = vpop.permute.xlu0 %598 }
 0x4dc   :  { %v601_v10 = vmul.f32 %v599_v8, %v590_v7 }
 0x4de   :  { %603 = vrot.lane.b32.xlu0 %v601_v10, %s4984_s16 }
 0x550   :  { %v604_v12 = vpop.permute.xlu0 %603 }
 0x551   :  { %v606_v13 = vadd.f32 %v604_v12, %v596_v11 }
 0x553   :  { %4729 = vtanh.f32 %v606_v13 }
 0x55d   :  { %v4730_v14 = vpop.eup %4729 }
 0x55e   :  { %609 = vrot.lane.b32.xlu1 %v4730_v14, %s4983_s29 }
 0x562   :  { %614 = vrot.lane.b32.xlu1 %v606_v13, %s4985_s14 }
 0x5d0   :  { %v610_v16 = vpop.permute.xlu1 %609 }
 0x5d1   :  { %v612_v17 = vmul.f32 %v610_v16, %v590_v7 }
 0x5d3   :  { %619 = vrot.lane.b32.xlu0 %v612_v17, %s4984_s16 }
 0x5d4   :  { %v615_v18 = vpop.permute.xlu1 %614 }
 0x5d5   :  { %617 = vst.msk [vmem:[#allocation5] sm:$0xff] %vm365_vm1, %v615_v18 }
 0x5dc   :  { %v721_v19 = vld [vmem:[#allocation5] sm:$0xff] }
 0x5dd   :  { %723 = vrot.lane.b32.xlu1 %v721_v19, %s4984_s16 }
 0x645   :  { %v620_v20 = vpop.permute.xlu0 %619 }
 0x646   :  { %622 = vst.msk [vmem:[#allocation4] sm:$0xff] %vm365_vm1, %v620_v20  ;;  %624 = vst.msk [vmem:[#allocation3 + $0x8] sm:$0xff] %vm365_vm1, %v620_v20  ;;  %v338_v20 = vadd.f32 %v5280_v58, %v5317_v51 }
 0x64d   :  { %v627_v22 = vld [vmem:[#allocation4] sm:$0xff] }
 0x64e   :  { %3574 = vmatmul.mubr.f32.vlgmr.msra.gmra.mrb[2].mxu1 %v627_v22 }
 0x64f   :  { %4275 = vmatpush3.bf16.msra.mxu1 %v5202_v9  ;;  %3643 = vmatprep.mubr.msk.f32.mxu1 %vm4982_vm0, %v4981_v1  ;;  %v328_v9 = vadd.f32 %v5280_v58, %v5311_v47  ;;  %v724_v35 = vpop.permute.xlu1 %723 }
 0x650   :  { %4276 = vmatprep.subr.bf16.mxu1 %v4980_v0 }
 0x653   :  { %4278 = vmatpush3.bf16.msra.mxu1 %v5205_v15 }
 0x654   :  { %4279 = vmatprep.subr.bf16.mxu1 %v4980_v0 }
 0x657   :  { %4281 = vmatpush3.bf16.msra.mxu1 %v5209_v21 }
 0x658   :  { %4282 = vmatprep.subr.bf16.mxu1 %v4980_v0 }
 0x65b   :  { %4284 = vmatpush3.bf16.msra.mxu1 %v5217_v31 }
 0x65c   :  { %4285 = vmatprep.subr.bf16.mxu1 %v4980_v0 }
 0x65f   :  { %4287 = vmatpush3.bf16.msra.mxu1 %v5221_v37 }
 0x660   :  { %4288 = vmatprep.subr.bf16.mxu1 %v4980_v0 }
 0x663   :  { %4290 = vmatpush3.bf16.msra.mxu1 %v5225_v44 }
 0x664   :  { %4291 = vmatprep.subr.bf16.mxu1 %v4980_v0 }
 0x667   :  { %4293 = vmatpush3.bf16.msra.mxu1 %v5229_v50 }
 0x668   :  { %4294 = vmatprep.subr.bf16.mxu1 %v4980_v0 }
 0x66b   :  { %4296 = vmatpush3.bf16.msra.mxu1 %v5233_v54 }
 0x66c   :  { %4321 = vmatprep.subr.bf16.mxu1 %v4980_v0 }
 0x721   :  { %v710_v23 = vpop.f32.mrb[2].mxu1 }
 0x722   :  { %v714_v24 = vadd.f32 %v710_v23, %v328_v9  ;;  %v3575_v25 = vpop.f32.mrb[3].mxu1 }
 0x724   :  { %v715_v26 = vmul.f32 0.5, %v714_v24 }
 0x726   :  { %v716_v27 = vsel %vm5285_vm4, %v714_v24, %v715_v26 }
 0x727   :  { %4731 = vtanh.f32 %v716_v27 }
 0x731   :  { %v4732_v28 = vpop.eup %4731 }
 0x732   :  { %v718_v29 = vmul.f32 0.5, %v4732_v28 }
 0x734   :  { %v719_v30 = vadd.f32 0.5, %v718_v29 }
 0x736   :  { %v720_v32 = vsel %vm5285_vm4, %v4732_v28, %v719_v30 }
 0x737   :  { %728 = vrot.lane.b32.xlu0 %v720_v32, %s4983_s29  ;;  %v726_v36 = vmul.f32 %v724_v35, %v720_v32 }
 0x7a9   :  { %v729_v33 = vpop.permute.xlu0 %728 }
 0x7aa   :  { %v731_v34 = vmul.f32 %v729_v33, %v720_v32 }
 0x7ac   :  { %733 = vrot.lane.b32.xlu0 %v731_v34, %s4984_s16 }
 0x81e   :  { %v734_v38 = vpop.permute.xlu0 %733 }
 0x81f   :  { %v736_v39 = vadd.f32 %v734_v38, %v726_v36  ;;  %v1018_v38 = vld [vmem:[#allocation12] sm:$0xff] }
 0x821   :  { %4733 = vtanh.f32 %v736_v39 }
 0x82b   :  { %v4734_v40 = vpop.eup %4733 }
 0x82c   :  { %739 = vrot.lane.b32.xlu1 %v4734_v40, %s4983_s29 }
 0x830   :  { %744 = vrot.lane.b32.xlu1 %v736_v39, %s4985_s14  ;;  %v1019_v39 = vld [vmem:[#allocation12 + $0x8] sm:$0xff] }
 0x831   :  { %v4298_v40 = vpack.c.bf16 %v1019_v39, %v1018_v38 }
 0x89e   :  { %v740_v41 = vpop.permute.xlu1 %739 }
 0x89f   :  { %v742_v42 = vmul.f32 %v740_v41, %v720_v32 }
 0x8a1   :  { %749 = vrot.lane.b32.xlu0 %v742_v42, %s4984_s16 }
 0x8a2   :  { %v745_v43 = vpop.permute.xlu1 %744 }
 0x8a3   :  { %747 = vst.msk [vmem:[#allocation5] sm:$0xff] %vm365_vm1, %v745_v43 }
 0x8aa   :  { %v851_v45 = vld [vmem:[#allocation5] sm:$0xff] }
 0x8ab   :  { %853 = vrot.lane.b32.xlu1 %v851_v45, %s4984_s16 }
 0x913   :  { %v750_v47 = vpop.permute.xlu0 %749 }
 0x914   :  { %752 = vst.msk [vmem:[#allocation4] sm:$0xff] %vm365_vm1, %v750_v47  ;;  %754 = vst.msk [vmem:[#allocation3 + $0x10] sm:$0xff] %vm365_vm1, %v750_v47 }
 0x91b   :  { %v757_v48 = vld [vmem:[#allocation4] sm:$0xff] }
 0x91c   :  { %3609 = vmatmul.mubr.f32.vlgmr.msra.gmra.mrb[10].mxu0 %v757_v48 }
 0x91d   :  { %3678 = vmatprep.mubr.msk.f32.mxu0 %vm4982_vm0, %v4981_v1  ;;  %v854_v46 = vpop.permute.xlu1 %853  ;;  %4299 = vmatpush3.bf16.msra.mxu0 %v4298_v40 }
 0x91e   :  { %4300 = vmatprep.subr.bf16.mxu0 %v4980_v0 }
 0x921   :  { %4302 = vmatpush3.bf16.msra.mxu0 %v5205_v15 }
 0x922   :  { %4303 = vmatprep.subr.bf16.mxu0 %v4980_v0 }
 0x925   :  { %4305 = vmatpush3.bf16.msra.mxu0 %v5209_v21 }
 0x926   :  { %4306 = vmatprep.subr.bf16.mxu0 %v4980_v0 }
 0x929   :  { %4308 = vmatpush3.bf16.msra.mxu0 %v5217_v31 }
 0x92a   :  { %4309 = vmatprep.subr.bf16.mxu0 %v4980_v0 }
 0x92d   :  { %4311 = vmatpush3.bf16.msra.mxu0 %v5221_v37 }
 0x92e   :  { %4312 = vmatprep.subr.bf16.mxu0 %v4980_v0 }
 0x931   :  { %4314 = vmatpush3.bf16.msra.mxu0 %v5225_v44 }
 0x932   :  { %4315 = vmatprep.subr.bf16.mxu0 %v4980_v0 }
 0x935   :  { %4317 = vmatpush3.bf16.msra.mxu0 %v5229_v50 }
 0x936   :  { %4318 = vmatprep.subr.bf16.mxu0 %v4980_v0 }
 0x939   :  { %4320 = vmatpush3.bf16.msra.mxu0 %v5233_v54  ;;  %v343_v54 = vadd.f32 %v5313_v49, %v5280_v58 }
 0x93a   :  { %4345 = vmatprep.subr.bf16.mxu0 %v4980_v0 }
 0x9ef   :  { %v840_v57 = vpop.f32.mrb[10].mxu0 }
 0x9f0   :  { %v844_v60 = vadd.f32 %v840_v57, %v333_v52  ;;  %v3610_v61 = vpop.f32.mrb[11].mxu0 }
 0x9f2   :  { %v845_v62 = vmul.f32 0.5, %v844_v60 }
 0x9f4   :  { %v846_v63 = vsel %vm5285_vm4, %v844_v60, %v845_v62 }
 0x9f5   :  { %4735 = vtanh.f32 %v846_v63 }
 0x9ff   :  { %v4736_v2 = vpop.eup %4735 }
 0xa00   :  { %v848_v4 = vmul.f32 0.5, %v4736_v2 }
 0xa02   :  { %v849_v5 = vadd.f32 0.5, %v848_v4 }
 0xa04   :  { %v850_v6 = vsel %vm5285_vm4, %v4736_v2, %v849_v5 }
 0xa05   :  { %858 = vrot.lane.b32.xlu0 %v850_v6, %s4983_s29  ;;  %v856_v10 = vmul.f32 %v854_v46, %v850_v6 }
 0xa77   :  { %v859_v7 = vpop.permute.xlu0 %858 }
 0xa78   :  { %v861_v8 = vmul.f32 %v859_v7, %v850_v6  ;;  %v1151_v7 = vld [vmem:[#allocation12 + $0x18] sm:$0xff] }
 0xa7a   :  { %863 = vrot.lane.b32.xlu0 %v861_v8, %s4984_s16  ;;  %v1152_v8 = vld [vmem:[#allocation12 + $0x20] sm:$0xff] }
 0xaec   :  { %v864_v59 = vpop.permute.xlu0 %863 }
 0xaed   :  { %v866_v11 = vadd.f32 %v864_v59, %v856_v10  ;;  %v1153_v10 = vld [vmem:[#allocation12 + $0x28] sm:$0xff] }
 0xaee   :  { %v4328_v59 = vpack.c.bf16 %v1153_v10, %v1152_v8 }
 0xaef   :  { %4737 = vtanh.f32 %v866_v11 }
 0xaf9   :  { %v4738_v12 = vpop.eup %4737 }
 0xafa   :  { %869 = vrot.lane.b32.xlu1 %v4738_v12, %s4983_s29  ;;  %v1155_v12 = vld [vmem:[#allocation12 + $0x38] sm:$0xff] }
 0xafe   :  { %874 = vrot.lane.b32.xlu1 %v866_v11, %s4985_s14  ;;  %v1154_v11 = vld [vmem:[#allocation12 + $0x30] sm:$0xff] }
 0xb6c   :  { %v870_v13 = vpop.permute.xlu1 %869 }
 0xb6d   :  { %v872_v14 = vmul.f32 %v870_v13, %v850_v6  ;;  %v1150_v6 = vld [vmem:[#allocation12 + $0x10] sm:$0xff]  ;;  %v4331_v13 = vpack.c.bf16 %v1155_v12, %v1154_v11 }
 0xb6e   :  { %v4325_v46 = vpack.c.bf16 %v1151_v7, %v1150_v6  ;;  %v348_v6 = vadd.f32 %v5280_v58, %v5339_v55 }
 0xb6f   :  { %879 = vrot.lane.b32.xlu0 %v872_v14, %s4984_s16  ;;  %v1156_v14 = vld [vmem:[#allocation12 + $0x40] sm:$0xff] }
 0xb70   :  { %v875_v16 = vpop.permute.xlu1 %874 }
 0xb71   :  { %877 = vst.msk [vmem:[#allocation5] sm:$0xff] %vm365_vm1, %v875_v16  ;;  %v1157_v16 = vld [vmem:[#allocation12 + $0x48] sm:$0xff] }
 0xb78   :  { %v981_v17 = vld [vmem:[#allocation5] sm:$0xff] }
 0xb79   :  { %983 = vrot.lane.b32.xlu1 %v981_v17, %s4984_s16  ;;  %v4334_v17 = vpack.c.bf16 %v1157_v16, %v1156_v14 }
 0xbe1   :  { %v880_v18 = vpop.permute.xlu0 %879 }
 0xbe2   :  { %882 = vst.msk [vmem:[#allocation4] sm:$0xff] %vm365_vm1, %v880_v18  ;;  %884 = vst.msk [vmem:[#allocation3 + $0x18] sm:$0xff] %vm365_vm1, %v880_v18  ;;  %v1158_v18 = vld [vmem:[#allocation12 + $0x50] sm:$0xff] }
 0xbe9   :  { %v887_v19 = vld [vmem:[#allocation4] sm:$0xff] }
 0xbea   :  { %3644 = vmatmul.mubr.f32.vlgmr.msra.gmra.mrb[4].mxu1 %v887_v19  ;;  %v1159_v19 = vld [vmem:[#allocation12 + $0x58] sm:$0xff] }
 0xbeb   :  { %3713 = vmatprep.mubr.msk.f32.mxu1 %vm4982_vm0, %v4981_v1  ;;  %v984_v51 = vpop.permute.xlu1 %983  ;;  %4323 = vmatpush3.bf16.msra.mxu1 %v4298_v40 }
 0xbec   :  { %4324 = vmatprep.subr.bf16.mxu1 %v4980_v0 }
 0xbef   :  { %4326 = vmatpush3.bf16.msra.mxu1 %v4325_v46 }
 0xbf0   :  { %4327 = vmatprep.subr.bf16.mxu1 %v4980_v0 }
 0xbf3   :  { %4329 = vmatpush3.bf16.msra.mxu1 %v4328_v59 }
 0xbf4   :  { %4330 = vmatprep.subr.bf16.mxu1 %v4980_v0 }
 0xbf7   :  { %4332 = vmatpush3.bf16.msra.mxu1 %v4331_v13 }
 0xbf8   :  { %4333 = vmatprep.subr.bf16.mxu1 %v4980_v0 }
 0xbfb   :  { %4335 = vmatpush3.bf16.msra.mxu1 %v4334_v17 }
 0xbfc   :  { %4336 = vmatprep.subr.bf16.mxu1 %v4980_v0 }
 0xcbd   :  { %v970_v22 = vpop.f32.mrb[4].mxu1 }
 0xcbe   :  { %v974_v9 = vadd.f32 %v970_v22, %v338_v20  ;;  %v3645_v23 = vpop.f32.mrb[5].mxu1  ;;  %v4337_v20 = vpack.c.bf16 %v1159_v19, %v1158_v18  ;;  %v1160_v22 = vld [vmem:[#allocation12 + $0x60] sm:$0xff] }
 0xcc0   :  { %v975_v24 = vmul.f32 0.5, %v974_v9  ;;  %4338 = vmatpush3.bf16.msra.mxu1 %v4337_v20 }
 0xcc1   :  { %4339 = vmatprep.subr.bf16.mxu1 %v4980_v0 }
 0xcc2   :  { %v976_v25 = vsel %vm5285_vm4, %v974_v9, %v975_v24  ;;  %v1161_v9 = vld [vmem:[#allocation12 + $0x68] sm:$0xff]  ;;  %v1162_v24 = vld [vmem:[#allocation12 + $0x70] sm:$0xff] }
 0xcc3   :  { %4739 = vtanh.f32 %v976_v25  ;;  %v4340_v23 = vpack.c.bf16 %v1161_v9, %v1160_v22  ;;  %v1163_v25 = vld [vmem:[#allocation12 + $0x78] sm:$0xff] }
 0xcc5   :  { %4341 = vmatpush3.bf16.msra.mxu1 %v4340_v23 }
 0xcc6   :  { %4342 = vmatprep.subr.bf16.mxu1 %v4980_v0 }
 0xccd   :  { %v4740_v26 = vpop.eup %4739 }
 0xcce   :  { %v978_v27 = vmul.f32 0.5, %v4740_v26 }
 0xcd0   :  { %v979_v28 = vadd.f32 0.5, %v978_v27  ;;  %v4343_v27 = vpack.c.bf16 %v1163_v25, %v1162_v24 }
 0xcd2   :  { %v980_v29 = vsel %vm5285_vm4, %v4740_v26, %v979_v28  ;;  %v1414_v26 = vld [vmem:[#allocation10 + $0x80] sm:$0xff]  ;;  %v1415_v28 = vld [vmem:[#allocation10 + $0x88] sm:$0xff]  ;;  %4344 = vmatpush3.bf16.msra.mxu1 %v4343_v27 }
 0xcd3   :  { %988 = vrot.lane.b32.xlu0 %v980_v29, %s4983_s29  ;;  %v986_v33 = vmul.f32 %v984_v51, %v980_v29 }
 0xd45   :  { %v989_v30 = vpop.permute.xlu0 %988 }
 0xd46   :  { %v991_v32 = vmul.f32 %v989_v30, %v980_v29 }
 0xd48   :  { %993 = vrot.lane.b32.xlu0 %v991_v32, %s4984_s16 }
 0xdba   :  { %v994_v34 = vpop.permute.xlu0 %993 }
 0xdbb   :  { %v996_v35 = vadd.f32 %v994_v34, %v986_v33 }
 0xdbd   :  { %4741 = vtanh.f32 %v996_v35 }
 0xdc7   :  { %v4742_v36 = vpop.eup %4741 }
 0xdc8   :  { %999 = vrot.lane.b32.xlu1 %v4742_v36, %s4983_s29  ;;  %v1417_v36 = vld [vmem:[#allocation10 + $0x98] sm:$0xff] }
 0xdcc   :  { %1004 = vrot.lane.b32.xlu1 %v996_v35, %s4985_s14  ;;  %v1416_v35 = vld [vmem:[#allocation10 + $0x90] sm:$0xff] }
 0xdcd   :  { %v4373_v38 = vpack.c.bf16 %v1417_v36, %v1416_v35  ;;  %v1560_v36 = vld [vmem:[#allocation12 + $0xa0] sm:$0xff] }
 0xe3a   :  { %v1000_v15 = vpop.permute.xlu1 %999 }
 0xe3b   :  { %v1002_v21 = vmul.f32 %v1000_v15, %v980_v29  ;;  %v4369_v29 = vpack.c.bf16 %v1415_v28, %v1414_v26  ;;  %v1419_v15 = vld [vmem:[#allocation10 + $0xa8] sm:$0xff] }
 0xe3c   :  { %v1557_v28 = vld [vmem:[#allocation12 + $0x88] sm:$0xff] }
 0xe3d   :  { %1009 = vrot.lane.b32.xlu0 %v1002_v21, %s4984_s16  ;;  %4370 = vmatprep.subr.bf16.mxu1 %v4369_v29  ;;  %v1405_v21 = vld [vmem:[#allocation3] sm:$0xff] }
 0xe3e   :  { %v1005_v31 = vpop.permute.xlu1 %1004 }
 0xe3f   :  { %1007 = vst.msk [vmem:[#allocation5] sm:$0xff] %vm365_vm1, %v1005_v31 }
 0xe46   :  { %v1111_v37 = vld [vmem:[#allocation5] sm:$0xff] }
 0xe47   :  { %1113 = vrot.lane.b32.xlu1 %v1111_v37, %s4984_s16  ;;  %v1420_v37 = vld [vmem:[#allocation10 + $0xb0] sm:$0xff] }
 0xeaf   :  { %v1010_v44 = vpop.permute.xlu0 %1009 }
 0xeb0   :  { %1012 = vst.msk [vmem:[#allocation4] sm:$0xff] %vm365_vm1, %v1010_v44  ;;  %1014 = vst.msk [vmem:[#allocation3 + $0x20] sm:$0xff] %vm365_vm1, %v1010_v44  ;;  %v1421_v44 = vld [vmem:[#allocation10 + $0xb8] sm:$0xff] }
 0xeb7   :  { %v1017_v50 = vld [vmem:[#allocation4] sm:$0xff] }
 0xeb8   :  { %3679 = vmatmul.mubr.f32.vlgmr.msra.gmra.mrb[12].mxu0 %v1017_v50  ;;  %v4381_v50 = vpack.c.bf16 %v1421_v44, %v1420_v37  ;;  %v1564_v37 = vld [vmem:[#allocation12 + $0xc0] sm:$0xff]  ;;  %v1565_v44 = vld [vmem:[#allocation12 + $0xc8] sm:$0xff] }
 0xeb9   :  { %4347 = vmatpush3.bf16.msra.mxu0 %v4298_v40  ;;  %3748 = vmatprep.mubr.msk.f32.mxu0 %vm4982_vm0, %v4981_v1  ;;  %v1114_v62 = vpop.permute.xlu1 %1113  ;;  %v1418_v40 = vld [vmem:[#allocation10 + $0xa0] sm:$0xff] }
 0xeba   :  { %4348 = vmatprep.subr.bf16.mxu0 %v4980_v0  ;;  %v4377_v31 = vpack.c.bf16 %v1419_v15, %v1418_v40  ;;  %v1562_v40 = vld [vmem:[#allocation12 + $0xb0] sm:$0xff]  ;;  %v1563_v15 = vld [vmem:[#allocation12 + $0xb8] sm:$0xff] }
 0xebd   :  { %4350 = vmatpush3.bf16.msra.mxu0 %v4325_v46 }
 0xebe   :  { %4351 = vmatprep.subr.bf16.mxu0 %v4980_v0 }
 0xec1   :  { %4353 = vmatpush3.bf16.msra.mxu0 %v4328_v59 }
 0xec2   :  { %4354 = vmatprep.subr.bf16.mxu0 %v4980_v0 }
 0xec5   :  { %4356 = vmatpush3.bf16.msra.mxu0 %v4331_v13 }
 0xec6   :  { %4357 = vmatprep.subr.bf16.mxu0 %v4980_v0 }
 0xec9   :  { %4359 = vmatpush3.bf16.msra.mxu0 %v4334_v17 }
 0xeca   :  { %4360 = vmatprep.subr.bf16.mxu0 %v4980_v0 }
 0xecd   :  { %4362 = vmatpush3.bf16.msra.mxu0 %v4337_v20 }
 0xece   :  { %4363 = vmatprep.subr.bf16.mxu0 %v4980_v0 }
 0xed1   :  { %4365 = vmatpush3.bf16.msra.mxu0 %v4340_v23 }
 0xed2   :  { %4366 = vmatprep.subr.bf16.mxu0 %v4980_v0 }
 0xed5   :  { %4368 = vmatpush3.bf16.msra.mxu0 %v4343_v27  ;;  %v1556_v27 = vld [vmem:[#allocation12 + $0x80] sm:$0xff] }
 0xed6   :  { %4401 = vmatprep.subr.bf16.mxu0 %v4980_v0 }
 0xf8b   :  { %v1100_v41 = vpop.f32.mrb[12].mxu0 }
 0xf8c   :  { %v1104_v42 = vadd.f32 %v1100_v41, %v343_v54  ;;  %v3680_v43 = vpop.f32.mrb[13].mxu0  ;;  %v1422_v54 = vld [vmem:[#allocation10 + $0xc0] sm:$0xff]  ;;  %v1423_v41 = vld [vmem:[#allocation10 + $0xc8] sm:$0xff] }
 0xf8d   :  { %v1424_v43 = vld [vmem:[#allocation10 + $0xd0] sm:$0xff] }
 0xf8e   :  { %v1105_v45 = vmul.f32 0.5, %v1104_v42 }
 0xf90   :  { %v1106_v47 = vsel %vm5285_vm4, %v1104_v42, %v1105_v45  ;;  %v4385_v42 = vpack.c.bf16 %v1423_v41, %v1422_v54  ;;  %v1425_v45 = vld [vmem:[#allocation10 + $0xd8] sm:$0xff]  ;;  %v1566_v54 = vld [vmem:[#allocation12 + $0xd0] sm:$0xff] }
 0xf91   :  { %4743 = vtanh.f32 %v1106_v47  ;;  %v4389_v47 = vpack.c.bf16 %v1425_v45, %v1424_v43  ;;  %v1567_v41 = vld [vmem:[#allocation12 + $0xd8] sm:$0xff]  ;;  %v1568_v43 = vld [vmem:[#allocation12 + $0xe0] sm:$0xff]  ;;  %v1569_v45 = vld [vmem:[#allocation12 + $0xe8] sm:$0xff] }
 0xf9b   :  { %v4744_v48 = vpop.eup %4743 }
 0xf9c   :  { %v1108_v52 = vmul.f32 0.5, %v4744_v48 }
 0xf9e   :  { %v1109_v57 = vadd.f32 0.5, %v1108_v52  ;;  %v1427_v52 = vld [vmem:[#allocation10 + $0xe8] sm:$0xff] }
 0xfa0   :  { %v5448_v60 = vsel %vm5285_vm4, %v4744_v48, %v1109_v57  ;;  %v1426_v48 = vld [vmem:[#allocation10 + $0xe0] sm:$0xff] }
 0xfa1   :  { %1118 = vrot.lane.b32.xlu0 %v5448_v60, %s4983_s29  ;;  %v1116_v63 = vmul.f32 %v1114_v62, %v5448_v60  ;;  %v4393_v57 = vpack.c.bf16 %v1427_v52, %v1426_v48  ;;  %v1406_v62 = vld [vmem:[#allocation3 + $0x8] sm:$0xff]  ;;  %v1570_v48 = vld [vmem:[#allocation12 + $0xf0] sm:$0xff]  ;;  %v1571_v52 = vld [vmem:[#allocation12 + $0xf8] sm:$0xff] }
0x1013   :  { %v1119_v61 = vpop.permute.xlu0 %1118 }
0x1014   :  { %v1121_v49 = vmul.f32 %v1119_v61, %v5448_v60  ;;  %v1429_v61 = vld [vmem:[#allocation10 + $0xf8] sm:$0xff] }
0x1016   :  { %1123 = vrot.lane.b32.xlu0 %v1121_v49, %s4984_s16 }
0x1088   :  { %v1124_v2 = vpop.permute.xlu0 %1123 }
0x1089   :  { %v1126_v4 = vadd.f32 %v1124_v2, %v1116_v63  ;;  %v1407_v63 = vld [vmem:[#allocation3 + $0x10] sm:$0xff]  ;;  %v1408_v2 = vld [vmem:[#allocation3 + $0x18] sm:$0xff] }
0x108b   :  { %4745 = vtanh.f32 %v1126_v4 }
0x1095   :  { %v4746_v5 = vpop.eup %4745 }
0x1096   :  { %1129 = vrot.lane.b32.xlu1 %v4746_v5, %s4983_s29 }
0x109a   :  { %1134 = vrot.lane.b32.xlu1 %v1126_v4, %s4985_s14  ;;  %v1409_v4 = vld [vmem:[#allocation3 + $0x20] sm:$0xff] }
0x1108   :  { %v1130_v30 = vpop.permute.xlu1 %1129 }
0x1109   :  { %v1132_v32 = vmul.f32 %v1130_v30, %v5448_v60  ;;  %v1428_v60 = vld [vmem:[#allocation10 + $0xf0] sm:$0xff] }
0x110a   :  { %v4397_v49 = vpack.c.bf16 %v1429_v61, %v1428_v60 }
0x110b   :  { %1139 = vrot.lane.b32.xlu0 %v1132_v32, %s4984_s16  ;;  %v1558_v32 = vld [vmem:[#allocation12 + $0x90] sm:$0xff] }
0x110c   :  { %v1135_v51 = vpop.permute.xlu1 %1134 }
0x110d   :  { %1137 = vst.msk [vmem:[#allocation5] sm:$0xff] %vm365_vm1, %v1135_v51  ;;  %v1559_v51 = vld [vmem:[#allocation12 + $0x98] sm:$0xff] }
0x1114   :  { %v1241_v33 = vld [vmem:[#allocation5] sm:$0xff] }
0x1115   :  { %1243 = vrot.lane.b32.xlu1 %v1241_v33, %s4984_s16 }
0x117d   :  { %v1140_v34 = vpop.permute.xlu0 %1139 }
0x117e   :  { %1142 = vst.msk [vmem:[#allocation4] sm:$0xff] %vm365_vm1, %v1140_v34  ;;  %1144 = vst.msk [vmem:[#allocation3 + $0x28] sm:$0xff] %vm365_vm1, %v1140_v34  ;;  %v5503_v34 = vpack.c.bf16 %v1559_v51, %v1558_v32 }
0x1185   :  { %v1147_v39 = vld [vmem:[#allocation4] sm:$0xff]  ;;  %v1410_v5 = vld [vmem:[#allocation3 + $0x28] sm:$0xff] }
0x1186   :  { %3714 = vmatmul.mubr.f32.vlgmr.msra.gmra.mrb[6].mxu1 %v1147_v39 }
0x1187   :  { %4372 = vmatpush3.bf16.msra.mxu1 %v4369_v29  ;;  %3783 = vmatprep.mubr.f32.mxu1 %v1405_v21  ;;  %v1244_v9 = vpop.permute.xlu1 %1243  ;;  %v5499_v29 = vpack.c.bf16 %v1557_v28, %v1556_v27  ;;  %v5513_v21 = vpack.c.bf16 %v1563_v15, %v1562_v40 }
0x1188   :  { %4374 = vmatprep.subr.bf16.mxu1 %v4373_v38 }
0x118b   :  { %4376 = vmatpush3.bf16.msra.mxu1 %v4373_v38  ;;  %v1561_v38 = vld [vmem:[#allocation12 + $0xa8] sm:$0xff] }
0x118c   :  { %4378 = vmatprep.subr.bf16.mxu1 %v4377_v31  ;;  %v5509_v39 = vpack.c.bf16 %v1561_v38, %v1560_v36 }
0x118f   :  { %4380 = vmatpush3.bf16.msra.mxu1 %v4377_v31 }
0x1190   :  { %4382 = vmatprep.subr.bf16.mxu1 %v4381_v50 }
0x1193   :  { %4384 = vmatpush3.bf16.msra.mxu1 %v4381_v50  ;;  %v5518_v50 = vpack.c.bf16 %v1565_v44, %v1564_v37 }
0x1194   :  { %4386 = vmatprep.subr.bf16.mxu1 %v4385_v42 }
0x1197   :  { %4388 = vmatpush3.bf16.msra.mxu1 %v4385_v42  ;;  %v5522_v42 = vpack.c.bf16 %v1567_v41, %v1566_v54 }
0x1198   :  { %4390 = vmatprep.subr.bf16.mxu1 %v4389_v47 }
0x119b   :  { %4392 = vmatpush3.bf16.msra.mxu1 %v4389_v47  ;;  %v5526_v47 = vpack.c.bf16 %v1569_v45, %v1568_v43 }
0x119c   :  { %4394 = vmatprep.subr.bf16.mxu1 %v4393_v57 }
0x119f   :  { %4396 = vmatpush3.bf16.msra.mxu1 %v4393_v57  ;;  %v5530_v57 = vpack.c.bf16 %v1571_v52, %v1570_v48 }
0x11a0   :  { %4398 = vmatprep.subr.bf16.mxu1 %v4397_v49 }
0x11a3   :  { %4400 = vmatpush3.bf16.msra.mxu1 %v4397_v49 }
0x11a4   :  { %4425 = vmatprep.subr.bf16.mxu1 %v4980_v0 }
0x11a6   :  { %3784 = vmatmul.mubr.f32.vlgmr.msra.gmra.mrb[8].mxu1 %v1406_v62  ;;  %v4791_v62 = vld [vmem:[%s5844_s4] ss:$0 sm:$0xff] }
0x11a7   :  { %3786 = vmatprep.mubr.f32.mxu1 %v1407_v63  ;;  %4427 = vmatpush3.bf16.msra.mxu1 %v5499_v29  ;;  %v353_v63 = vadd.f32 %v4791_v62, %v5337_v53  ;;  %v5585_v53 = vld [vmem:[%s5844_s4 + $0x1] ss:$0 sm:$0xff] }
0x11a8   :  { %4428 = vmatprep.subr.bf16.mxu1 %v4980_v0 }
0x11aa   :  { %3787 = vmatmul.mubr.f32.gmra.mrb[10].mxu1 %v1408_v2 }
0x11ab   :  { %3789 = vmatprep.mubr.f32.mxu1 %v1409_v4  ;;  %4430 = vmatpush3.bf16.msra.mxu1 %v5503_v34 }
0x11ac   :  { %4431 = vmatprep.subr.bf16.mxu1 %v4980_v0 }
0x11ae   :  { %3790 = vmatmul.mubr.f32.gmra.mrb[12].mxu1 %v1410_v5 }
0x11af   :  { %4433 = vmatpush3.bf16.msra.mxu1 %v5509_v39 }
0x11b0   :  { %4434 = vmatprep.subr.bf16.mxu1 %v4980_v0 }
0x11b3   :  { %4436 = vmatpush3.bf16.msra.mxu1 %v5513_v21 }
0x11b4   :  { %4437 = vmatprep.subr.bf16.mxu1 %v4980_v0 }
0x11b7   :  { %4439 = vmatpush3.bf16.msra.mxu1 %v5518_v50 }
0x11b8   :  { %4440 = vmatprep.subr.bf16.mxu1 %v4980_v0 }
0x11bb   :  { %4442 = vmatpush3.bf16.msra.mxu1 %v5522_v42 }
0x11bc   :  { %4443 = vmatprep.subr.bf16.mxu1 %v4980_v0 }
0x11bf   :  { %4445 = vmatpush3.bf16.msra.mxu1 %v5526_v47 }
0x11c0   :  { %4446 = vmatprep.subr.bf16.mxu1 %v4980_v0 }
0x11c3   :  { %4448 = vmatpush3.bf16.msra.mxu1 %v5530_v57 }
0x11c4   :  { %4473 = vmatprep.subr.bf16.mxu1 %v4980_v0 }
0x1259   :  { %v1230_v7 = vpop.f32.mrb[6].mxu1 }
0x125a   :  { %v1234_v8 = vadd.f32 %v1230_v7, %v348_v6  ;;  %v3715_v46 = vpop.f32.mrb[7].mxu1 }
0x125c   :  { %v1235_v10 = vmul.f32 0.5, %v1234_v8 }
0x125e   :  { %v1236_v59 = vsel %vm5285_vm4, %v1234_v8, %v1235_v10 }
0x125f   :  { %4747 = vtanh.f32 %v1236_v59 }
0x1269   :  { %v4748_v11 = vpop.eup %4747 }
0x126a   :  { %v1238_v12 = vmul.f32 0.5, %v4748_v11 }
0x126c   :  { %v1239_v13 = vadd.f32 0.5, %v1238_v12 }
0x126e   :  { %v1240_v14 = vsel %vm5285_vm4, %v4748_v11, %v1239_v13 }
0x126f   :  { %1248 = vrot.lane.b32.xlu0 %v1240_v14, %s4983_s29  ;;  %v1246_v23 = vmul.f32 %v1244_v9, %v1240_v14 }
0x1279   :  { %v5484_v16 = vpop.f32.mrb[8].mxu1 }
0x127a   :  { %v5486_v17 = vpop.f32.mrb[9].mxu1 }
0x127b   :  { %v1505_v11 = vadd.f32 %v5585_v53, %v5486_v17 }
0x127d   :  { %v5488_v58 = vpop.f32.mrb[10].mxu1 }
0x127e   :  { %v5490_v55 = vpop.f32.mrb[11].mxu1 }
0x1281   :  { %v5492_v18 = vpop.f32.mrb[12].mxu1 }
0x1282   :  { %v5494_v19 = vpop.f32.mrb[13].mxu1 }
0x12e1   :  { %v1249_v20 = vpop.permute.xlu0 %1248 }
0x12e2   :  { %v1251_v22 = vmul.f32 %v1249_v20, %v1240_v14 }
0x12e4   :  { %1253 = vrot.lane.b32.xlu0 %v1251_v22, %s4984_s16 }
0x1356   :  { %v1254_v24 = vpop.permute.xlu0 %1253 }
0x1357   :  { %v1256_v25 = vadd.f32 %v1254_v24, %v1246_v23 }
0x1359   :  { %4749 = vtanh.f32 %v1256_v25 }
0x1363   :  { %v4750_v26 = vpop.eup %4749 }
0x1364   :  { %1259 = vrot.lane.b32.xlu1 %v4750_v26, %s4983_s29 }
0x1368   :  { %1264 = vrot.lane.b32.xlu1 %v1256_v25, %s4985_s14 }
0x13d6   :  { %v1260_v30 = vpop.permute.xlu1 %1259 }
0x13d7   :  { %v1262_v33 = vmul.f32 %v1260_v30, %v1240_v14 }
0x13d9   :  { %1269 = vrot.lane.b32.xlu0 %v1262_v33, %s4984_s16 }
0x13da   :  { %v1265_v35 = vpop.permute.xlu1 %1264 }
0x13db   :  { %1267 = vst.msk [vmem:[#allocation5] sm:$0xff] %vm365_vm1, %v1265_v35 }
0x13e2   :  { %v1371_v31 = vld [vmem:[#allocation5] sm:$0xff] }
0x13e3   :  { %1373 = vrot.lane.b32.xlu1 %v1371_v31, %s4984_s16 }
0x144b   :  { %v1270_v60 = vpop.permute.xlu0 %1269 }
0x144c   :  { %1272 = vst.msk [vmem:[#allocation4] sm:$0xff] %vm365_vm1, %v1270_v60  ;;  %1274 = vst.msk [vmem:[#allocation3 + $0x30] sm:$0xff] %vm365_vm1, %v1270_v60 }
0x1453   :  { %v1277_v61 = vld [vmem:[#allocation4] sm:$0xff]  ;;  %v1411_v49 = vld [vmem:[#allocation3 + $0x30] sm:$0xff] }
0x1454   :  { %3749 = vmatmul.mubr.f32.vlgmr.msra.gmra.mrb[14].mxu0 %v1277_v61  ;;  %3792 = vmatprep.mubr.f32.mxu1 %v1411_v49 }
0x1455   :  { %4403 = vmatpush3.bf16.msra.mxu0 %v5499_v29  ;;  %3827 = vmatprep.mubr.msk.f32.mxu0 %vm4982_vm0, %v4981_v1  ;;  %v1374_v9 = vpop.permute.xlu1 %1373 }
0x1456   :  { %4404 = vmatprep.subr.bf16.mxu0 %v4980_v0 }
0x1459   :  { %4406 = vmatpush3.bf16.msra.mxu0 %v5503_v34 }
0x145a   :  { %4407 = vmatprep.subr.bf16.mxu0 %v4980_v0 }
0x145d   :  { %4409 = vmatpush3.bf16.msra.mxu0 %v5509_v39 }
0x145e   :  { %4410 = vmatprep.subr.bf16.mxu0 %v4980_v0 }
0x1461   :  { %4412 = vmatpush3.bf16.msra.mxu0 %v5513_v21 }
0x1462   :  { %4413 = vmatprep.subr.bf16.mxu0 %v4980_v0 }
0x1465   :  { %4415 = vmatpush3.bf16.msra.mxu0 %v5518_v50 }
0x1466   :  { %4416 = vmatprep.subr.bf16.mxu0 %v4980_v0 }
0x1469   :  { %4418 = vmatpush3.bf16.msra.mxu0 %v5522_v42 }
0x146a   :  { %4419 = vmatprep.subr.bf16.mxu0 %v4980_v0 }
0x146d   :  { %4421 = vmatpush3.bf16.msra.mxu0 %v5526_v47 }
0x146e   :  { %4422 = vmatprep.subr.bf16.mxu0 %v4980_v0 }
0x1471   :  { %4424 = vmatpush3.bf16.msra.mxu0 %v5530_v57 }
0x1472   :  { %4449 = vmatprep.subr.bf16.mxu0 %v4980_v0 }
0x1474   :  { %3828 = vmatmul.mubr.f32.vlgmr.msra.gmra.mrb[16].mxu0 %v4981_v1 }
0x1475   :  { %4451 = vmatpush3.bf16.msra.mxu0 %v5499_v29  ;;  %3897 = vmatprep.mubr.msk.f32.mxu0 %vm4982_vm0, %v4981_v1 }
0x1476   :  { %4452 = vmatprep.subr.bf16.mxu0 %v4980_v0 }
0x1479   :  { %4454 = vmatpush3.bf16.msra.mxu0 %v5503_v34 }
0x147a   :  { %4455 = vmatprep.subr.bf16.mxu0 %v4980_v0 }
0x147d   :  { %4457 = vmatpush3.bf16.msra.mxu0 %v5509_v39 }
0x147e   :  { %4458 = vmatprep.subr.bf16.mxu0 %v4980_v0 }
0x1481   :  { %4460 = vmatpush3.bf16.msra.mxu0 %v5513_v21 }
0x1482   :  { %4461 = vmatprep.subr.bf16.mxu0 %v4980_v0 }
0x1485   :  { %4463 = vmatpush3.bf16.msra.mxu0 %v5518_v50 }
0x1486   :  { %4464 = vmatprep.subr.bf16.mxu0 %v4980_v0 }
0x1489   :  { %4466 = vmatpush3.bf16.msra.mxu0 %v5522_v42 }
0x148a   :  { %4467 = vmatprep.subr.bf16.mxu0 %v4980_v0 }
0x148d   :  { %4469 = vmatpush3.bf16.msra.mxu0 %v5526_v47 }
0x148e   :  { %4470 = vmatprep.subr.bf16.mxu0 %v4980_v0 }
0x1491   :  { %4472 = vmatpush3.bf16.msra.mxu0 %v5530_v57 }
0x1492   :  { %4497 = vmatprep.subr.bf16.mxu0 %v4980_v0 }
0x1527   :  { %v1360_v2 = vpop.f32.mrb[14].mxu0 }
0x1528   :  { %v1364_v4 = vadd.f32 %v1360_v2, %v353_v63  ;;  %v3750_v5 = vpop.f32.mrb[15].mxu0 }
0x152a   :  { %v1365_v6 = vmul.f32 0.5, %v1364_v4 }
0x152c   :  { %v1366_v7 = vsel %vm5285_vm4, %v1364_v4, %v1365_v6  ;;  %v1510_v4 = vadd.f32 %v5484_v16, %v5585_v53 }
0x152d   :  { %4751 = vtanh.f32 %v1366_v7 }
0x1537   :  { %v4752_v8 = vpop.eup %4751 }
0x1538   :  { %v1368_v46 = vmul.f32 0.5, %v4752_v8 }
0x153a   :  { %v1369_v10 = vadd.f32 0.5, %v1368_v46 }
0x153c   :  { %v1370_v59 = vsel %vm5285_vm4, %v4752_v8, %v1369_v10 }
0x153d   :  { %1378 = vrot.lane.b32.xlu0 %v1370_v59, %s4983_s29  ;;  %v1376_v23 = vmul.f32 %v1374_v9, %v1370_v59 }
0x1547   :  { %v1638_v12 = vpop.f32.mrb[16].mxu0 }
0x1548   :  { %v1642_v13 = vadd.f32 %v1638_v12, %v1505_v11  ;;  %v3829_v14 = vpop.f32.mrb[17].mxu0 }
0x154a   :  { %v1643_v27 = vmul.f32 0.5, %v1642_v13 }
0x154c   :  { %v1644_v17 = vsel %vm5285_vm4, %v1642_v13, %v1643_v27 }
0x15af   :  { %v1379_v20 = vpop.permute.xlu0 %1378 }
0x15b0   :  { %v1381_v22 = vmul.f32 %v1379_v20, %v1370_v59 }
0x15b2   :  { %1383 = vrot.lane.b32.xlu0 %v1381_v22, %s4984_s16 }
0x1624   :  { %v1384_v24 = vpop.permute.xlu0 %1383 }
0x1625   :  { %v1386_v25 = vadd.f32 %v1384_v24, %v1376_v23 }
0x1627   :  { %4753 = vtanh.f32 %v1386_v25 }
0x1628   :  { %4755 = vtanh.f32 %v1644_v17 }
0x1631   :  { %v4754_v26 = vpop.eup %4753 }
0x1632   :  { %1389 = vrot.lane.b32.xlu1 %v4754_v26, %s4983_s29  ;;  %v4756_v28 = vpop.eup %4755 }
0x1633   :  { %v1646_v30 = vmul.f32 0.5, %v4756_v28 }
0x1635   :  { %v1647_v33 = vadd.f32 0.5, %v1646_v30  ;;  %v1515_v30 = vadd.f32 %v5585_v53, %v5490_v55 }
0x1636   :  { %1394 = vrot.lane.b32.xlu1 %v1386_v25, %s4985_s14 }
0x1637   :  { %v1648_v36 = vsel %vm5285_vm4, %v4756_v28, %v1647_v33 }
0x16a4   :  { %v1390_v32 = vpop.permute.xlu1 %1389 }
0x16a5   :  { %v1392_v51 = vmul.f32 %v1390_v32, %v1370_v59 }
0x16a7   :  { %1399 = vrot.lane.b32.xlu0 %v1392_v51, %s4984_s16 }
0x16a8   :  { %v1395_v35 = vpop.permute.xlu1 %1394 }
0x16a9   :  { %1397 = vst.msk [vmem:[#allocation5] sm:$0xff] %vm365_vm1, %v1395_v35 }
0x16aa   :  { %1552 = vst.msk [vmem:[#allocation5] sm:$0xff] %vm365_vm1, %v4981_v1 }
0x16ab   :  { %1656 = vrot.lane.b32.xlu0 %v1648_v36, %s4983_s29 }
0x16b1   :  { %v1649_v38 = vld [vmem:[#allocation5] sm:$0xff] }
0x16b2   :  { %1651 = vrot.lane.b32.xlu1 %v1649_v38, %s4984_s16 }
0x1719   :  { %v1400_v40 = vpop.permute.xlu0 %1399 }
0x171a   :  { %1402 = vst.msk [vmem:[#allocation4] sm:$0xff] %vm365_vm1, %v1400_v40  ;;  %1404 = vst.msk [vmem:[#allocation3 + $0x38] sm:$0xff] %vm365_vm1, %v1400_v40 }
0x171b   :  { %1551 = vst [vmem:[#allocation4] sm:$0xff] %v4981_v1 }
0x171d   :  { %v1657_v15 = vpop.permute.xlu0 %1656 }
0x171e   :  { %v1659_v31 = vmul.f32 %v1657_v15, %v1648_v36 }
0x1720   :  { %1661 = vrot.lane.b32.xlu0 %v1659_v31, %s4984_s16 }
0x1721   :  { %v1412_v37 = vld [vmem:[#allocation3 + $0x38] sm:$0xff] }
0x1722   :  { %3793 = vmatmul.mubr.f32.gmra.mrb[14].mxu1 %v1412_v37 }
0x1723   :  { %3862 = vmatprep.mubr.msk.f32.mxu1 %vm4982_vm0, %v4981_v1 }
0x1724   :  { %v1652_v44 = vpop.permute.xlu1 %1651 }
0x1725   :  { %v1654_v54 = vmul.f32 %v1652_v44, %v1648_v36 }
0x1792   :  { %v1662_v41 = vpop.permute.xlu0 %1661 }
0x1793   :  { %v1664_v43 = vadd.f32 %v1662_v41, %v1654_v54 }
0x1795   :  { %4757 = vtanh.f32 %v1664_v43 }
0x179f   :  { %v4758_v45 = vpop.eup %4757 }
0x17a0   :  { %1667 = vrot.lane.b32.xlu1 %v4758_v45, %s4983_s29 }
0x17a4   :  { %1672 = vrot.lane.b32.xlu1 %v1664_v43, %s4985_s14 }
0x17f5   :  { %v5610_v48 = vpop.f32.mrb[14].mxu1 }
0x17f6   :  { %v5612_v52 = vpop.f32.mrb[15].mxu1 }
0x1812   :  { %v1668_v60 = vpop.permute.xlu1 %1667 }
0x1813   :  { %v1670_v61 = vmul.f32 %v1668_v60, %v1648_v36 }
0x1815   :  { %1677 = vrot.lane.b32.xlu0 %v1670_v61, %s4984_s16 }
0x1816   :  { %v1673_v49 = vpop.permute.xlu1 %1672 }
0x1817   :  { %1675 = vst.msk [vmem:[#allocation5] sm:$0xff] %vm365_vm1, %v1673_v49 }
0x181e   :  { %v1776_v62 = vld [vmem:[#allocation5] sm:$0xff] }
0x181f   :  { %1778 = vrot.lane.b32.xlu1 %v1776_v62, %s4984_s16 }
0x1887   :  { %v1678_v63 = vpop.permute.xlu0 %1677 }
0x1888   :  { %1680 = vst.msk [vmem:[#allocation4] sm:$0xff] %vm365_vm1, %v1678_v63 }
0x188f   :  { %v1682_v2 = vld [vmem:[#allocation4] sm:$0xff] }
0x1890   :  { %3863 = vmatmul.mubr.f32.vlgmr.msra.gmra.mrb[16].mxu1 %v1682_v2 }
0x1891   :  { %4475 = vmatpush3.bf16.msra.mxu1 %v5499_v29  ;;  %3932 = vmatprep.mubr.msk.f32.mxu1 %vm4982_vm0, %v4981_v1  ;;  %v1779_v16 = vpop.permute.xlu1 %1778 }
0x1892   :  { %4476 = vmatprep.subr.bf16.mxu1 %v4980_v0 }
0x1895   :  { %4478 = vmatpush3.bf16.msra.mxu1 %v5503_v34 }
0x1896   :  { %4479 = vmatprep.subr.bf16.mxu1 %v4980_v0 }
0x1899   :  { %4481 = vmatpush3.bf16.msra.mxu1 %v5509_v39 }
0x189a   :  { %4482 = vmatprep.subr.bf16.mxu1 %v4980_v0 }
0x189d   :  { %4484 = vmatpush3.bf16.msra.mxu1 %v5513_v21 }
0x189e   :  { %4485 = vmatprep.subr.bf16.mxu1 %v4980_v0 }
0x18a1   :  { %4487 = vmatpush3.bf16.msra.mxu1 %v5518_v50 }
0x18a2   :  { %4488 = vmatprep.subr.bf16.mxu1 %v4980_v0 }
0x18a5   :  { %4490 = vmatpush3.bf16.msra.mxu1 %v5522_v42 }
0x18a6   :  { %4491 = vmatprep.subr.bf16.mxu1 %v4980_v0 }
0x18a9   :  { %4493 = vmatpush3.bf16.msra.mxu1 %v5526_v47 }
0x18aa   :  { %4494 = vmatprep.subr.bf16.mxu1 %v4980_v0 }
0x18ad   :  { %4496 = vmatpush3.bf16.msra.mxu1 %v5530_v57 }
0x18ae   :  { %4521 = vmatprep.subr.bf16.mxu1 %v4980_v0 }
0x1963   :  { %v1765_v5 = vpop.f32.mrb[16].mxu1 }
0x1964   :  { %v1769_v6 = vadd.f32 %v1765_v5, %v1510_v4  ;;  %v3864_v7 = vpop.f32.mrb[17].mxu1  ;;  %v1520_v4 = vadd.f32 %v5488_v58, %v5585_v53 }
0x1966   :  { %v1770_v8 = vmul.f32 0.5, %v1769_v6 }
0x1968   :  { %v1771_v46 = vsel %vm5285_vm4, %v1769_v6, %v1770_v8 }
0x1969   :  { %4759 = vtanh.f32 %v1771_v46 }
0x1973   :  { %v4760_v10 = vpop.eup %4759 }
0x1974   :  { %v1773_v59 = vmul.f32 0.5, %v4760_v10 }
0x1976   :  { %v1774_v11 = vadd.f32 0.5, %v1773_v59 }
0x1978   :  { %v1775_v12 = vsel %vm5285_vm4, %v4760_v10, %v1774_v11 }
0x1979   :  { %1783 = vrot.lane.b32.xlu0 %v1775_v12, %s4983_s29  ;;  %v1781_v20 = vmul.f32 %v1779_v16, %v1775_v12 }
0x19eb   :  { %v1784_v13 = vpop.permute.xlu0 %1783 }
0x19ec   :  { %v1786_v14 = vmul.f32 %v1784_v13, %v1775_v12 }
0x19ee   :  { %1788 = vrot.lane.b32.xlu0 %v1786_v14, %s4984_s16 }
0x1a60   :  { %v1789_v22 = vpop.permute.xlu0 %1788 }
0x1a61   :  { %v1791_v9 = vadd.f32 %v1789_v22, %v1781_v20 }
0x1a63   :  { %4761 = vtanh.f32 %v1791_v9 }
0x1a6d   :  { %v4762_v23 = vpop.eup %4761 }
0x1a6e   :  { %1794 = vrot.lane.b32.xlu1 %v4762_v23, %s4983_s29 }
0x1a72   :  { %1799 = vrot.lane.b32.xlu1 %v1791_v9, %s4985_s14 }
0x1ae0   :  { %v1795_v24 = vpop.permute.xlu1 %1794 }
0x1ae1   :  { %v1797_v25 = vmul.f32 %v1795_v24, %v1775_v12 }
0x1ae3   :  { %1804 = vrot.lane.b32.xlu0 %v1797_v25, %s4984_s16 }
0x1ae4   :  { %v1800_v26 = vpop.permute.xlu1 %1799 }
0x1ae5   :  { %1802 = vst.msk [vmem:[#allocation5] sm:$0xff] %vm365_vm1, %v1800_v26 }
0x1aec   :  { %v1903_v27 = vld [vmem:[#allocation5] sm:$0xff] }
0x1aed   :  { %1905 = vrot.lane.b32.xlu1 %v1903_v27, %s4984_s16 }
0x1b55   :  { %v1805_v17 = vpop.permute.xlu0 %1804 }
0x1b56   :  { %1807 = vst.msk [vmem:[#allocation4] sm:$0xff] %vm365_vm1, %v1805_v17 }
0x1b5d   :  { %v1809_v28 = vld [vmem:[#allocation4] sm:$0xff] }
0x1b5e   :  { %3898 = vmatmul.mubr.f32.vlgmr.msra.gmra.mrb[18].mxu0 %v1809_v28 }
0x1b5f   :  { %4499 = vmatpush3.bf16.msra.mxu0 %v5499_v29  ;;  %3967 = vmatprep.mubr.msk.f32.mxu0 %vm4982_vm0, %v4981_v1  ;;  %v1906_v55 = vpop.permute.xlu1 %1905 }
0x1b60   :  { %4500 = vmatprep.subr.bf16.mxu0 %v4980_v0 }
0x1b63   :  { %4502 = vmatpush3.bf16.msra.mxu0 %v5503_v34 }
0x1b64   :  { %4503 = vmatprep.subr.bf16.mxu0 %v4980_v0 }
0x1b67   :  { %4505 = vmatpush3.bf16.msra.mxu0 %v5509_v39 }
0x1b68   :  { %4506 = vmatprep.subr.bf16.mxu0 %v4980_v0 }
0x1b6b   :  { %4508 = vmatpush3.bf16.msra.mxu0 %v5513_v21 }
0x1b6c   :  { %4509 = vmatprep.subr.bf16.mxu0 %v4980_v0 }
0x1b6f   :  { %4511 = vmatpush3.bf16.msra.mxu0 %v5518_v50 }
0x1b70   :  { %4512 = vmatprep.subr.bf16.mxu0 %v4980_v0 }
0x1b73   :  { %4514 = vmatpush3.bf16.msra.mxu0 %v5522_v42 }
0x1b74   :  { %4515 = vmatprep.subr.bf16.mxu0 %v4980_v0 }
0x1b77   :  { %4517 = vmatpush3.bf16.msra.mxu0 %v5526_v47 }
0x1b78   :  { %4518 = vmatprep.subr.bf16.mxu0 %v4980_v0 }
0x1b7b   :  { %4520 = vmatpush3.bf16.msra.mxu0 %v5530_v57 }
0x1b7c   :  { %4545 = vmatprep.subr.bf16.mxu0 %v4980_v0 }
0x1c31   :  { %v1892_v32 = vpop.f32.mrb[18].mxu0 }
0x1c32   :  { %v1896_v51 = vadd.f32 %v1892_v32, %v1515_v30  ;;  %v3899_v33 = vpop.f32.mrb[19].mxu0 }
0x1c34   :  { %v1897_v35 = vmul.f32 0.5, %v1896_v51 }
0x1c36   :  { %v1898_v36 = vsel %vm5285_vm4, %v1896_v51, %v1897_v35 }
0x1c37   :  { %4763 = vtanh.f32 %v1898_v36 }
0x1c41   :  { %v4764_v38 = vpop.eup %4763 }
0x1c42   :  { %v1900_v40 = vmul.f32 0.5, %v4764_v38 }
0x1c44   :  { %v1901_v15 = vadd.f32 0.5, %v1900_v40 }
0x1c46   :  { %v1902_v31 = vsel %vm5285_vm4, %v4764_v38, %v1901_v15 }
0x1c47   :  { %1910 = vrot.lane.b32.xlu0 %v1902_v31, %s4983_s29  ;;  %v1908_v54 = vmul.f32 %v1906_v55, %v1902_v31 }
0x1cb9   :  { %v1911_v37 = vpop.permute.xlu0 %1910 }
0x1cba   :  { %v1913_v44 = vmul.f32 %v1911_v37, %v1902_v31 }
0x1cbc   :  { %1915 = vrot.lane.b32.xlu0 %v1913_v44, %s4984_s16 }
0x1d2e   :  { %v1916_v41 = vpop.permute.xlu0 %1915 }
0x1d2f   :  { %v1918_v43 = vadd.f32 %v1916_v41, %v1908_v54 }
0x1d31   :  { %4765 = vtanh.f32 %v1918_v43 }
0x1d3b   :  { %v4766_v45 = vpop.eup %4765 }
0x1d3c   :  { %1921 = vrot.lane.b32.xlu1 %v4766_v45, %s4983_s29 }
0x1d40   :  { %1926 = vrot.lane.b32.xlu1 %v1918_v43, %s4985_s14  ;;  %v1530_v43 = vadd.f32 %v5492_v18, %v5585_v53 }
0x1dae   :  { %v1922_v60 = vpop.permute.xlu1 %1921 }
0x1daf   :  { %v1924_v61 = vmul.f32 %v1922_v60, %v1902_v31 }
0x1db1   :  { %1931 = vrot.lane.b32.xlu0 %v1924_v61, %s4984_s16 }
0x1db2   :  { %v1927_v49 = vpop.permute.xlu1 %1926 }
0x1db3   :  { %1929 = vst.msk [vmem:[#allocation5] sm:$0xff] %vm365_vm1, %v1927_v49 }
0x1dba   :  { %v2030_v62 = vld [vmem:[#allocation5] sm:$0xff] }
0x1dbb   :  { %2032 = vrot.lane.b32.xlu1 %v2030_v62, %s4984_s16 }
0x1e23   :  { %v1932_v63 = vpop.permute.xlu0 %1931 }
0x1e24   :  { %1934 = vst.msk [vmem:[#allocation4] sm:$0xff] %vm365_vm1, %v1932_v63 }
0x1e2b   :  { %v1936_v2 = vld [vmem:[#allocation4] sm:$0xff] }
0x1e2c   :  { %3933 = vmatmul.mubr.f32.vlgmr.msra.gmra.mrb[18].mxu1 %v1936_v2 }
0x1e2d   :  { %4523 = vmatpush3.bf16.msra.mxu1 %v5499_v29  ;;  %4002 = vmatprep.mubr.msk.f32.mxu1 %vm4982_vm0, %v4981_v1  ;;  %v2033_v58 = vpop.permute.xlu1 %2032 }
0x1e2e   :  { %4524 = vmatprep.subr.bf16.mxu1 %v4980_v0 }
0x1e31   :  { %4526 = vmatpush3.bf16.msra.mxu1 %v5503_v34 }
0x1e32   :  { %4527 = vmatprep.subr.bf16.mxu1 %v4980_v0 }
0x1e35   :  { %4529 = vmatpush3.bf16.msra.mxu1 %v5509_v39 }
0x1e36   :  { %4530 = vmatprep.subr.bf16.mxu1 %v4980_v0 }
0x1e39   :  { %4532 = vmatpush3.bf16.msra.mxu1 %v5513_v21 }
0x1e3a   :  { %4533 = vmatprep.subr.bf16.mxu1 %v4980_v0 }
0x1e3d   :  { %4535 = vmatpush3.bf16.msra.mxu1 %v5518_v50 }
0x1e3e   :  { %4536 = vmatprep.subr.bf16.mxu1 %v4980_v0 }
0x1e41   :  { %4538 = vmatpush3.bf16.msra.mxu1 %v5522_v42 }
0x1e42   :  { %4539 = vmatprep.subr.bf16.mxu1 %v4980_v0 }
0x1e45   :  { %4541 = vmatpush3.bf16.msra.mxu1 %v5526_v47 }
0x1e46   :  { %4542 = vmatprep.subr.bf16.mxu1 %v4980_v0 }
0x1e49   :  { %4544 = vmatpush3.bf16.msra.mxu1 %v5530_v57 }
0x1e4a   :  { %4569 = vmatprep.subr.bf16.mxu1 %v4980_v0 }
0x1eff   :  { %v2019_v5 = vpop.f32.mrb[18].mxu1 }
0x1f00   :  { %v2023_v6 = vadd.f32 %v2019_v5, %v1520_v4  ;;  %v3934_v7 = vpop.f32.mrb[19].mxu1 }
0x1f02   :  { %v2024_v8 = vmul.f32 0.5, %v2023_v6 }
0x1f04   :  { %v2025_v46 = vsel %vm5285_vm4, %v2023_v6, %v2024_v8 }
0x1f05   :  { %4767 = vtanh.f32 %v2025_v46 }
0x1f0f   :  { %v4768_v10 = vpop.eup %4767 }
0x1f10   :  { %v2027_v59 = vmul.f32 0.5, %v4768_v10 }
0x1f12   :  { %v2028_v11 = vadd.f32 0.5, %v2027_v59 }
0x1f14   :  { %v2029_v12 = vsel %vm5285_vm4, %v4768_v10, %v2028_v11 }
0x1f15   :  { %2037 = vrot.lane.b32.xlu0 %v2029_v12, %s4983_s29  ;;  %v2035_v16 = vmul.f32 %v2033_v58, %v2029_v12 }
0x1f87   :  { %v2038_v13 = vpop.permute.xlu0 %2037 }
0x1f88   :  { %v2040_v14 = vmul.f32 %v2038_v13, %v2029_v12 }
0x1f8a   :  { %2042 = vrot.lane.b32.xlu0 %v2040_v14, %s4984_s16 }
0x1ffc   :  { %v2043_v20 = vpop.permute.xlu0 %2042 }
0x1ffd   :  { %v2045_v22 = vadd.f32 %v2043_v20, %v2035_v16  ;;  %v1535_v20 = vadd.f32 %v5585_v53, %v5612_v52 }
0x1fff   :  { %4769 = vtanh.f32 %v2045_v22 }
0x2009   :  { %v4770_v9 = vpop.eup %4769 }
0x200a   :  { %2048 = vrot.lane.b32.xlu1 %v4770_v9, %s4983_s29 }
0x200e   :  { %2053 = vrot.lane.b32.xlu1 %v2045_v22, %s4985_s14 }
0x207c   :  { %v2049_v23 = vpop.permute.xlu1 %2048 }
0x207d   :  { %v2051_v24 = vmul.f32 %v2049_v23, %v2029_v12 }
0x207f   :  { %2058 = vrot.lane.b32.xlu0 %v2051_v24, %s4984_s16 }
0x2080   :  { %v2054_v25 = vpop.permute.xlu1 %2053 }
0x2081   :  { %2056 = vst.msk [vmem:[#allocation5] sm:$0xff] %vm365_vm1, %v2054_v25 }
0x2088   :  { %v2157_v26 = vld [vmem:[#allocation5] sm:$0xff] }
0x2089   :  { %2159 = vrot.lane.b32.xlu1 %v2157_v26, %s4984_s16 }
0x20f1   :  { %v2059_v27 = vpop.permute.xlu0 %2058 }
0x20f2   :  { %2061 = vst.msk [vmem:[#allocation4] sm:$0xff] %vm365_vm1, %v2059_v27 }
0x20f9   :  { %v2063_v17 = vld [vmem:[#allocation4] sm:$0xff] }
0x20fa   :  { %3968 = vmatmul.mubr.f32.vlgmr.msra.gmra.mrb[20].mxu0 %v2063_v17 }
0x20fb   :  { %4547 = vmatpush3.bf16.msra.mxu0 %v5499_v29  ;;  %4037 = vmatprep.mubr.msk.f32.mxu0 %vm4982_vm0, %v4981_v1  ;;  %v1525_v29 = vadd.f32 %v5585_v53, %v5494_v19  ;;  %v2160_v19 = vpop.permute.xlu1 %2159 }
0x20fc   :  { %4548 = vmatprep.subr.bf16.mxu0 %v4980_v0 }
0x20ff   :  { %4550 = vmatpush3.bf16.msra.mxu0 %v5503_v34 }
0x2100   :  { %4551 = vmatprep.subr.bf16.mxu0 %v4980_v0 }
0x2103   :  { %4553 = vmatpush3.bf16.msra.mxu0 %v5509_v39 }
0x2104   :  { %4554 = vmatprep.subr.bf16.mxu0 %v4980_v0 }
0x2107   :  { %4556 = vmatpush3.bf16.msra.mxu0 %v5513_v21 }
0x2108   :  { %4557 = vmatprep.subr.bf16.mxu0 %v4980_v0 }
0x210b   :  { %4559 = vmatpush3.bf16.msra.mxu0 %v5518_v50 }
0x210c   :  { %4560 = vmatprep.subr.bf16.mxu0 %v4980_v0 }
0x210f   :  { %4562 = vmatpush3.bf16.msra.mxu0 %v5522_v42 }
0x2110   :  { %4563 = vmatprep.subr.bf16.mxu0 %v4980_v0 }
0x2113   :  { %4565 = vmatpush3.bf16.msra.mxu0 %v5526_v47 }
0x2114   :  { %4566 = vmatprep.subr.bf16.mxu0 %v4980_v0 }
0x2117   :  { %4568 = vmatpush3.bf16.msra.mxu0 %v5530_v57 }
0x2118   :  { %4593 = vmatprep.subr.bf16.mxu0 %v4980_v0 }
0x21cd   :  { %v2146_v34 = vpop.f32.mrb[20].mxu0 }
0x21ce   :  { %v2150_v39 = vadd.f32 %v2146_v34, %v1525_v29  ;;  %v3969_v21 = vpop.f32.mrb[21].mxu0 }
0x21d0   :  { %v2151_v50 = vmul.f32 0.5, %v2150_v39 }
0x21d2   :  { %v2152_v42 = vsel %vm5285_vm4, %v2150_v39, %v2151_v50 }
0x21d3   :  { %4771 = vtanh.f32 %v2152_v42 }
0x21dd   :  { %v4772_v28 = vpop.eup %4771 }
0x21de   :  { %v2154_v30 = vmul.f32 0.5, %v4772_v28 }
0x21e0   :  { %v2155_v32 = vadd.f32 0.5, %v2154_v30  ;;  %v2445_v30 = vld [vmem:[#allocation12 + $0x80] sm:$0xff] }
0x21e2   :  { %v2156_v51 = vsel %vm5285_vm4, %v4772_v28, %v2155_v32  ;;  %v2446_v32 = vld [vmem:[#allocation12 + $0x88] sm:$0xff] }
0x21e3   :  { %2164 = vrot.lane.b32.xlu0 %v2156_v51, %s4983_s29  ;;  %v2162_v36 = vmul.f32 %v2160_v19, %v2156_v51 }
0x2255   :  { %v2165_v33 = vpop.permute.xlu0 %2164 }
0x2256   :  { %v2167_v35 = vmul.f32 %v2165_v33, %v2156_v51  ;;  %v4570_v33 = vpack.c.bf16 %v2446_v32, %v2445_v30  ;;  %v2585_v32 = vld [vmem:[#allocation13 + $0x70] sm:$0xff] }
0x2258   :  { %2169 = vrot.lane.b32.xlu0 %v2167_v35, %s4984_s16  ;;  %v2448_v35 = vld [vmem:[#allocation12 + $0x98] sm:$0xff] }
0x22ca   :  { %v2170_v38 = vpop.permute.xlu0 %2169 }
0x22cb   :  { %v2172_v40 = vadd.f32 %v2170_v38, %v2162_v36  ;;  %v2449_v36 = vld [vmem:[#allocation12 + $0xa0] sm:$0xff]  ;;  %v2450_v38 = vld [vmem:[#allocation12 + $0xa8] sm:$0xff] }
0x22cd   :  { %4773 = vtanh.f32 %v2172_v40 }
0x22d7   :  { %v4774_v15 = vpop.eup %4773 }
0x22d8   :  { %2175 = vrot.lane.b32.xlu1 %v4774_v15, %s4983_s29  ;;  %v2451_v15 = vld [vmem:[#allocation12 + $0xb0] sm:$0xff] }
0x22dc   :  { %2180 = vrot.lane.b32.xlu1 %v2172_v40, %s4985_s14  ;;  %v4576_v40 = vpack.c.bf16 %v2450_v38, %v2449_v36  ;;  %v2665_v36 = vld [vmem:[#allocation15] sm:$0xff] }
0x234a   :  { %v2176_v31 = vpop.permute.xlu1 %2175 }
0x234b   :  { %v2178_v37 = vmul.f32 %v2176_v31, %v2156_v51  ;;  %v2447_v51 = vld [vmem:[#allocation12 + $0x90] sm:$0xff]  ;;  %v2452_v31 = vld [vmem:[#allocation12 + $0xb8] sm:$0xff] }
0x234c   :  { %v4573_v19 = vpack.c.bf16 %v2448_v35, %v2447_v51  ;;  %v2586_v51 = vld [vmem:[#allocation13 + $0x78] sm:$0xff]  ;;  %v2666_v35 = vld [vmem:[#allocation15 + $0x8] sm:$0xff] }
0x234d   :  { %2185 = vrot.lane.b32.xlu0 %v2178_v37, %s4984_s16  ;;  %v4579_v37 = vpack.c.bf16 %v2452_v31, %v2451_v15  ;;  %v2670_v15 = vld [vmem:[#allocation15 + $0x28] sm:$0xff]  ;;  %v2672_v31 = vld [vmem:[#allocation15 + $0x38] sm:$0xff] }
0x234e   :  { %v2181_v44 = vpop.permute.xlu1 %2180 }
0x234f   :  { %2183 = vst.msk [vmem:[#allocation5] sm:$0xff] %vm365_vm1, %v2181_v44  ;;  %v2453_v44 = vld [vmem:[#allocation12 + $0xc0] sm:$0xff] }
0x2356   :  { %v2284_v55 = vld [vmem:[#allocation5] sm:$0xff] }
0x2357   :  { %2286 = vrot.lane.b32.xlu1 %v2284_v55, %s4984_s16  ;;  %v2454_v55 = vld [vmem:[#allocation12 + $0xc8] sm:$0xff] }
0x23bf   :  { %v2186_v54 = vpop.permute.xlu0 %2185 }
0x23c0   :  { %2188 = vst.msk [vmem:[#allocation4] sm:$0xff] %vm365_vm1, %v2186_v54  ;;  %v4582_v54 = vpack.c.bf16 %v2454_v55, %v2453_v44  ;;  %v4621_v55 = vpack.c.bf16 %v2672_v31, %v2670_v15 }
0x23c7   :  { %v2190_v41 = vld [vmem:[#allocation4] sm:$0xff] }
0x23c8   :  { %4003 = vmatmul.mubr.f32.vlgmr.msra.gmra.mrb[20].mxu1 %v2190_v41  ;;  %v2455_v41 = vld [vmem:[#allocation12 + $0xd0] sm:$0xff] }
0x23c9   :  { %4072 = vmatprep.mubr.msk.f32.mxu1 %vm4982_vm0, %v4981_v1  ;;  %v2287_v18 = vpop.permute.xlu1 %2286  ;;  %4571 = vmatpush3.bf16.msra.mxu1 %v4570_v33  ;;  %v4615_v33 = vpack.c.bf16 %v2586_v51, %v2585_v32  ;;  %v2800_v32 = vld [vmem:[#allocation16 + $0x90] sm:$0xff]  ;;  %v2801_v51 = vld [vmem:[#allocation16 + $0x98] sm:$0xff] }
0x23ca   :  { %4572 = vmatprep.subr.bf16.mxu1 %v4980_v0 }
0x23cd   :  { %4574 = vmatpush3.bf16.msra.mxu1 %v4573_v19  ;;  %v2668_v19 = vld [vmem:[#allocation15 + $0x18] sm:$0xff] }
0x23ce   :  { %4575 = vmatprep.subr.bf16.mxu1 %v4980_v0  ;;  %v4617_v38 = vpack.c.bf16 %v2668_v19, %v2666_v35  ;;  %v4653_v35 = vpack.c.bf16 %v2801_v51, %v2800_v32  ;;  %v2784_v19 = vld [vmem:[#allocation16 + $0x10] sm:$0xff] }
0x23cf   :  { %v2902_v51 = vld [vmem:[#allocation18 + $0x50] sm:$0xff] }
0x23d1   :  { %4577 = vmatpush3.bf16.msra.mxu1 %v4576_v40  ;;  %v2667_v40 = vld [vmem:[#allocation15 + $0x10] sm:$0xff] }
0x23d2   :  { %4578 = vmatprep.subr.bf16.mxu1 %v4980_v0  ;;  %v4619_v44 = vpack.c.bf16 %v2667_v40, %v2665_v36  ;;  %v2785_v36 = vld [vmem:[#allocation16 + $0x18] sm:$0xff]  ;;  %v2803_v40 = vld [vmem:[#allocation16 + $0xa8] sm:$0xff] }
0x23d3   :  { %v4655_v15 = vpack.c.bf16 %v2785_v36, %v2784_v19  ;;  %v2700_v19 = vshrl.u32 %v215_v56, 7  ;;  %v2906_v56 = vld [vmem:[#allocation18 + $0x70] sm:$0xff] }
0x23d5   :  { %4580 = vmatpush3.bf16.msra.mxu1 %v4579_v37  ;;  %v2701_v36 = vsub.s32 0, %v2700_v19 }
0x23d6   :  { %4581 = vmatprep.subr.bf16.mxu1 %v4980_v0 }
0x23d9   :  { %4583 = vmatpush3.bf16.msra.mxu1 %v4582_v54  ;;  %v2669_v54 = vld [vmem:[#allocation15 + $0x20] sm:$0xff] }
0x23da   :  { %4584 = vmatprep.subr.bf16.mxu1 %v4980_v0 }
0x249b   :  { %v2273_v45 = vpop.f32.mrb[20].mxu1 }
0x249c   :  { %v2277_v60 = vadd.f32 %v2273_v45, %v1530_v43  ;;  %v4004_v61 = vpop.f32.mrb[21].mxu1  ;;  %v2456_v43 = vld [vmem:[#allocation12 + $0xd8] sm:$0xff] }
0x249d   :  { %v4585_v45 = vpack.c.bf16 %v2456_v43, %v2455_v41  ;;  %v2671_v41 = vld [vmem:[#allocation15 + $0x30] sm:$0xff]  ;;  %v2674_v43 = vld [vmem:[#allocation15 + $0x48] sm:$0xff] }
0x249e   :  { %v2278_v49 = vmul.f32 0.5, %v2277_v60 }
0x249f   :  { %4586 = vmatpush3.bf16.msra.mxu1 %v4585_v45 }
0x24a0   :  { %v2279_v62 = vsel %vm5285_vm4, %v2277_v60, %v2278_v49  ;;  %4587 = vmatprep.subr.bf16.mxu1 %v4980_v0 }
0x24a1   :  { %4775 = vtanh.f32 %v2279_v62 }
0x24a3   :  { %4589 = vmatpush3.bf16.msra.mxu1 %v5526_v47  ;;  %v1540_v47 = vadd.f32 %v5610_v48, %v5585_v53 }
0x24a4   :  { %4590 = vmatprep.subr.bf16.mxu1 %v4980_v0 }
0x24a7   :  { %4592 = vmatpush3.bf16.msra.mxu1 %v5530_v57 }
0x24a8   :  { %4618 = vmatprep.subr.bf16.mxu1 %v4617_v38  ;;  %v2802_v38 = vld [vmem:[#allocation16 + $0xa0] sm:$0xff] }
0x24a9   :  { %v4657_v31 = vpack.c.bf16 %v2803_v40, %v2802_v38  ;;  %v2697_v38 = vld [vmem:[%s5848_s8] sm:$0x3]  ;;  %v2705_v40 = vsub.s32 1, %v2700_v19 }
0x24ab   :  { %v4776_v63 = vpop.eup %4775 }
0x24ac   :  { %v2281_v2 = vmul.f32 0.5, %v4776_v63 }
0x24ae   :  { %v2282_v4 = vadd.f32 0.5, %v2281_v2 }
0x24b0   :  { %v2283_v5 = vsel %vm5285_vm4, %v4776_v63, %v2282_v4 }
0x24b1   :  { %2291 = vrot.lane.b32.xlu0 %v2283_v5, %s4983_s29  ;;  %v2289_v8 = vmul.f32 %v2287_v18, %v2283_v5 }
0x2523   :  { %v2292_v6 = vpop.permute.xlu0 %2291 }
0x2524   :  { %v2294_v7 = vmul.f32 %v2292_v6, %v2283_v5 }
0x2526   :  { %2296 = vrot.lane.b32.xlu0 %v2294_v7, %s4984_s16 }
0x2598   :  { %v2297_v46 = vpop.permute.xlu0 %2296 }
0x2599   :  { %v2299_v10 = vadd.f32 %v2297_v46, %v2289_v8 }
0x259b   :  { %4777 = vtanh.f32 %v2299_v10 }
0x25a5   :  { %v4778_v59 = vpop.eup %4777 }
0x25a6   :  { %2302 = vrot.lane.b32.xlu1 %v4778_v59, %s4983_s29 }
0x25aa   :  { %2307 = vrot.lane.b32.xlu1 %v2299_v10, %s4985_s14 }
0x2618   :  { %v2303_v11 = vpop.permute.xlu1 %2302 }
0x2619   :  { %v2305_v12 = vmul.f32 %v2303_v11, %v2283_v5 }
0x261b   :  { %2312 = vrot.lane.b32.xlu0 %v2305_v12, %s4984_s16 }
0x261c   :  { %v2308_v13 = vpop.permute.xlu1 %2307 }
0x261d   :  { %2310 = vst.msk [vmem:[#allocation5] sm:$0xff] %vm365_vm1, %v2308_v13 }
0x2624   :  { %v2411_v14 = vld [vmem:[#allocation5] sm:$0xff] }
0x2625   :  { %2413 = vrot.lane.b32.xlu1 %v2411_v14, %s4984_s16  ;;  %v2571_v14 = vld [vmem:[#allocation13] sm:$0xff] }
0x268d   :  { %v2313_v58 = vpop.permute.xlu0 %2312 }
0x268e   :  { %2315 = vst.msk [vmem:[#allocation4] sm:$0xff] %vm365_vm1, %v2313_v58  ;;  %v2572_v58 = vld [vmem:[#allocation13 + $0x8] sm:$0xff] }
0x268f   :  { %v4594_v3 = vpack.c.bf16 %v2572_v58, %v2571_v14  ;;  %v2685_v14 = vld [vmem:[#allocation15 + $0xa0] sm:$0xff]  ;;  %v2687_v58 = vld [vmem:[#allocation15 + $0xb0] sm:$0xff] }
0x2695   :  { %v2317_v16 = vld [vmem:[#allocation4] sm:$0xff] }
0x2696   :  { %4038 = vmatmul.mubr.f32.vlgmr.msra.gmra.mrb[22].mxu0 %v2317_v16  ;;  %v2573_v16 = vld [vmem:[#allocation13 + $0x10] sm:$0xff] }
0x2697   :  { %4107 = vmatprep.mubr.msk.f32.mxu0 %vm4982_vm0, %v4981_v1  ;;  %v2414_v52 = vpop.permute.xlu1 %2413  ;;  %4595 = vmatpush3.bf16.msra.mxu0 %v4594_v3  ;;  %v2692_v3 = vld [vmem:[#allocation15 + $0xd8] sm:$0xff] }
0x2698   :  { %4596 = vmatprep.subr.bf16.mxu0 %v4980_v0 }
0x2769   :  { %v2400_v22 = vpop.f32.mrb[22].mxu0 }
0x276a   :  { %v2404_v9 = vadd.f32 %v2400_v22, %v1535_v20  ;;  %v4039_v23 = vpop.f32.mrb[23].mxu0  ;;  %v2574_v20 = vld [vmem:[#allocation13 + $0x18] sm:$0xff] }
0x276b   :  { %v4597_v22 = vpack.c.bf16 %v2574_v20, %v2573_v16  ;;  %v2576_v23 = vld [vmem:[#allocation13 + $0x28] sm:$0xff]  ;;  %v4639_v20 = vpack.c.bf16 %v2687_v58, %v2685_v14  ;;  %v2794_v14 = vld [vmem:[#allocation16 + $0x60] sm:$0xff] }
0x276c   :  { %v2405_v24 = vmul.f32 0.5, %v2404_v9  ;;  %v2690_v16 = vld [vmem:[#allocation15 + $0xc8] sm:$0xff] }
0x276d   :  { %4598 = vmatpush3.bf16.msra.mxu0 %v4597_v22  ;;  %v4641_v22 = vpack.c.bf16 %v2692_v3, %v2690_v16  ;;  %v2795_v58 = vld [vmem:[#allocation16 + $0x68] sm:$0xff]  ;;  %v2812_v3 = vld [vmem:[#allocation16 + $0xf0] sm:$0xff] }
0x276e   :  { %v2406_v25 = vsel %vm5285_vm4, %v2404_v9, %v2405_v24  ;;  %v2575_v9 = vld [vmem:[#allocation13 + $0x20] sm:$0xff]  ;;  %4599 = vmatprep.subr.bf16.mxu0 %v4980_v0  ;;  %v4675_v16 = vpack.c.bf16 %v2795_v58, %v2794_v14 }
0x276f   :  { %4779 = vtanh.f32 %v2406_v25  ;;  %v4600_v24 = vpack.c.bf16 %v2576_v23, %v2575_v9  ;;  %v2689_v9 = vld [vmem:[#allocation15 + $0xc0] sm:$0xff]  ;;  %v2691_v23 = vld [vmem:[#allocation15 + $0xd0] sm:$0xff] }
0x2771   :  { %4601 = vmatpush3.bf16.msra.mxu0 %v4600_v24  ;;  %v4643_v24 = vpack.c.bf16 %v2691_v23, %v2689_v9  ;;  %v2796_v9 = vld [vmem:[#allocation16 + $0x70] sm:$0xff]  ;;  %v2797_v23 = vld [vmem:[#allocation16 + $0x78] sm:$0xff] }
0x2772   :  { %4602 = vmatprep.subr.bf16.mxu0 %v4980_v0 }
0x2779   :  { %v4780_v26 = vpop.eup %4779 }
0x277a   :  { %v2408_v27 = vmul.f32 0.5, %v4780_v26 }
0x277c   :  { %v2409_v17 = vadd.f32 0.5, %v2408_v27  ;;  %v2578_v27 = vld [vmem:[#allocation13 + $0x38] sm:$0xff] }
0x277e   :  { %v2410_v29 = vsel %vm5285_vm4, %v4780_v26, %v2409_v17  ;;  %v2577_v26 = vld [vmem:[#allocation13 + $0x30] sm:$0xff] }
0x277f   :  { %2418 = vrot.lane.b32.xlu0 %v2410_v29, %s4983_s29  ;;  %v2416_v21 = vmul.f32 %v2414_v52, %v2410_v29  ;;  %v4603_v17 = vpack.c.bf16 %v2578_v27, %v2577_v26  ;;  %v2581_v52 = vld [vmem:[#allocation13 + $0x50] sm:$0xff]  ;;  %v2694_v27 = vld [vmem:[#allocation15 + $0xe8] sm:$0xff] }
0x2781   :  { %4604 = vmatpush3.bf16.msra.mxu0 %v4603_v17  ;;  %v2696_v17 = vld [vmem:[#allocation15 + $0xf8] sm:$0xff] }
0x2782   :  { %4605 = vmatprep.subr.bf16.mxu0 %v4980_v0 }
0x27f1   :  { %v2419_v34 = vpop.permute.xlu0 %2418 }
0x27f2   :  { %v2421_v39 = vmul.f32 %v2419_v34, %v2410_v29  ;;  %v2580_v34 = vld [vmem:[#allocation13 + $0x48] sm:$0xff] }
0x27f4   :  { %2423 = vrot.lane.b32.xlu0 %v2421_v39, %s4984_s16 }
0x2866   :  { %v2424_v50 = vpop.permute.xlu0 %2423 }
0x2867   :  { %v2426_v42 = vadd.f32 %v2424_v50, %v2416_v21  ;;  %v2582_v21 = vld [vmem:[#allocation13 + $0x58] sm:$0xff] }
0x2868   :  { %v4609_v50 = vpack.c.bf16 %v2582_v21, %v2581_v52  ;;  %v2798_v21 = vld [vmem:[#allocation16 + $0x80] sm:$0xff] }
0x2869   :  { %4781 = vtanh.f32 %v2426_v42 }
0x2873   :  { %v4782_v28 = vpop.eup %4781 }
0x2874   :  { %2429 = vrot.lane.b32.xlu1 %v4782_v28, %s4983_s29  ;;  %v2584_v28 = vld [vmem:[#allocation13 + $0x68] sm:$0xff] }
0x2878   :  { %2434 = vrot.lane.b32.xlu1 %v2426_v42, %s4985_s14  ;;  %v2583_v42 = vld [vmem:[#allocation13 + $0x60] sm:$0xff] }
0x2879   :  { %v4612_v30 = vpack.c.bf16 %v2584_v28, %v2583_v42  ;;  %v2782_v42 = vld [vmem:[#allocation16] sm:$0xff] }
0x28e6   :  { %v2430_v60 = vpop.permute.xlu1 %2429 }
0x28e7   :  { %v2432_v61 = vmul.f32 %v2430_v60, %v2410_v29  ;;  %v2579_v29 = vld [vmem:[#allocation13 + $0x40] sm:$0xff]  ;;  %v2676_v60 = vld [vmem:[#allocation15 + $0x58] sm:$0xff] }
0x28e8   :  { %v4606_v39 = vpack.c.bf16 %v2580_v34, %v2579_v29  ;;  %v4645_v29 = vpack.c.bf16 %v2696_v17, %v2694_v27  ;;  %v2693_v34 = vld [vmem:[#allocation15 + $0xe0] sm:$0xff]  ;;  %v2894_v27 = vld [vmem:[#allocation18 + $0x10] sm:$0xff] }
0x28e9   :  { %2439 = vrot.lane.b32.xlu0 %v2432_v61, %s4984_s16  ;;  %v4623_v61 = vpack.c.bf16 %v2671_v41, %v2669_v54  ;;  %v2805_v54 = vld [vmem:[#allocation16 + $0xb8] sm:$0xff] }
0x28ea   :  { %v2435_v49 = vpop.permute.xlu1 %2434  ;;  %4607 = vmatpush3.bf16.msra.mxu0 %v4606_v39  ;;  %v2695_v39 = vld [vmem:[#allocation15 + $0xf0] sm:$0xff] }
0x28eb   :  { %2437 = vst.msk [vmem:[#allocation5] sm:$0xff] %vm365_vm1, %v2435_v49  ;;  %4608 = vmatprep.subr.bf16.mxu0 %v4980_v0  ;;  %v4625_v49 = vpack.c.bf16 %v2676_v60, %v2674_v43  ;;  %v4647_v52 = vpack.c.bf16 %v2695_v39, %v2693_v34  ;;  %v2789_v60 = vld [vmem:[#allocation16 + $0x38] sm:$0xff]  ;;  %v2897_v39 = vld [vmem:[#allocation18 + $0x28] sm:$0xff] }
0x28ee   :  { %4610 = vmatpush3.bf16.msra.mxu0 %v4609_v50  ;;  %v2799_v50 = vld [vmem:[#allocation16 + $0x88] sm:$0xff] }
0x28ef   :  { %4611 = vmatprep.subr.bf16.mxu0 %v4980_v0  ;;  %v4649_v28 = vpack.c.bf16 %v2799_v50, %v2798_v21  ;;  %v2898_v21 = vld [vmem:[#allocation18 + $0x30] sm:$0xff]  ;;  %v2899_v50 = vld [vmem:[#allocation18 + $0x38] sm:$0xff] }
0x28f2   :  { %v2538_v62 = vld [vmem:[#allocation5] sm:$0xff]  ;;  %4613 = vmatpush3.bf16.msra.mxu0 %v4612_v30  ;;  %v2783_v30 = vld [vmem:[#allocation16 + $0x8] sm:$0xff] }
0x28f3   :  { %2540 = vrot.lane.b32.xlu1 %v2538_v62, %s4984_s16  ;;  %4614 = vmatprep.subr.bf16.mxu0 %v4980_v0  ;;  %v2673_v62 = vld [vmem:[#allocation15 + $0x40] sm:$0xff] }
0x28f6   :  { %4616 = vmatpush3.bf16.msra.mxu0 %v4615_v33  ;;  %v4651_v33 = vpack.c.bf16 %v2783_v30, %v2782_v42  ;;  %v4691_v42 = vpack.c.bf16 %v2899_v50, %v2898_v21  ;;  %v2901_v30 = vld [vmem:[#allocation18 + $0x48] sm:$0xff] }
0x28f7   :  { %4650 = vmatprep.subr.bf16.mxu0 %v4649_v28  ;;  %v2900_v28 = vld [vmem:[#allocation18 + $0x40] sm:$0xff] }
0x28f8   :  { %v4694_v32 = vpack.c.bf16 %v2901_v30, %v2900_v28 }
0x295b   :  { %v2440_v63 = vpop.permute.xlu0 %2439 }
0x295c   :  { %2442 = vst.msk [vmem:[#allocation4] sm:$0xff] %vm365_vm1, %v2440_v63  ;;  %v2675_v63 = vld [vmem:[#allocation15 + $0x50] sm:$0xff] }
0x2963   :  { %v2444_v2 = vld [vmem:[#allocation4] sm:$0xff] }
0x2964   :  { %4073 = vmatmul.mubr.f32.vlgmr.msra.gmra.mrb[22].mxu1 %v2444_v2 }
0x2965   :  { %2773 = vmatprep.mubr.f32.mxu1 %v4981_v1  ;;  %v2541_v48 = vpop.permute.xlu1 %2540  ;;  %4620 = vmatpush1.bf16.msra.mxu1 %v4619_v44  ;;  %v2787_v44 = vld [vmem:[#allocation16 + $0x28] sm:$0xff] }
0x2966   :  { %4622 = vmatprep.subr.bf16.mxu1 %v4621_v55  ;;  %v2804_v55 = vld [vmem:[#allocation16 + $0xb0] sm:$0xff] }
0x2967   :  { %v4661_v43 = vpack.c.bf16 %v2805_v54, %v2804_v55 }
0x2969   :  { %4624 = vmatpush1.bf16.msra.mxu1 %v4623_v61  ;;  %v2806_v61 = vld [vmem:[#allocation16 + $0xc0] sm:$0xff] }
0x296a   :  { %4626 = vmatprep.subr.bf16.mxu1 %v4625_v49  ;;  %v2807_v49 = vld [vmem:[#allocation16 + $0xc8] sm:$0xff] }
0x2a37   :  { %v2527_v57 = vpop.f32.mrb[22].mxu1 }
0x2a38   :  { %v2531_v4 = vadd.f32 %v2527_v57, %v1540_v47  ;;  %v4074_v5 = vpop.f32.mrb[23].mxu1  ;;  %v2678_v47 = vld [vmem:[#allocation15 + $0x68] sm:$0xff]  ;;  %v2680_v57 = vld [vmem:[#allocation15 + $0x78] sm:$0xff] }
0x2a39   :  { %v4629_v5 = vpack.c.bf16 %v2680_v57, %v2678_v47  ;;  %v2791_v47 = vld [vmem:[#allocation16 + $0x48] sm:$0xff]  ;;  %v2808_v57 = vld [vmem:[#allocation16 + $0xd0] sm:$0xff] }
0x2a3a   :  { %v2532_v6 = vmul.f32 0.5, %v2531_v4 }
0x2a3c   :  { %v2533_v7 = vsel %vm5285_vm4, %v2531_v4, %v2532_v6  ;;  %v4627_v4 = vpack.c.bf16 %v2675_v63, %v2673_v62  ;;  %v2677_v6 = vld [vmem:[#allocation15 + $0x60] sm:$0xff]  ;;  %v4665_v63 = vpack.c.bf16 %v2807_v49, %v2806_v61  ;;  %v2907_v49 = vld [vmem:[#allocation18 + $0x78] sm:$0xff] }
0x2a3d   :  { %4783 = vtanh.f32 %v2533_v7  ;;  %v2679_v7 = vld [vmem:[#allocation15 + $0x70] sm:$0xff] }
0x2a3e   :  { %4628 = vmatpush1.bf16.msra.mxu1 %v4627_v4  ;;  %v2809_v4 = vld [vmem:[#allocation16 + $0xd8] sm:$0xff] }
0x2a3f   :  { %4630 = vmatprep.subr.bf16.mxu1 %v4629_v5 }
0x2a47   :  { %v4784_v18 = vpop.eup %4783 }
0x2a48   :  { %v2535_v8 = vmul.f32 0.5, %v4784_v18 }
0x2a4a   :  { %v2536_v46 = vadd.f32 0.5, %v2535_v8  ;;  %v2684_v8 = vld [vmem:[#allocation15 + $0x98] sm:$0xff] }
0x2a4c   :  { %v5794_v10 = vsel %vm5285_vm4, %v4784_v18, %v2536_v46  ;;  %v2682_v18 = vld [vmem:[#allocation15 + $0x88] sm:$0xff]  ;;  %v4631_v46 = vpack.c.bf16 %v2679_v7, %v2677_v6  ;;  %v4669_v6 = vpack.c.bf16 %v2809_v4, %v2808_v57  ;;  %v2792_v7 = vld [vmem:[#allocation16 + $0x50] sm:$0xff] }
0x2a4d   :  { %2545 = vrot.lane.b32.xlu0 %v5794_v10, %s4983_s29  ;;  %v2543_v11 = vmul.f32 %v2541_v48, %v5794_v10  ;;  %v2686_v48 = vld [vmem:[#allocation15 + $0xa8] sm:$0xff] }
0x2a4e   :  { %4632 = vmatpush1.bf16.msra.mxu1 %v4631_v46  ;;  %v2811_v46 = vld [vmem:[#allocation16 + $0xe8] sm:$0xff] }
0x2abf   :  { %v2546_v59 = vpop.permute.xlu0 %2545 }
0x2ac0   :  { %v2548_v53 = vmul.f32 %v2546_v59, %v5794_v10  ;;  %v2681_v59 = vld [vmem:[#allocation15 + $0x80] sm:$0xff] }
0x2ac2   :  { %2550 = vrot.lane.b32.xlu0 %v2548_v53, %s4984_s16  ;;  %v2683_v53 = vld [vmem:[#allocation15 + $0x90] sm:$0xff] }
0x2b34   :  { %v2551_v12 = vpop.permute.xlu0 %2550 }
0x2b35   :  { %v2553_v13 = vadd.f32 %v2551_v12, %v2543_v11  ;;  %v2688_v11 = vld [vmem:[#allocation15 + $0xb8] sm:$0xff]  ;;  %v4635_v12 = vpack.c.bf16 %v2683_v53, %v2681_v59 }
0x2b36   :  { %v3034_v53 = vld [vmem:[%s5846_s6] ss:$0 sm:$0xff] }
0x2b37   :  { %4785 = vtanh.f32 %v2553_v13 }
0x2b41   :  { %v4786_v25 = vpop.eup %4785 }
0x2b42   :  { %2556 = vrot.lane.b32.xlu1 %v4786_v25, %s4983_s29 }
0x2b46   :  { %2561 = vrot.lane.b32.xlu1 %v2553_v13, %s4985_s14  ;;  %v4637_v13 = vpack.c.bf16 %v2688_v11, %v2686_v48 }
0x2bb4   :  { %v2557_v37 = vpop.permute.xlu1 %2556 }
0x2bb5   :  { %v2559_v45 = vmul.f32 %v2557_v37, %v5794_v10  ;;  %v4633_v10 = vpack.c.bf16 %v2684_v8, %v2682_v18  ;;  %v2786_v37 = vld [vmem:[#allocation16 + $0x20] sm:$0xff]  ;;  %v2793_v18 = vld [vmem:[#allocation16 + $0x58] sm:$0xff] }
0x2bb6   :  { %v4659_v41 = vpack.c.bf16 %v2787_v44, %v2786_v37  ;;  %v2810_v8 = vld [vmem:[#allocation16 + $0xe0] sm:$0xff] }
0x2bb7   :  { %2566 = vrot.lane.b32.xlu0 %v2559_v45, %s4984_s16  ;;  %4634 = vmatprep.subr.bf16.mxu1 %v4633_v10  ;;  %v2788_v45 = vld [vmem:[#allocation16 + $0x30] sm:$0xff]  ;;  %v4671_v10 = vpack.c.bf16 %v2793_v18, %v2792_v7  ;;  %v4673_v59 = vpack.c.bf16 %v2811_v46, %v2810_v8 }
0x2bb8   :  { %v2562_v2 = vpop.permute.xlu1 %2561  ;;  %4636 = vmatpush1.bf16.msra.mxu1 %v4635_v12  ;;  %v4663_v62 = vpack.c.bf16 %v2789_v60, %v2788_v45  ;;  %v2904_v45 = vld [vmem:[#allocation18 + $0x60] sm:$0xff]  ;;  %v2905_v60 = vld [vmem:[#allocation18 + $0x68] sm:$0xff] }
0x2bb9   :  { %2564 = vst.msk [vmem:[#allocation5] sm:$0xff] %vm365_vm1, %v2562_v2  ;;  %4638 = vmatprep.subr.bf16.mxu1 %v4637_v13  ;;  %v2790_v2 = vld [vmem:[#allocation16 + $0x40] sm:$0xff]  ;;  %v4700_v61 = vpack.c.bf16 %v2905_v60, %v2904_v45 }
0x2bba   :  { %v4667_v5 = vpack.c.bf16 %v2791_v47, %v2790_v2  ;;  %v3035_v2 = vld [vmem:[%s5850_s10] ss:$0 sm:$0xff] }
0x2bbc   :  { %4640 = vmatpush1.bf16.msra.mxu1 %v4639_v20  ;;  %v2813_v20 = vld [vmem:[#allocation16 + $0xf8] sm:$0xff] }
0x2bbd   :  { %4642 = vmatprep.subr.bf16.mxu1 %v4641_v22  ;;  %v4677_v22 = vpack.c.bf16 %v2813_v20, %v2812_v3 }
0x2bc0   :  { %4644 = vmatpush1.bf16.msra.mxu1 %v4643_v24  ;;  %v4679_v24 = vpack.c.bf16 %v2797_v23, %v2796_v9 }
0x2bc1   :  { %4646 = vmatprep.subr.bf16.mxu1 %v4645_v29  ;;  %v2895_v29 = vld [vmem:[#allocation18 + $0x18] sm:$0xff] }
0x2bc2   :  { %v4685_v34 = vpack.c.bf16 %v2895_v29, %v2894_v27 }
0x2bc4   :  { %4648 = vmatpush1.bf16.msra.mxu1 %v4647_v52 }
0x2bc5   :  { %4681 = vmatprep.subr.bf16.mxu1 %v4980_v0 }
0x2c29   :  { %v2567_v25 = vpop.permute.xlu0 %2566 }
0x2c2a   :  { %2569 = vst.msk [vmem:[#allocation4] sm:$0xff] %vm365_vm1, %v2567_v25  ;;  %v2892_v25 = vld [vmem:[#allocation18] sm:$0xff] }
0x2c31   :  { %v2570_v26 = vld [vmem:[#allocation4] sm:$0xff] }
0x2c32   :  { %4108 = vmatmul.mubr.f32.vlgmr.msra.gmra.mrb[24].mxu0 %v2570_v26  ;;  %v2893_v26 = vld [vmem:[#allocation18 + $0x8] sm:$0xff] }
0x2c33   :  { %4652 = vmatpush3.bf16.msra.mxu0 %v4651_v33  ;;  %v4682_v17 = vpack.c.bf16 %v2893_v26, %v2892_v25  ;;  %v2903_v33 = vld [vmem:[#allocation18 + $0x58] sm:$0xff] }
0x2c34   :  { %4654 = vmatprep.subr.bf16.mxu0 %v4653_v35  ;;  %v4697_v35 = vpack.c.bf16 %v2903_v33, %v2902_v51 }
0x2c37   :  { %4656 = vmatpush3.bf16.msra.mxu0 %v4655_v15  ;;  %v2702_v15 = vrot.slane %v2697_v38, %v2701_v36 }
0x2c38   :  { %4658 = vmatprep.subr.bf16.mxu0 %v4657_v31  ;;  %v2706_v31 = vrot.slane %v2697_v38, %v2705_v40 }
0x2c3b   :  { %4660 = vmatpush3.bf16.msra.mxu0 %v4659_v41 }
0x2c3c   :  { %4662 = vmatprep.subr.bf16.mxu0 %v4661_v43 }
0x2c3f   :  { %4664 = vmatpush3.bf16.msra.mxu0 %v4663_v62  ;;  %v4703_v62 = vpack.c.bf16 %v2907_v49, %v2906_v56 }
0x2c40   :  { %4666 = vmatprep.subr.bf16.mxu0 %v4665_v63 }
0x2c43   :  { %4668 = vmatpush3.bf16.msra.mxu0 %v4667_v5 }
0x2c44   :  { %4670 = vmatprep.subr.bf16.mxu0 %v4669_v6  ;;  %v3036_v6 = vld [vmem:[%s5852_s12] ss:$0 sm:$0xff] }
0x2c47   :  { %4672 = vmatpush3.bf16.msra.mxu0 %v4671_v10 }
0x2c48   :  { %4674 = vmatprep.subr.bf16.mxu0 %v4673_v59 }
0x2c4b   :  { %4676 = vmatpush3.bf16.msra.mxu0 %v4675_v16 }
0x2c4c   :  { %4678 = vmatprep.subr.bf16.mxu0 %v4677_v22 }
0x2c4f   :  { %4680 = vmatpush3.bf16.msra.mxu0 %v4679_v24 }
0x2d05   :  { %v2660_v48 = vpop.f32.mrb[24].mxu0 }
0x2d06   :  { %v2661_v11 = vadd.f32 %v3034_v53, %v2660_v48  ;;  %v4109_v12 = vpop.f32.mrb[25].mxu0 }
0x2d08   :  { %v2664_v13 = vmax.f32 %v2661_v11, 0.0 }
0x2d0a   :  { %2774 = vmatmul.mubr.f32.vlgmr.msra.gmra.mrb[24].mxu1 %v2664_v13 }
0x2d0b   :  { %4142 = vmatprep.mubr.msk.f32.mxu1 %vm4982_vm0, %v4981_v1  ;;  %4683 = vmatpush3.bf16.msra.mxu1 %v4682_v17  ;;  %v2896_v1 = vld [vmem:[#allocation18 + $0x20] sm:$0xff] }
0x2d0c   :  { %4684 = vmatprep.subr.bf16.mxu1 %v4980_v0  ;;  %v4688_v52 = vpack.c.bf16 %v2897_v39, %v2896_v1 }
0x2d0f   :  { %4686 = vmatpush3.bf16.msra.mxu1 %v4685_v34 }
0x2d10   :  { %4687 = vmatprep.subr.bf16.mxu1 %v4980_v0 }
0x2d13   :  { %4689 = vmatpush3.bf16.msra.mxu1 %v4688_v52 }
0x2d14   :  { %4690 = vmatprep.subr.bf16.mxu1 %v4980_v0 }
0x2d17   :  { %4692 = vmatpush3.bf16.msra.mxu1 %v4691_v42 }
0x2d18   :  { %4693 = vmatprep.subr.bf16.mxu1 %v4980_v0 }
0x2d1b   :  { %4695 = vmatpush3.bf16.msra.mxu1 %v4694_v32 }
0x2d1c   :  { %4696 = vmatprep.subr.bf16.mxu1 %v4980_v0 }
0x2d1f   :  { %4698 = vmatpush3.bf16.msra.mxu1 %v4697_v35 }
0x2d20   :  { %4699 = vmatprep.subr.bf16.mxu1 %v4980_v0 }
0x2d23   :  { %4701 = vmatpush3.bf16.msra.mxu1 %v4700_v61 }
0x2d24   :  { %4702 = vmatprep.subr.bf16.mxu1 %v4980_v0 }
0x2d27   :  { %4704 = vmatpush3.bf16.msra.mxu1 %v4703_v62 }
0x2ddd   :  { %v2775_v37 = vpop.f32.mrb[24].mxu1 }
0x2dde   :  { %v2776_v44 = vadd.f32 %v2775_v37, %v2702_v15  ;;  %v2777_v55 = vpop.f32.mrb[25].mxu1 }
0x2ddf   :  { %v2778_v54 = vadd.f32 %v2777_v55, %v2706_v31 }
0x2de0   :  { %v2780_v43 = vmax.f32 %v2776_v44, 0.0 }
0x2de1   :  { %v2781_v41 = vmax.f32 %v2778_v54, 0.0 }
0x2de3   :  { %2885 = vmatprep.mubr.f32.mxu0 %v2781_v41 }
0x2de4   :  { %2886 = vmatmul.mubr.f32.vlgmr.msra.gmra.mrb[26].mxu0 %v2780_v43 }
0x2eb7   :  { %v3407_v63 = vpop.f32.mrb[26].mxu0 }
0x2eb8   :  { %v3408_v47 = vpop.f32.mrb[27].mxu0 }
0x2eb9   :  { %v3409_v57 = vadd.f32 %v3408_v47, %v3407_v63 }
0x2ebb   :  { %v2888_v4 = vadd.f32 %v3409_v57, %v3035_v2 }
0x2ebd   :  { %v2891_v5 = vmax.f32 %v2888_v4, 0.0 }
0x2ebf   :  { %4143 = vmatmul.mubr.f32.vlgmr.msra.gmra.mrb[26].mxu1 %v2891_v5 }
0x2f92   :  { %v2981_v7 = vpop.f32.mrb[26].mxu1 }
0x2f93   :  { %v2982_v0 = vadd.f32 %v3036_v6, %v2981_v7  ;;  %v4144_v18 = vpop.f32.mrb[27].mxu1 }
0x2f95   :  { %v3037_v8 = vmul.f32 -1.442695, %v2982_v0 }
0x2f97   :  { %4787 = vpow2.f32 %v3037_v8 }
0x2fa1   :  { %v4788_v46 = vpop.eup %4787 }
0x2fa2   :  { %v2988_v10 = vadd.f32 1.0, %v4788_v46 }
0x2fa4   :  { %4789 = vrcp.f32 %v2988_v10 }
0x2fae   :  { %v4790_v59 = vpop.eup %4789 }
0x2faf   :  { %2991 = vst [vmem:[%s5853_s13] sm:$0xff] %v4790_v59 }
0x2fb0   :  { %2996 = vsyncpa [#allocation9], 1 }
0x2fb1   :  { %2997 = vsyncpa [#allocation11], 1 }
0x2fb2   :  { %2998 = vsyncpa [#allocation14], 1 }
0x2fb3   :  { %2999 = vsyncpa [#allocation17], 1 }

</bundles_post_ra>
